<compile_context>
chip_gen: v5e
topology: v5e:2x2
jax: 0.10.0
libtpu: 0.0.40
codegen_flags: <defaults>
</compile_context>

<pallas_src>
import functools

import jax
import jax.numpy as jnp
from jax import lax
from jax.experimental import pallas as pl
from jax.experimental.pallas import tpu as pltpu

LANE = 128


def _round_up(v, m):
    return ((v + m - 1) // m) * m


# ------------------------------ fused kernel ------------------------------- #

def _bottleneck_kernel(*refs, H, W, Ho, Wo, stride, has_proj):
    it = iter(refs)
    sel_idx_ref = next(it) if stride > 1 else None
    x_ref = next(it)
    w1_ref = next(it); b1_ref = next(it)
    w2_ref = next(it); b2_ref = next(it)
    w3_ref = next(it); b3_ref = next(it)
    if has_proj:
        wd_ref = next(it); bd_ref = next(it)
    o_ref = next(it)
    halo_ref = next(it)                                  # VMEM (H+2, W+2, Cb_p) f32

    HW = H * W
    cb_p = halo_ref.shape[-1]

    # ---- conv1: 1x1 + bias + ReLU (per-pixel matmul on the MXU) ----
    x_f32 = x_ref[0]                                     # [HW, Cin_p] f32
    x_bf = x_f32.astype(jnp.bfloat16)
    mid = jnp.dot(x_bf, w1_ref[...], preferred_element_type=jnp.float32)
    mid = jnp.maximum(mid + b1_ref[...], 0.0)            # [HW, Cb_p] f32

    # ---- write conv1 output into a zero-padded VMEM halo tile ----
    halo_ref[...] = jnp.zeros_like(halo_ref)
    halo_ref[1:H + 1, 1:W + 1, :] = mid.reshape(H, W, cb_p)

    # ---- conv2: 3x3.  Build the [HW, 9*Cb_p] patch matrix in-kernel from 9
    #      shifted contiguous slices of the halo tile, then one MXU matmul. ----
    taps = []
    for di in range(3):
        for dj in range(3):
            taps.append(halo_ref[di:di + H, dj:dj + W, :].reshape(HW, cb_p))
    patches = jnp.concatenate(taps, axis=1).astype(jnp.bfloat16)   # [HW, 9*Cb_p]
    hid = jnp.dot(patches, w2_ref[...], preferred_element_type=jnp.float32)
    hid = jnp.maximum(hid + b2_ref[...], 0.0)            # stride-1 grid, [HW, Cb_p]

    # ---- spatial stride: subsample rows with an exact 0/1 selection matmul ----
    if stride > 1:
        col = lax.broadcasted_iota(jnp.int32, (Ho * Wo, HW), 1)
        sel = jnp.where(col == sel_idx_ref[...], 1.0, 0.0).astype(jnp.bfloat16)
        hid = jnp.dot(sel, hid.astype(jnp.bfloat16),
                      preferred_element_type=jnp.float32)          # [HoWo, Cb_p]
        res_in = jnp.dot(sel, x_bf, preferred_element_type=jnp.float32)
    else:
        res_in = x_f32

    # ---- conv3: 1x1 (no activation before the residual add) ----
    out = jnp.dot(hid.astype(jnp.bfloat16), w3_ref[...],
                  preferred_element_type=jnp.float32) + b3_ref[...]

    # ---- residual path: identity or 1x1 stride-s projection ----
    if has_proj:
        res = jnp.dot(res_in.astype(jnp.bfloat16), wd_ref[...],
                      preferred_element_type=jnp.float32) + bd_ref[...]
    else:
        res = res_in                                    # exact f32 identity

    # ---- residual add + final ReLU, lane-dense store ----
    o_ref[0] = jnp.maximum(out + res, 0.0).astype(o_ref.dtype)


# ------------------------------ weight prep -------------------------------- #

def _prep_1x1(w, cin_p, cout_p):
    cout, cin = w.shape[0], w.shape[1]
    w2d = jnp.transpose(w[:, :, 0, 0], (1, 0))                      # [Cin, Cout]
    w2d = jnp.pad(w2d, ((0, cin_p - cin), (0, cout_p - cout)))
    return w2d.astype(jnp.bfloat16)


def _prep_3x3(w, cin_p, cout_p):
    cout, cin, kh, kw = w.shape
    wt = jnp.transpose(w, (2, 3, 1, 0))                             # [kh,kw,Cin,Cout]
    wt = jnp.pad(wt, ((0, 0), (0, 0), (0, cin_p - cin), (0, cout_p - cout)))
    return wt.reshape(kh * kw * cin_p, cout_p).astype(jnp.bfloat16)


def _prep_bias(b, c_p):
    return jnp.pad(b, (0, c_p - b.shape[0])).reshape(1, c_p).astype(jnp.float32)


# --------------------------- block forward wrapper -------------------------- #

def quant_res_bottleneck_forward(x_nchw, params):
    """Matches QuantResBottleneckBlock.forward with quantizers disabled:
       residual = x (or downsample(x)); out = relu(conv1(x)); out = relu(conv2(out));
       out = conv3(out); out += residual; out = relu(out)."""
    stride = int(params["stride"])
    has_proj = params.get("proj_w") is not None

    n, cin, h, w = x_nchw.shape
    cb = params["conv1_w"].shape[0]          # bottleneck width
    cout = params["conv3_w"].shape[0]

    if not has_proj:
        assert stride == 1 and cin == cout, \
            "identity residual requires stride == 1 and Cin == Cout"

    ho = (h - 1) // stride + 1
    wo = (w - 1) // stride + 1

    cin_p = _round_up(cin, LANE)
    cb_p = _round_up(cb, LANE)
    cout_p = _round_up(cout, LANE)

    # NCHW -> NHWC, channel-pad to a lane multiple, flatten spatial (layout
    # plumbing only; all compute is inside the fused kernel).
    x = jnp.transpose(x_nchw, (0, 2, 3, 1))
    x = jnp.pad(x, ((0, 0), (0, 0), (0, 0), (0, cin_p - cin)))
    x = x.reshape(n, h * w, cin_p).astype(jnp.float32)

    w1 = _prep_1x1(params["conv1_w"], cin_p, cb_p)
    b1 = _prep_bias(params["conv1_b"], cb_p)
    w2 = _prep_3x3(params["conv2_w"], cb_p, cb_p)
    b2 = _prep_bias(params["conv2_b"], cb_p)
    w3 = _prep_1x1(params["conv3_w"], cb_p, cout_p)
    b3 = _prep_bias(params["conv3_b"], cout_p)

    args = []
    in_specs = []
    if stride > 1:
        oh, ow = jnp.meshgrid(jnp.arange(ho), jnp.arange(wo), indexing="ij")
        sel_idx = (stride * oh * w + stride * ow).reshape(ho * wo, 1)
        args.append(sel_idx.astype(jnp.int32))
        in_specs.append(pl.BlockSpec((ho * wo, 1), lambda i: (0, 0)))

    args += [x, w1, b1, w2, b2, w3, b3]
    in_specs += [
        pl.BlockSpec((1, h * w, cin_p), lambda i: (i, 0, 0)),
        pl.BlockSpec((cin_p, cb_p), lambda i: (0, 0)),
        pl.BlockSpec((1, cb_p), lambda i: (0, 0)),
        pl.BlockSpec((9 * cb_p, cb_p), lambda i: (0, 0)),
        pl.BlockSpec((1, cb_p), lambda i: (0, 0)),
        pl.BlockSpec((cb_p, cout_p), lambda i: (0, 0)),
        pl.BlockSpec((1, cout_p), lambda i: (0, 0)),
    ]
    if has_proj:
        wd = _prep_1x1(params["proj_w"], cin_p, cout_p)
        bd = _prep_bias(params["proj_b"], cout_p)
        args += [wd, bd]
        in_specs += [
            pl.BlockSpec((cin_p, cout_p), lambda i: (0, 0)),
            pl.BlockSpec((1, cout_p), lambda i: (0, 0)),
        ]

    kernel = functools.partial(
        _bottleneck_kernel, H=h, W=w, Ho=ho, Wo=wo, stride=stride,
        has_proj=has_proj)

    out = pl.pallas_call(
        kernel,
        out_shape=jax.ShapeDtypeStruct((n, ho * wo, cout_p), jnp.float32),
        grid_spec=pltpu.PrefetchScalarGridSpec(
            num_scalar_prefetch=0,
            grid=(n,),
            in_specs=in_specs,
            out_specs=pl.BlockSpec((1, ho * wo, cout_p), lambda i: (i, 0, 0)),
            scratch_shapes=[pltpu.VMEM((h + 2, w + 2, cb_p), jnp.float32)],
        ),
        compiler_params=pltpu.CompilerParams(
            dimension_semantics=("parallel",),
        ),
    )(*args)

    out = out.reshape(n, ho, wo, cout_p)[..., :cout]
    return jnp.transpose(out, (0, 3, 1, 2))              # NHWC -> NCHW


# ------------------------------ reference (JAX) ----------------------------- #

def _ref_forward(x, params):
    def conv(x_, w_, b_, stride, padding):
        y = lax.conv_general_dilated(
            x_, w_, (stride, stride), [(padding, padding)] * 2,
            dimension_numbers=("NCHW", "OIHW", "NCHW"))
        return y + b_.reshape(1, -1, 1, 1)

    s = int(params["stride"])
    if params.get("proj_w") is not None:
        residual = conv(x, params["proj_w"], params["proj_b"], s, 0)
    else:
        residual = x
    out = jax.nn.relu(conv(x, params["conv1_w"], params["conv1_b"], 1, 0))
    out = jax.nn.relu(conv(out, params["conv2_w"], params["conv2_b"], s, 1))
    out = conv(out, params["conv3_w"], params["conv3_b"], 1, 0)
    return jax.nn.relu(out + residual)


# ----------------------------------- main ----------------------------------- #

if __name__ == "__main__":
    key = jax.random.PRNGKey(0)
    ks = jax.random.split(key, 16)

    N, H, W = 2, 16, 16

    # Case 1: identity residual (stride 1, Cin == Cout), bottleneck width 8.
    cin, cb, cout = 16, 8, 16
    x1 = jax.random.normal(ks[0], (N, cin, H, W), jnp.float32)
    params1 = dict(
        conv1_w=0.1 * jax.random.normal(ks[1], (cb, cin, 1, 1), jnp.float32),
        conv1_b=0.05 * jax.random.normal(ks[2], (cb,), jnp.float32),
        conv2_w=0.1 * jax.random.normal(ks[3], (cb, cb, 3, 3), jnp.float32),
        conv2_b=0.05 * jax.random.normal(ks[4], (cb,), jnp.float32),
        conv3_w=0.1 * jax.random.normal(ks[5], (cout, cb, 1, 1), jnp.float32),
        conv3_b=0.05 * jax.random.normal(ks[6], (cout,), jnp.float32),
        proj_w=None, proj_b=None, stride=1,
    )
    out1 = jax.block_until_ready(quant_res_bottleneck_forward(x1, params1))
    ref1 = _ref_forward(x1, params1)
    assert out1.shape == (N, cout, H, W)
    assert jnp.allclose(out1, ref1, atol=2e-2, rtol=2e-2), \
        float(jnp.max(jnp.abs(out1 - ref1)))

    # Case 2: projection shortcut (1x1 stride-2 conv, channels 16 -> 32).
    cin, cb, cout, s = 16, 16, 32, 2
    x2 = jax.random.normal(ks[7], (N, cin, H, W), jnp.float32)
    params2 = dict(
        conv1_w=0.1 * jax.random.normal(ks[8], (cb, cin, 1, 1), jnp.float32),
        conv1_b=0.05 * jax.random.normal(ks[9], (cb,), jnp.float32),
        conv2_w=0.1 * jax.random.normal(ks[10], (cb, cb, 3, 3), jnp.float32),
        conv2_b=0.05 * jax.random.normal(ks[11], (cb,), jnp.float32),
        conv3_w=0.1 * jax.random.normal(ks[12], (cout, cb, 1, 1), jnp.float32),
        conv3_b=0.05 * jax.random.normal(ks[13], (cout,), jnp.float32),
        proj_w=0.1 * jax.random.normal(ks[14], (cout, cin, 1, 1), jnp.float32),
        proj_b=0.05 * jax.random.normal(ks[15], (cout,), jnp.float32),
        stride=s,
    )
    out2 = jax.block_until_ready(quant_res_bottleneck_forward(x2, params2))
    ref2 = _ref_forward(x2, params2)
    assert out2.shape == (N, cout, H // s, W // s)
    assert jnp.allclose(out2, ref2, atol=2e-2, rtol=2e-2), \
        float(jnp.max(jnp.abs(out2 - ref2)))

    print("KERNEL_OK")
</pallas_src>

<mosaic_0001>
module attributes {stable_mosaic.version = 11 : i64} {
  func.func @_bottleneck_kernel(%arg0: i32, %arg1: memref<1x256x128xf32, #tpu.memory_space<vmem>>, %arg2: memref<128x128xbf16, #tpu.memory_space<vmem>>, %arg3: memref<1x128xf32, #tpu.memory_space<vmem>>, %arg4: memref<1152x128xbf16, #tpu.memory_space<vmem>>, %arg5: memref<1x128xf32, #tpu.memory_space<vmem>>, %arg6: memref<128x128xbf16, #tpu.memory_space<vmem>>, %arg7: memref<1x128xf32, #tpu.memory_space<vmem>>, %arg8: memref<1x256x128xf32, #tpu.memory_space<vmem>>, %arg9: memref<18x18x128xf32, #tpu.memory_space<vmem>>) attributes {dimension_semantics = [#tpu.dimension_semantics<parallel>], iteration_bounds = array<i64: 2>, scalar_prefetch = 0 : i64, scratch_operands = 1 : i64, tpu.core_type = #tpu.core_type<tc>, window_params = [{transform_indices = @transform_0, window_bounds = array<i64: 1, 256, 128>}, {pipeline_mode = #tpu.pipeline_mode<synchronous>, transform_indices = @transform_1, window_bounds = array<i64: 128, 128>}, {pipeline_mode = #tpu.pipeline_mode<synchronous>, transform_indices = @transform_2, window_bounds = array<i64: 1, 128>}, {pipeline_mode = #tpu.pipeline_mode<synchronous>, transform_indices = @transform_3, window_bounds = array<i64: 1152, 128>}, {pipeline_mode = #tpu.pipeline_mode<synchronous>, transform_indices = @transform_4, window_bounds = array<i64: 1, 128>}, {pipeline_mode = #tpu.pipeline_mode<synchronous>, transform_indices = @transform_5, window_bounds = array<i64: 128, 128>}, {pipeline_mode = #tpu.pipeline_mode<synchronous>, transform_indices = @transform_6, window_bounds = array<i64: 1, 128>}, {transform_indices = @transform_7, window_bounds = array<i64: 1, 256, 128>}]} {
    %c0 = arith.constant 0 : index
    %c0_0 = arith.constant 0 : index
    %c0_1 = arith.constant 0 : index
    %0 = vector.load %arg1[%c0, %c0_0, %c0_1] : memref<1x256x128xf32, #tpu.memory_space<vmem>>, vector<1x256x128xf32>
    %1 = vector.shape_cast %0 : vector<1x256x128xf32> to vector<256x128xf32>
    %2 = arith.truncf %1 : vector<256x128xf32> to vector<256x128xbf16>
    %c0_2 = arith.constant 0 : index
    %c0_3 = arith.constant 0 : index
    %3 = vector.load %arg2[%c0_2, %c0_3] : memref<128x128xbf16, #tpu.memory_space<vmem>>, vector<128x128xbf16>
    %cst = arith.constant dense<0.000000e+00> : vector<256x128xf32>
    %4 = tpu.matmul %2, %3, %cst {dimension_numbers = #tpu.dot_dimension_numbers<[1], [0], [0], [1], [0, 0, 1, 1], [], []>} : vector<256x128xbf16>, vector<128x128xbf16>, vector<256x128xf32> -> vector<256x128xf32>
    %c0_4 = arith.constant 0 : index
    %c0_5 = arith.constant 0 : index
    %5 = vector.load %arg3[%c0_4, %c0_5] : memref<1x128xf32, #tpu.memory_space<vmem>>, vector<1x128xf32>
    %6 = vector.broadcast %5 : vector<1x128xf32> to vector<256x128xf32>
    %7 = arith.addf %4, %6 : vector<256x128xf32>
    %cst_6 = arith.constant 0.000000e+00 : f32
    %8 = vector.broadcast %cst_6 : f32 to vector<256x128xf32>
    %9 = arith.maximumf %7, %8 : vector<256x128xf32>
    %cst_7 = arith.constant 0.000000e+00 : f32
    %10 = vector.broadcast %cst_7 : f32 to vector<18x18x128xf32>
    %c0_8 = arith.constant 0 : index
    %c0_9 = arith.constant 0 : index
    %c0_10 = arith.constant 0 : index
    %11 = vector.load %arg9[%c0_8, %c0_9, %c0_10] : memref<18x18x128xf32, #tpu.memory_space<vmem>>, vector<18x18x128xf32>
    tpu.vector_store %arg9[%c0_8, %c0_9, %c0_10], %10 {strides = array<i32>} : memref<18x18x128xf32, #tpu.memory_space<vmem>>, vector<18x18x128xf32>,
    %12 = vector.shape_cast %9 : vector<256x128xf32> to vector<16x16x128xf32>
    %c1 = arith.constant 1 : index
    %c1_11 = arith.constant 1 : index
    %c0_12 = arith.constant 0 : index
    %13 = vector.load %arg9[%c1, %c1_11, %c0_12] : memref<18x18x128xf32, #tpu.memory_space<vmem>>, vector<16x16x128xf32>
    tpu.vector_store %arg9[%c1, %c1_11, %c0_12], %12 {strides = array<i32>} : memref<18x18x128xf32, #tpu.memory_space<vmem>>, vector<16x16x128xf32>,
    %c0_13 = arith.constant 0 : index
    %c0_14 = arith.constant 0 : index
    %c0_15 = arith.constant 0 : index
    %14 = vector.load %arg9[%c0_13, %c0_14, %c0_15] : memref<18x18x128xf32, #tpu.memory_space<vmem>>, vector<16x16x128xf32>
    %15 = vector.shape_cast %14 : vector<16x16x128xf32> to vector<256x128xf32>
    %c0_16 = arith.constant 0 : index
    %c1_17 = arith.constant 1 : index
    %c0_18 = arith.constant 0 : index
    %16 = vector.load %arg9[%c0_16, %c1_17, %c0_18] : memref<18x18x128xf32, #tpu.memory_space<vmem>>, vector<16x16x128xf32>
    %17 = vector.shape_cast %16 : vector<16x16x128xf32> to vector<256x128xf32>
    %c0_19 = arith.constant 0 : index
    %c2 = arith.constant 2 : index
    %c0_20 = arith.constant 0 : index
    %18 = vector.load %arg9[%c0_19, %c2, %c0_20] : memref<18x18x128xf32, #tpu.memory_space<vmem>>, vector<16x16x128xf32>
    %19 = vector.shape_cast %18 : vector<16x16x128xf32> to vector<256x128xf32>
    %c1_21 = arith.constant 1 : index
    %c0_22 = arith.constant 0 : index
    %c0_23 = arith.constant 0 : index
    %20 = vector.load %arg9[%c1_21, %c0_22, %c0_23] : memref<18x18x128xf32, #tpu.memory_space<vmem>>, vector<16x16x128xf32>
    %21 = vector.shape_cast %20 : vector<16x16x128xf32> to vector<256x128xf32>
    %c1_24 = arith.constant 1 : index
    %c1_25 = arith.constant 1 : index
    %c0_26 = arith.constant 0 : index
    %22 = vector.load %arg9[%c1_24, %c1_25, %c0_26] : memref<18x18x128xf32, #tpu.memory_space<vmem>>, vector<16x16x128xf32>
    %23 = vector.shape_cast %22 : vector<16x16x128xf32> to vector<256x128xf32>
    %c1_27 = arith.constant 1 : index
    %c2_28 = arith.constant 2 : index
    %c0_29 = arith.constant 0 : index
    %24 = vector.load %arg9[%c1_27, %c2_28, %c0_29] : memref<18x18x128xf32, #tpu.memory_space<vmem>>, vector<16x16x128xf32>
    %25 = vector.shape_cast %24 : vector<16x16x128xf32> to vector<256x128xf32>
    %c2_30 = arith.constant 2 : index
    %c0_31 = arith.constant 0 : index
    %c0_32 = arith.constant 0 : index
    %26 = vector.load %arg9[%c2_30, %c0_31, %c0_32] : memref<18x18x128xf32, #tpu.memory_space<vmem>>, vector<16x16x128xf32>
    %27 = vector.shape_cast %26 : vector<16x16x128xf32> to vector<256x128xf32>
    %c2_33 = arith.constant 2 : index
    %c1_34 = arith.constant 1 : index
    %c0_35 = arith.constant 0 : index
    %28 = vector.load %arg9[%c2_33, %c1_34, %c0_35] : memref<18x18x128xf32, #tpu.memory_space<vmem>>, vector<16x16x128xf32>
    %29 = vector.shape_cast %28 : vector<16x16x128xf32> to vector<256x128xf32>
    %c2_36 = arith.constant 2 : index
    %c2_37 = arith.constant 2 : index
    %c0_38 = arith.constant 0 : index
    %30 = vector.load %arg9[%c2_36, %c2_37, %c0_38] : memref<18x18x128xf32, #tpu.memory_space<vmem>>, vector<16x16x128xf32>
    %31 = vector.shape_cast %30 : vector<16x16x128xf32> to vector<256x128xf32>
    %32 = tpu.concatenate %15, %17, %19, %21, %23, %25, %27, %29, %31 in 1 : vector<256x128xf32>, vector<256x128xf32>, vector<256x128xf32>, vector<256x128xf32>, vector<256x128xf32>, vector<256x128xf32>, vector<256x128xf32>, vector<256x128xf32>, vector<256x128xf32> -> vector<256x1152xf32>
    %33 = arith.truncf %32 : vector<256x1152xf32> to vector<256x1152xbf16>
    %c0_39 = arith.constant 0 : index
    %c0_40 = arith.constant 0 : index
    %34 = vector.load %arg4[%c0_39, %c0_40] : memref<1152x128xbf16, #tpu.memory_space<vmem>>, vector<1152x128xbf16>
    %cst_41 = arith.constant dense<0.000000e+00> : vector<256x128xf32>
    %35 = tpu.matmul %33, %34, %cst_41 {dimension_numbers = #tpu.dot_dimension_numbers<[1], [0], [0], [1], [0, 0, 1, 1], [], []>} : vector<256x1152xbf16>, vector<1152x128xbf16>, vector<256x128xf32> -> vector<256x128xf32>
    %c0_42 = arith.constant 0 : index
    %c0_43 = arith.constant 0 : index
    %36 = vector.load %arg5[%c0_42, %c0_43] : memref<1x128xf32, #tpu.memory_space<vmem>>, vector<1x128xf32>
    %37 = vector.broadcast %36 : vector<1x128xf32> to vector<256x128xf32>
    %38 = arith.addf %35, %37 : vector<256x128xf32>
    %cst_44 = arith.constant 0.000000e+00 : f32
    %39 = vector.broadcast %cst_44 : f32 to vector<256x128xf32>
    %40 = arith.maximumf %38, %39 : vector<256x128xf32>
    %41 = arith.truncf %40 : vector<256x128xf32> to vector<256x128xbf16>
    %c0_45 = arith.constant 0 : index
    %c0_46 = arith.constant 0 : index
    %42 = vector.load %arg6[%c0_45, %c0_46] : memref<128x128xbf16, #tpu.memory_space<vmem>>, vector<128x128xbf16>
    %cst_47 = arith.constant dense<0.000000e+00> : vector<256x128xf32>
    %43 = tpu.matmul %41, %42, %cst_47 {dimension_numbers = #tpu.dot_dimension_numbers<[1], [0], [0], [1], [0, 0, 1, 1], [], []>} : vector<256x128xbf16>, vector<128x128xbf16>, vector<256x128xf32> -> vector<256x128xf32>
    %c0_48 = arith.constant 0 : index
    %c0_49 = arith.constant 0 : index
    %44 = vector.load %arg7[%c0_48, %c0_49] : memref<1x128xf32, #tpu.memory_space<vmem>>, vector<1x128xf32>
    %45 = vector.broadcast %44 : vector<1x128xf32> to vector<256x128xf32>
    %46 = arith.addf %43, %45 : vector<256x128xf32>
    %47 = arith.addf %46, %1 : vector<256x128xf32>
    %cst_50 = arith.constant 0.000000e+00 : f32
    %48 = vector.broadcast %cst_50 : f32 to vector<256x128xf32>
    %49 = arith.maximumf %47, %48 : vector<256x128xf32>
    %c0_51 = arith.constant 0 : index
    %c0_52 = arith.constant 0 : index
    %c0_53 = arith.constant 0 : index
    %50 = vector.load %arg8[%c0_51, %c0_52, %c0_53] : memref<1x256x128xf32, #tpu.memory_space<vmem>>, vector<1x256x128xf32>
    %51 = vector.shape_cast %50 : vector<1x256x128xf32> to vector<256x128xf32>
    %52 = vector.shape_cast %49 : vector<256x128xf32> to vector<1x256x128xf32>
    tpu.vector_store %arg8[%c0_51, %c0_52, %c0_53], %52 {strides = array<i32>} : memref<1x256x128xf32, #tpu.memory_space<vmem>>, vector<1x256x128xf32>,
    return
  }
  func.func @transform_0(%arg0: i32) -> (i32, i32, i32) {
    %c0_i32 = arith.constant 0 : i32
    %c0_i32_0 = arith.constant 0 : i32
    %c0_i32_1 = arith.constant 0 : i32
    return %arg0, %c0_i32, %c0_i32_0 : i32, i32, i32
  }
  func.func @transform_1(%arg0: i32) -> (i32, i32) {
    %c0_i32 = arith.constant 0 : i32
    %c0_i32_0 = arith.constant 0 : i32
    %c0_i32_1 = arith.constant 0 : i32
    return %c0_i32, %c0_i32_0 : i32, i32
  }
  func.func @transform_2(%arg0: i32) -> (i32, i32) {
    %c0_i32 = arith.constant 0 : i32
    %c0_i32_0 = arith.constant 0 : i32
    %c0_i32_1 = arith.constant 0 : i32
    return %c0_i32, %c0_i32_0 : i32, i32
  }
  func.func @transform_3(%arg0: i32) -> (i32, i32) {
    %c0_i32 = arith.constant 0 : i32
    %c0_i32_0 = arith.constant 0 : i32
    %c0_i32_1 = arith.constant 0 : i32
    return %c0_i32, %c0_i32_0 : i32, i32
  }
  func.func @transform_4(%arg0: i32) -> (i32, i32) {
    %c0_i32 = arith.constant 0 : i32
    %c0_i32_0 = arith.constant 0 : i32
    %c0_i32_1 = arith.constant 0 : i32
    return %c0_i32, %c0_i32_0 : i32, i32
  }
  func.func @transform_5(%arg0: i32) -> (i32, i32) {
    %c0_i32 = arith.constant 0 : i32
    %c0_i32_0 = arith.constant 0 : i32
    %c0_i32_1 = arith.constant 0 : i32
    return %c0_i32, %c0_i32_0 : i32, i32
  }
  func.func @transform_6(%arg0: i32) -> (i32, i32) {
    %c0_i32 = arith.constant 0 : i32
    %c0_i32_0 = arith.constant 0 : i32
    %c0_i32_1 = arith.constant 0 : i32
    return %c0_i32, %c0_i32_0 : i32, i32
  }
  func.func @transform_7(%arg0: i32) -> (i32, i32, i32) {
    %c0_i32 = arith.constant 0 : i32
    %c0_i32_0 = arith.constant 0 : i32
    %c0_i32_1 = arith.constant 0 : i32
    return %arg0, %c0_i32, %c0_i32_0 : i32, i32, i32
  }
}

</mosaic_0001>

<bundles_post_ra>
// kernel: tpu_custom_call.1
= control target key start
LH: loop header
LB: loop body
LE: loop exit
PB: predicated region body
PF: predicated region fallthrough
CT: control target
= control target key end

     0   :  { %s5009_s0 = inlined_call_operand.hbm [shape: f32[2,256,128], index: 0, kind: input, shape index: {}]   ;;  %s5010_s1 = inlined_call_operand.hbm [shape: bf16[128,128], index: 1, kind: input, shape index: {}]   ;;  %s5011_s2 = inlined_call_operand.vmem [shape: f32[1,128], index: 2, kind: input, shape index: {}]   ;;  %s5012_s3 = inlined_call_operand.hbm [shape: bf16[1152,128], index: 3, kind: input, shape index: {}]   ;;  %s5013_s4 = inlined_call_operand.vmem [shape: f32[1,128], index: 4, kind: input, shape index: {}]   ;;  %s5014_s5 = inlined_call_operand.hbm [shape: bf16[128,128], index: 5, kind: input, shape index: {}]   ;;  %s5015_s6 = inlined_call_operand.vmem [shape: f32[1,128], index: 6, kind: input, shape index: {}]   ;;  %s5016_s7 = inlined_call_operand.hbm [shape: f32[2,256,128], index: 7, kind: output, shape index: {}]  }
   0x1   :  { %5018 = sst [smem:[#allocation94_spill]] %s5010_s1 }
   0x2   :  { %12 = vsyncpa [#allocation4], 0 }
   0x3   :  { %14 = vsyncpa [#allocation4 + $0x1], 0 }
   0x4   :  { %15 = vsyncpa [#allocation7], 0 }
   0x5   :  { %16 = vsyncpa [#allocation10], 0 }
   0x6   :  { %17 = vsyncpa [#allocation5], 0 }
   0x7   :  { %19 = vsyncpa [#allocation5 + $0x1], 0  ;;  %s3760_s24 = smov 0   ;;  %s3762_s25 = smov 0  }
   0x8   :  { %s3764_s26 = smov 0   ;;  %s3766_s27 = smov 0  }
   0x9 LB: > { %s3781_s28 = sadd.s32 4294967295, %s3707_s27   ;;  %s2906_s29 = sadd.s32 4294967294, %s3707_s27   ;;  %s3707_s27 = sphi %s3766_s27, %s5187_s27   ;;  %s3703_s26 = sphi %s3764_s26, %s5186_s26   ;;  %s3699_s25 = sphi %s3762_s25, %s5185_s25   ;;  %s3695_s24 = sphi %s3760_s24, %s5184_s24  }
   0xa   : > { %p45_p0 = scmp.ne.s32.totalorder %s3699_s25, %s3695_s24  ;;  %p46_p1 = scmp.eq.s32.totalorder %s3781_s28, 0 }
   0xb   : > { %p195_p2 = scmp.eq.s32.totalorder %s3781_s28, 1  ;;  %p201_p3 = scmp.eq.s32.totalorder %s2906_s29, 1 }
   0xc   : > { %p3790_p4 = por %p46_p1, %p45_p0  ;;  %p2907_p5 = scmp.ge.s32.totalorder %s3707_s27, 1 }
   0xd   : > { %p3795_p6 = por %p201_p3, %p45_p0  ;;  %p208_p7 = scmp.lt.s32.totalorder %s3707_s27, 3 }
   0xe   : > { %s5021_s1 = sld [smem:[#allocation94_spill]]  ;;  %s3709_s13 = smov [#allocation6]  }
   0xf   : > { %p3803_p8 = pnand %p2907_p5, %p208_p7  ;;  %s221_s14 = sshll.u32 %s3709_s13, 4  ;;  %s222_s14 = int_to_ptr.vmem [resolvable:$true] %s221_s14 }
  0x10   : > { %s236_s18 = sshll.u32 %s5012_s3, 4  ;;  %s3710_s19 = smov 64   ;;  %s237_s18 = int_to_ptr.hbm [resolvable:$true] %s236_s18 }
  0x11   : > { %p3408_p9 = pneg %p3803_p8  ;;  %s3711_s20 = smov 4  }
  0x12   : > { %s3712_s21 = smov [#allocation8]   ;;  %s253_s9 = sshll.u32 %s5014_s5, 4  ;;  %s254_s9 = int_to_ptr.hbm [resolvable:$true] %s253_s9 }
  0x13   : > { %p3811_p10 = pnand %p3408_p9, %p46_p1  ;;  %s238_s22 = sshll.u32 %s3712_s21, 4  ;;  %s239_s22 = int_to_ptr.vmem [resolvable:$true] %s238_s22 }
  0x14   : > { %s219_s11 = sshll.u32 %s5021_s1, 4  ;;  %s3713_s10 = smov [#allocation9]   ;;  %s220_s11 = int_to_ptr.hbm [resolvable:$true] %s219_s11 }
  0x15   : > { %3411 = dma.hbm_to_vmem [thread:$0]  (!%p3811_p10), %s220_s11, 1024, %s222_s14, [#allocation7], %s3710_s19, %s3710_s19, %s3711_s20  }
  0x16   : > { %3414 = dma.hbm_to_vmem [thread:$0]  (!%p3811_p10), %s237_s18, 9216, %s239_s22, [#allocation7], %s3710_s19, %s3710_s19, %s3711_s20  }
  0x17   : > { %s255_s13 = sshll.u32 %s3713_s10, 4  ;;  %s3827_s11 = sadd.s32 1, %s3707_s27   ;;  %s256_s13 = int_to_ptr.vmem [resolvable:$true] %s255_s13 }
  0x18   : > { %3417 = dma.hbm_to_vmem [thread:$0]  (!%p3811_p10), %s254_s9, 1024, %s256_s13, [#allocation10], %s3710_s19, %s3710_s19, %s3711_s20  }
  0x19   : > { %s29_s14 = ssub.s32 %s3707_s27, %s3827_s11  ;;  %s32_s16 = sadd.s32 1, %s3703_s26 }
  0x1a   : > { %p30_p12 = scmp.eq.s32.totalorder %s29_s14, 0  ;;  %p39_p13 = scmp.ne.s32.totalorder %s3703_s26, %s3699_s25 }
  0x1b   : > { %p40_p0 = scmp.eq.s32.totalorder %s3707_s27, 0  ;;  %p3429_p3 = scmp.lt.s32.totalorder %s3707_s27, 2 }
  0x1c   : > { %s3839_s17 = scalar_select %p30_p12, %s3703_s26, %s32_s16  }
  0x1d   : > { %p41_p5 = por %p40_p0, %p39_p13  ;;  %p3843_p7 = por %p195_p2, %p39_p13 }
  0x1e   : > { %s272_s21 = sand.u32 1, %s3703_s26   ;;  %s3278_s22 = sshll.u32 %s3707_s27, 8 }
  0x1f   : > { %s2912_s15 = sshll.u32 %s272_s21, 8  ;;  %s281_s20 = scalar_lea.hbm %s5009_s0, %s3278_s22 }
  0x20   : > { %s282_s29 = sshll.u32 %s281_s20, 4  ;;  %s276_s9 = scalar_lea.vmem [#allocation3], %s2912_s15  ;;  %s283_s29 = int_to_ptr.hbm [resolvable:$true] %s282_s29 }
  0x21   : > { %s284_s10 = sshll.u32 %s276_s9, 4  ;;  %p3854_p9 = pnand %p3429_p3, %p41_p5  ;;  %s285_s10 = int_to_ptr.vmem [resolvable:$true] %s284_s10 }
  0x22   : > { %s273_s14 = scalar_lea.sflag [#allocation4], %s272_s21  ;;  %s3603_s16 = sshra.s32 %s283_s29, 4  ;;  %s3604_s16 = int_to_ptr.hbm [resolvable:$true] %s3603_s16 }
  0x23   : > { %s3605_s1 = scalar_lea.hbm %s3604_s16, 256  ;;  %p3607_p10 = pneg %p3854_p9 }
  0x24   : > { %p3606_p2 = scmp.ne.s32.totalorder %s3604_s16, %s3605_s1  ;;  %s3610_s23 = scalar_lea.hbm %s5009_s0, 512 }
  0x25   : > { %p3611_p0 = scmp.lt.s32.totalorder %s3604_s16, %s5009_s0  ;;  %p3612_p3 = scmp.lt.s32.totalorder %s3610_s23, %s3605_s1 }
  0x26   : > { %p3608_p12 = pnand %p3607_p10, %p3606_p2 }
  0x27   : > { %p3613_p5 = por %p3612_p3, %p3611_p0 }
  0x28   : > { %p3609_p13 = pneg %p3608_p12 }
  0x2a   : > { %p3614_p11 = pnand %p3613_p5, %p3609_p13 }
  0x2c   : > { %3617 = shalt.err (!%p3614_p11)
}
  0x2d   : > { %s3714_s21 = smov 128   ;;  %s3715_s9 = smov 8  }
  0x2e   : > { %3421 = dma.hbm_to_vmem [thread:$0]  (!%p3854_p9), %s283_s29, 4096, %s285_s10, %s273_s14, %s3714_s21, %s3714_s21, %s3715_s9  }
  0x2f   : > { %296 = sbr.rel (%p3803_p8) target bundleno = 1340 (0x53c), region = 48 }
  0x34   : > { %s3871_s22 = sand.u32 1, %s3699_s25  }
  0x35   : > { %s2916_s16 = sshll.u32 %s3871_s22, 8  ;;  %s299_s1 = scalar_lea.sflag [#allocation4], %s3871_s22 }
  0x36   : > { %s3877_s15 = scalar_lea.vmem [#allocation3], %s2916_s16 }
  0x37   : > { %3678 = dma.done.wait (%p3790_p4), %s299_s1, 4096  }
  0x38   : > { %3680 = vsyncadd (%p3790_p4), %s299_s1, 4294963200 }
  0x39   : > { %3682 = dma.done.wait (%p46_p1), [#allocation7], 10240  }
  0x3a   : > { %3684 = vsyncadd (%p46_p1), [#allocation7], 4294957056 }
  0x3b   : > { %3686 = dma.done.wait (%p46_p1), [#allocation10], 1024  }
  0x3c   : > { %3688 = vsyncadd (%p46_p1), [#allocation10], 4294966272  ;;  %v3286_v0 = vld [vmem:[#allocation6 + $0x38] sm:$0xff]  ;;  %v3285_v1 = vld [vmem:[#allocation6 + $0x30] sm:$0xff]  ;;  %v3716_v37 = vmov 0.0   ;;  %v3717_v49 = vmov 0.0|0.0  }
  0x3d   : > { %465 = vmatpush.bf16.msra.mxu0 %v3286_v0  ;;  %3368 = vmatpush.bf16.msra.mxu3 %v3286_v0  ;;  %v3284_v2 = vld [vmem:[#allocation6 + $0x28] sm:$0xff]  ;;  %v3283_v3 = vld [vmem:[#allocation6 + $0x20] sm:$0xff]  ;;  %v3282_v4 = vld [vmem:[#allocation6 + $0x18] sm:$0xff]  ;;  %589 = vst [vmem:[#allocation2 + $0x18] sm:$0xff] %v3716_v37  ;;  %s4833_s20 = scalar_lea.vmem [#allocation11], %s2916_s16  ;;  %s3367_s21 = sshll.u32 %s3781_s28, 8 }
  0x3e   : > { %v3281_v5 = vld [vmem:[#allocation6 + $0x10] sm:$0xff]  ;;  %v3280_v6 = vld [vmem:[#allocation6 + $0x8] sm:$0xff]  ;;  %v3279_v7 = vld [vmem:[#allocation6] sm:$0xff]  ;;  %590 = vst [vmem:[#allocation2 + $0x20] sm:$0xff] %v3716_v37  ;;  %s2800_s1 = scalar_lea.hbm %s5016_s7, %s3367_s21  ;;  %s2801_s30 = sshll.u32 %s4833_s20, 4  ;;  %s2802_s30 = int_to_ptr.vmem [resolvable:$true] %s2801_s30 }
  0x3f   : > { %v349_v8 = vld [vmem:[%s3877_s15] sm:$0xff]  ;;  %v350_v9 = vld [vmem:[%s3877_s15 + $0x8] sm:$0xff]  ;;  %v351_v11 = vld [vmem:[%s3877_s15 + $0x10] sm:$0xff]  ;;  %586 = vst [vmem:[#allocation2] sm:$0xff] %v3716_v37  ;;  %s2803_s12 = sshll.u32 %s2800_s1, 4  ;;  %s2789_s29 = scalar_lea.sflag [#allocation5], %s3871_s22  ;;  %s2804_s12 = int_to_ptr.hbm [resolvable:$true] %s2803_s12 }
  0x40   : > { %v381_v10 = vpack.c.bf16 %v350_v9, %v349_v8  ;;  %v352_v12 = vld [vmem:[%s3877_s15 + $0x18] sm:$0xff]  ;;  %v353_v14 = vld [vmem:[%s3877_s15 + $0x20] sm:$0xff]  ;;  %v354_v15 = vld [vmem:[%s3877_s15 + $0x28] sm:$0xff]  ;;  %587 = vst [vmem:[#allocation2 + $0x8] sm:$0xff] %v3716_v37  ;;  %s3647_s28 = sshra.s32 %s2804_s12, 4  ;;  %s3653_s23 = scalar_lea.hbm %s5016_s7, 512  ;;  %s3648_s28 = int_to_ptr.hbm [resolvable:$true] %s3647_s28 }
  0x41   : > { %466 = vmatpush.bf16.msra.mxu0 %v3285_v1  ;;  %3369 = vmatpush.bf16.msra.mxu3 %v3285_v1  ;;  %v382_v13 = vpack.c.bf16 %v352_v12, %v351_v11  ;;  %v383_v16 = vpack.c.bf16 %v354_v15, %v353_v14  ;;  %v355_v17 = vld [vmem:[%s3877_s15 + $0x30] sm:$0xff]  ;;  %v356_v18 = vld [vmem:[%s3877_s15 + $0x38] sm:$0xff]  ;;  %v357_v20 = vld [vmem:[%s3877_s15 + $0x40] sm:$0xff]  ;;  %588 = vst [vmem:[#allocation2 + $0x10] sm:$0x3] %v3716_v37  ;;  %s3649_s10 = scalar_lea.hbm %s3648_s28, 256  ;;  %p3654_p11 = scmp.lt.s32.totalorder %s3648_s28, %s5016_s7 }
  0x42   : > { %v384_v19 = vpack.c.bf16 %v356_v18, %v355_v17  ;;  %v358_v21 = vld [vmem:[%s3877_s15 + $0x48] sm:$0xff]  ;;  %v3901_v22 = vld [vmem:[#allocation8 + $0x78] sm:$0xff]  ;;  %v3904_v24 = vld [vmem:[#allocation8 + $0x70] sm:$0xff]  ;;  %591 = vst [vmem:[#allocation2 + $0x28] sm:$0x3] %v3716_v37  ;;  %p3650_p1 = scmp.ne.s32.totalorder %s3648_s28, %s3649_s10  ;;  %p3655_p9 = scmp.lt.s32.totalorder %s3653_s23, %s3649_s10 }
  0x43   : > { %v385_v23 = vpack.c.bf16 %v358_v21, %v357_v20  ;;  %1775 = vmatpush.bf16.msra.mxu2 %v3901_v22  ;;  %v3294_v25 = vld [vmem:[#allocation8 + $0x38] sm:$0xff]  ;;  %v3907_v26 = vld [vmem:[#allocation8 + $0x68] sm:$0xff]  ;;  %v3293_v27 = vld [vmem:[#allocation8 + $0x30] sm:$0xff]  ;;  %592 = vst [vmem:[#allocation2 + $0x30] sm:$0xff] %v3716_v37 }
  0x44   : > { %1686 = vmatpush.bf16.msra.mxu1 %v3294_v25  ;;  %v3292_v28 = vld [vmem:[#allocation8 + $0x28] sm:$0xff]  ;;  %v3910_v29 = vld [vmem:[#allocation8 + $0x60] sm:$0xff]  ;;  %v359_v30 = vld [vmem:[%s3877_s15 + $0x50] sm:$0xff]  ;;  %593 = vst [vmem:[#allocation2 + $0x38] sm:$0xff] %v3716_v37  ;;  %p3651_p4 = pnand %p3650_p1, %p3843_p7  ;;  %p3656_p2 = por %p3655_p9, %p3654_p11 }
  0x45   : > { %467 = vmatpush.bf16.msra.mxu0 %v3284_v2  ;;  %3370 = vmatpush.bf16.msra.mxu3 %v3284_v2  ;;  %v360_v31 = vld [vmem:[%s3877_s15 + $0x58] sm:$0xff]  ;;  %v3291_v34 = vld [vmem:[#allocation8 + $0x20] sm:$0xff]  ;;  %v3918_v35 = vld [vmem:[#allocation8 + $0x50] sm:$0xff]  ;;  %594 = vst [vmem:[#allocation2 + $0x40] sm:$0x3] %v3716_v37 }
  0x46   : > { %v3915_v32 = vld [vmem:[#allocation8 + $0x58] sm:$0xff]  ;;  %v386_v33 = vpack.c.bf16 %v360_v31, %v359_v30  ;;  %v3923_v38 = vld [vmem:[#allocation8 + $0x48] sm:$0xff]  ;;  %v3289_v39 = vld [vmem:[#allocation8 + $0x10] sm:$0xff]  ;;  %595 = vst [vmem:[#allocation2 + $0x48] sm:$0xff] %v3716_v37  ;;  %p3652_p8 = pneg %p3651_p4 }
  0x47   : > { %1776 = vmatpush.bf16.msra.mxu2 %v3904_v24  ;;  %v3290_v36 = vld [vmem:[#allocation8 + $0x18] sm:$0xff]  ;;  %v3930_v40 = vld [vmem:[#allocation8 + $0x40] sm:$0xff]  ;;  %v362_v42 = vld [vmem:[%s3877_s15 + $0x68] sm:$0xff]  ;;  %596 = vst [vmem:[#allocation2 + $0x50] sm:$0xff] %v3716_v37 }
  0x48   : > { %1687 = vmatpush.bf16.msra.mxu1 %v3293_v27  ;;  %v361_v41 = vld [vmem:[%s3877_s15 + $0x60] sm:$0xff]  ;;  %v3288_v43 = vld [vmem:[#allocation8 + $0x8] sm:$0xff]  ;;  %v705_v45 = vld [vmem:[#allocation2 + $0x1] sm:$0xff]  ;;  %597 = vst [vmem:[#allocation2 + $0x58] sm:$0x3] %v3716_v37  ;;  %p3657_p10 = pnand %p3656_p2, %p3652_p8 }
  0x49   : > { %468 = vmatpush.bf16.msra.mxu0 %v3283_v3  ;;  %3371 = vmatpush.bf16.msra.mxu3 %v3283_v3  ;;  %v387_v44 = vpack.c.bf16 %v362_v42, %v361_v41  ;;  %v706_v46 = vld [vmem:[#allocation2 + $0x9] sm:$0xff]  ;;  %598 = vst [vmem:[#allocation2 + $0x60] sm:$0xff] %v3716_v37  ;;  %v363_v50 = vld [vmem:[%s3877_s15 + $0x70] sm:$0xff]  ;;  %v366_v54 = vld [vmem:[%s3877_s15 + $0x88] sm:$0xff] }
  0x4a   : > { %v963_v47 = vpack.c.bf16 %v706_v46, %v705_v45  ;;  %599 = vst [vmem:[#allocation2 + $0x68] sm:$0xff] %v3716_v37  ;;  %v3287_v48 = vld [vmem:[#allocation8] sm:$0xff]  ;;  %v364_v51 = vld [vmem:[%s3877_s15 + $0x78] sm:$0xff]  ;;  %v3976_v55 = vld [vmem:[%s5011_s2] ss:$0 sm:$0xff] }
  0x4b   : > { %1777 = vmatpush.bf16.msra.mxu2 %v3907_v26  ;;  %600 = vst [vmem:[#allocation2 + $0x70] sm:$0x3] %v3716_v37  ;;  %v388_v52 = vpack.c.bf16 %v364_v51, %v363_v50  ;;  %v365_v53 = vld [vmem:[%s3877_s15 + $0x80] sm:$0xff]  ;;  %v3318_v59 = vld [vmem:[#allocation8 + $0xf8] sm:$0xff]  ;;  %v3317_v61 = vld [vmem:[#allocation8 + $0xf0] sm:$0xff] }
  0x4c   : > { %1688 = vmatpush.bf16.msra.mxu1 %v3292_v28  ;;  %601 = vst [vmem:[#allocation2 + $0x78] sm:$0xff] %v3716_v37  ;;  %v389_v56 = vpack.c.bf16 %v366_v54, %v365_v53  ;;  %v3316_v0 = vld [vmem:[#allocation8 + $0xe8] sm:$0xff]  ;;  %v367_v2 = vld [vmem:[%s3877_s15 + $0x90] sm:$0xff]  ;;  %v368_v3 = vld [vmem:[%s3877_s15 + $0x98] sm:$0xff] }
  0x4d   : > { %469 = vmatpush.bf16.msra.mxu0 %v3282_v4  ;;  %3372 = vmatpush.bf16.msra.mxu3 %v3282_v4  ;;  %602 = vst [vmem:[#allocation2 + $0x80] sm:$0xff] %v3716_v37  ;;  %v3314_v9 = vld [vmem:[#allocation8 + $0xd8] sm:$0xff]  ;;  %v374_v11 = vld [vmem:[%s3877_s15 + $0xc8] sm:$0xff]  ;;  %v3313_v17 = vld [vmem:[#allocation8 + $0xd0] sm:$0xff] }
  0x4e   : > { %603 = vst [vmem:[#allocation2 + $0x88] sm:$0x3] %v3716_v37  ;;  %v3312_v20 = vld [vmem:[#allocation8 + $0xc8] sm:$0xff] }
  0x4f   : > { %1778 = vmatpush.bf16.msra.mxu2 %v3910_v29  ;;  %604 = vst [vmem:[#allocation2 + $0x90] sm:$0xff] %v3716_v37 }
  0x50   : > { %1689 = vmatpush.bf16.msra.mxu1 %v3291_v34  ;;  %605 = vst [vmem:[#allocation2 + $0x98] sm:$0xff] %v3716_v37 }
  0x51   : > { %470 = vmatpush.bf16.msra.mxu0 %v3281_v5  ;;  %3373 = vmatpush.bf16.msra.mxu3 %v3281_v5  ;;  %606 = vst [vmem:[#allocation2 + $0xa0] sm:$0x3] %v3716_v37  ;;  %v3315_v5 = vld [vmem:[#allocation8 + $0xe0] sm:$0xff] }
  0x52   : > { %607 = vst [vmem:[#allocation2 + $0xa8] sm:$0xff] %v3716_v37 }
  0x53   : > { %1779 = vmatpush.bf16.msra.mxu2 %v3915_v32  ;;  %608 = vst [vmem:[#allocation2 + $0xb0] sm:$0xff] %v3716_v37 }
  0x54   : > { %1690 = vmatpush.bf16.msra.mxu1 %v3290_v36  ;;  %609 = vst [vmem:[#allocation2 + $0xb8] sm:$0x3] %v3716_v37 }
  0x55   : > { %471 = vmatpush.bf16.msra.mxu0 %v3280_v6  ;;  %3374 = vmatpush.bf16.msra.mxu3 %v3280_v6  ;;  %610 = vst [vmem:[#allocation2 + $0xc0] sm:$0xff] %v3716_v37  ;;  %v390_v6 = vpack.c.bf16 %v368_v3, %v367_v2 }
  0x56   : > { %611 = vst [vmem:[#allocation2 + $0xc8] sm:$0xff] %v3716_v37 }
  0x57   : > { %1780 = vmatpush.bf16.msra.mxu2 %v3918_v35  ;;  %612 = vst [vmem:[#allocation2 + $0xd0] sm:$0x3] %v3716_v37 }
  0x58   : > { %1691 = vmatpush.bf16.msra.mxu1 %v3289_v39  ;;  %613 = vst [vmem:[#allocation2 + $0xd8] sm:$0xff] %v3716_v37 }
  0x59   : > { %472 = vmatpush.bf16.msra.mxu0 %v3279_v7  ;;  %3375 = vmatpush.bf16.msra.mxu3 %v3279_v7  ;;  %614 = vst [vmem:[#allocation2 + $0xe0] sm:$0xff] %v3716_v37 }
  0x5a   : > { %615 = vst [vmem:[#allocation2 + $0xe8] sm:$0x3] %v3716_v37 }
  0x5b   : > { %1781 = vmatpush.bf16.msra.mxu2 %v3923_v38  ;;  %616 = vst [vmem:[#allocation2 + $0xf0] sm:$0xff] %v3716_v37 }
  0x5c   : > { %473 = vmatmul.bf16.vlgmr.msra.gmra.mxu0 %v381_v10  ;;  %1692 = vmatpush.bf16.msra.mxu1 %v3288_v43  ;;  %617 = vst [vmem:[#allocation2 + $0xf8] sm:$0xff] %v3716_v37  ;;  %v373_v10 = vld [vmem:[%s3877_s15 + $0xc0] sm:$0xff] }
  0x5d   : > { %3376 = vmatpush.bf16.msrb.mxu3 %v3294_v25  ;;  %618 = vst [vmem:[#allocation2 + $0x100] sm:$0x3] %v3716_v37  ;;  %1953 = vmatpush.bf16.msrb.mxu0 %v3318_v59  ;;  %v370_v25 = vld [vmem:[%s3877_s15 + $0xa8] sm:$0xff] }
  0x5e   : > { %619 = vst [vmem:[#allocation2 + $0x108] sm:$0xff] %v3716_v37 }
  0x5f   : > { %1782 = vmatpush.bf16.msra.mxu2 %v3930_v40  ;;  %620 = vst [vmem:[#allocation2 + $0x110] sm:$0xff] %v3716_v37 }
  0x60   : > { %1693 = vmatpush.bf16.msra.mxu1 %v3287_v48  ;;  %621 = vst [vmem:[#allocation2 + $0x118] sm:$0x3] %v3716_v37 }
  0x61   : > { %3377 = vmatpush.bf16.msrb.mxu3 %v3293_v27  ;;  %622 = vst [vmem:[#allocation2 + $0x120] sm:$0xff] %v3716_v37  ;;  %1954 = vmatpush.bf16.msrb.mxu0 %v3317_v61 }
  0x62   : > { %1783 = vmatmul.bf16.vlgmr.msra.gmra.mxu2 %v963_v47  ;;  %623 = vst [vmem:[#allocation2 + $0x128] sm:$0xff] %v3716_v37 }
  0x63   : > { %1694 = vmatmul.bf16.vlgmr.msra.gmra.mxu1 %v3717_v49  ;;  %624 = vst [vmem:[#allocation2 + $0x130] sm:$0x3] %v3716_v37  ;;  %v378_v49 = vld [vmem:[%s3877_s15 + $0xe8] sm:$0xff] }
  0x64   : > { %625 = vst [vmem:[#allocation2 + $0x138] sm:$0xff] %v3716_v37 }
  0x65   : > { %3378 = vmatpush.bf16.msrb.mxu3 %v3292_v28  ;;  %626 = vst [vmem:[#allocation2 + $0x140] sm:$0xff] %v3716_v37  ;;  %1955 = vmatpush.bf16.msrb.mxu0 %v3316_v0  ;;  %v3311_v28 = vld [vmem:[#allocation8 + $0xc0] sm:$0xff] }
  0x66   : > { %627 = vst [vmem:[#allocation2 + $0x148] sm:$0x3] %v3716_v37 }
  0x67   : > { %628 = vst [vmem:[#allocation2 + $0x150] sm:$0xff] %v3716_v37 }
  0x68   : > { %629 = vst [vmem:[#allocation2 + $0x158] sm:$0xff] %v3716_v37 }
  0x69   : > { %3379 = vmatpush.bf16.msrb.mxu3 %v3291_v34  ;;  %630 = vst [vmem:[#allocation2 + $0x160] sm:$0x3] %v3716_v37  ;;  %1956 = vmatpush.bf16.msrb.mxu0 %v3315_v5  ;;  %v376_v34 = vld [vmem:[%s3877_s15 + $0xd8] sm:$0xff] }
  0x6a   : > { %631 = vst [vmem:[#allocation2 + $0x168] sm:$0xff] %v3716_v37 }
  0x6b   : > { %632 = vst [vmem:[#allocation2 + $0x170] sm:$0xff] %v3716_v37 }
  0x6c   : > { %478 = vmatmul.bf16.gmra.mxu0 %v382_v13  ;;  %633 = vst [vmem:[#allocation2 + $0x178] sm:$0x3] %v3716_v37  ;;  %v393_v13 = vpack.c.bf16 %v374_v11, %v373_v10 }
  0x6d   : > { %3380 = vmatpush.bf16.msrb.mxu3 %v3290_v36  ;;  %634 = vst [vmem:[#allocation2 + $0x180] sm:$0xff] %v3716_v37  ;;  %1957 = vmatpush.bf16.msrb.mxu0 %v3314_v9 }
  0x6e   : > { %635 = vst [vmem:[#allocation2 + $0x188] sm:$0xff] %v3716_v37  ;;  %533 = vmatmul.bf16.vlgmr.msra.gmra.mxu3 %v393_v13 }
  0x6f   : > { %636 = vst [vmem:[#allocation2 + $0x190] sm:$0x3] %v3716_v37 }
  0x70   : > { %637 = vst [vmem:[#allocation2 + $0x198] sm:$0xff] %v3716_v37 }
  0x71   : > { %3381 = vmatpush.bf16.msrb.mxu3 %v3289_v39  ;;  %638 = vst [vmem:[#allocation2 + $0x1a0] sm:$0xff] %v3716_v37  ;;  %1958 = vmatpush.bf16.msrb.mxu0 %v3313_v17 }
  0x72   : > { %639 = vst [vmem:[#allocation2 + $0x1a8] sm:$0x3] %v3716_v37 }
  0x75   : > { %3382 = vmatpush.bf16.msrb.mxu3 %v3288_v43  ;;  %1959 = vmatpush.bf16.msrb.mxu0 %v3312_v20  ;;  %v371_v43 = vld [vmem:[%s3877_s15 + $0xb0] sm:$0xff] }
  0x76   : > { %v4053_v20 = vld [vmem:[%s5013_s4] ss:$0 sm:$0xff] }
  0x79   : > { %3383 = vmatpush.bf16.msrb.mxu3 %v3287_v48  ;;  %1960 = vmatpush.bf16.msrb.mxu0 %v3311_v28  ;;  %v377_v48 = vld [vmem:[%s3877_s15 + $0xe0] sm:$0xff] }
  0x7c   : > { %483 = vmatmul.bf16.gmra.mxu0 %v383_v16 }
  0x7d   : > { %3384 = vmatpush.bf16.msra.mxu3 %v3901_v22 }
  0x81   : > { %3385 = vmatpush.bf16.msra.mxu3 %v3904_v24 }
  0x85   : > { %3386 = vmatpush.bf16.msra.mxu3 %v3907_v26 }
  0x89   : > { %3387 = vmatpush.bf16.msra.mxu3 %v3910_v29 }
  0x8c   : > { %488 = vmatmul.bf16.gmra.mxu0 %v384_v19 }
  0x8d   : > { %3388 = vmatpush.bf16.msra.mxu3 %v3915_v32 }
  0x91   : > { %3389 = vmatpush.bf16.msra.mxu3 %v3918_v35  ;;  %v395_v35 = vpack.c.bf16 %v378_v49, %v377_v48  ;;  %v3334_v48 = vld [vmem:[#allocation8 + $0x178] sm:$0xff] }
  0x92   : > { %2131 = vmatpush.bf16.msrb.mxu2 %v3334_v48  ;;  %v3319_v48 = vld [vmem:[#allocation8 + $0x100] sm:$0xff] }
  0x95   : > { %3390 = vmatpush.bf16.msra.mxu3 %v3923_v38 }
  0x99   : > { %3391 = vmatpush.bf16.msra.mxu3 %v3930_v40 }
  0x9c   : > { %493 = vmatmul.bf16.gmra.mxu0 %v385_v23  ;;  %v369_v23 = vld [vmem:[%s3877_s15 + $0xa0] sm:$0xff] }
  0x9d   : > { %v391_v22 = vpack.c.bf16 %v370_v25, %v369_v23 }
  0xac   : > { %498 = vmatmul.bf16.gmra.mxu0 %v386_v33  ;;  %v375_v33 = vld [vmem:[%s3877_s15 + $0xd0] sm:$0xff] }
  0xad   : > { %v394_v36 = vpack.c.bf16 %v376_v34, %v375_v33 }
  0xaf   : > { %538 = vmatmul.bf16.gmra.mxu3 %v394_v36 }
  0xbc   : > { %503 = vmatmul.bf16.gmra.mxu0 %v387_v44  ;;  %v372_v44 = vld [vmem:[%s3877_s15 + $0xb8] sm:$0xff] }
  0xbd   : > { %v392_v46 = vpack.c.bf16 %v372_v44, %v371_v43 }
  0xbf   : > { %543 = vmatmul.bf16.gmra.mxu3 %v395_v35  ;;  %v3333_v35 = vld [vmem:[#allocation8 + $0x170] sm:$0xff] }
  0xc0   : > { %2132 = vmatpush.bf16.msrb.mxu2 %v3333_v35 }
  0xcc   : > { %508 = vmatmul.bf16.gmra.mxu0 %v388_v52 }
  0xd9   : > { %v474_v57 = vpop.f32.mrf.mxu0 }
  0xda   : > { %v475_v58 = vadd.f32 %v3976_v55, %v474_v57 }
  0xdc   : > { %v554_v60 = vmax.f32 %v475_v58, 0.0  ;;  %513 = vmatmul.bf16.gmra.mxu0 %v389_v56 }
  0xde   : > { %641 = vst [vmem:[#allocation2 + $0x19] sm:$0xff] %v554_v60 }
  0xe0   : > { %v1695_v23 = vpop.f32.mrf.mxu1 }
  0xe1   : > { %v476_v62 = vpop.f32.mrf.mxu0  ;;  %v1696_v28 = vadd.f32 %v4053_v20, %v1695_v23 }
  0xe2   : > { %v477_v63 = vadd.f32 %v3976_v55, %v476_v62 }
  0xe4   : > { %v555_v1 = vmax.f32 %v477_v63, 0.0 }
  0xe5   : > { %v675_v14 = vld [vmem:[#allocation2 + $0x18] sm:$0xff] }
  0xe6   : > { %642 = vst [vmem:[#allocation2 + $0x21] sm:$0xff] %v555_v1  ;;  %v3996_v4 = vpack.c.bf16 %v555_v1, %v554_v60 }
  0xe8   : > { %1788 = vmatmul.bf16.gmra.mxu2 %v3996_v4 }
  0xe9   : > { %v479_v7 = vpop.f32.mrf.mxu0 }
  0xea   : > { %v480_v8 = vadd.f32 %v3976_v55, %v479_v7 }
  0xec   : > { %v556_v12 = vmax.f32 %v480_v8, 0.0  ;;  %518 = vmatmul.bf16.gmra.mxu0 %v390_v6 }
  0xed   : > { %v676_v15 = vld [vmem:[#allocation2 + $0x20] sm:$0xff] }
  0xee   : > { %643 = vst [vmem:[#allocation2 + $0x31] sm:$0xff] %v556_v12  ;;  %v4002_v16 = vpack.c.bf16 %v676_v15, %v675_v14 }
  0xf0   : > { %1699 = vmatmul.bf16.gmra.mxu1 %v4002_v16 }
  0xf1   : > { %v481_v18 = vpop.f32.mrf.mxu0  ;;  %v534_v23 = vpop.f32.mrf.mxu3 }
  0xf2   : > { %v482_v19 = vadd.f32 %v3976_v55, %v481_v18 }
  0xf4   : > { %v557_v21 = vmax.f32 %v482_v19, 0.0 }
  0xf5   : > { %v677_v37 = vld [vmem:[#allocation2 + $0x30] sm:$0xff] }
  0xf6   : > { %644 = vst [vmem:[#allocation2 + $0x39] sm:$0xff] %v557_v21  ;;  %v4010_v27 = vpack.c.bf16 %v557_v21, %v556_v12 }
  0xf8   : > { %1793 = vmatmul.bf16.gmra.mxu2 %v4010_v27 }
  0xf9   : > { %v484_v30 = vpop.f32.mrf.mxu0 }
  0xfa   : > { %v485_v31 = vadd.f32 %v3976_v55, %v484_v30  ;;  %v1784_v30 = vpop.f32.mrf.mxu2 }
  0xfb   : > { %v4059_v33 = vadd.f32 %v1784_v30, %v1696_v28  ;;  %v3321_v28 = vld [vmem:[#allocation8 + $0x110] sm:$0xff] }
  0xfc   : > { %v558_v24 = vmax.f32 %v485_v31, 0.0  ;;  %523 = vmatmul.bf16.gmra.mxu0 %v391_v22 }
  0xfd   : > { %v678_v39 = vld [vmem:[#allocation2 + $0x38] sm:$0xff] }
  0xfe   : > { %645 = vst [vmem:[#allocation2 + $0x49] sm:$0xff] %v558_v24  ;;  %v980_v26 = vpack.c.bf16 %v678_v39, %v677_v37 }
 0x100   : > { %1704 = vmatmul.bf16.gmra.mxu1 %v980_v26 }
 0x101   : > { %v486_v41 = vpop.f32.mrf.mxu0 }
 0x102   : > { %v487_v42 = vadd.f32 %v3976_v55, %v486_v41  ;;  %v3326_v41 = vld [vmem:[#allocation8 + $0x138] sm:$0xff] }
 0x103   : > { %2042 = vmatpush.bf16.msrb.mxu1 %v3326_v41 }
 0x104   : > { %v559_v29 = vmax.f32 %v487_v42, 0.0  ;;  %v379_v42 = vld [vmem:[%s3877_s15 + $0xf0] sm:$0xff] }
 0x105   : > { %v679_v51 = vld [vmem:[#allocation2 + $0x48] sm:$0xff] }
 0x106   : > { %646 = vst [vmem:[#allocation2 + $0x51] sm:$0xff] %v559_v29  ;;  %v4023_v45 = vpack.c.bf16 %v559_v29, %v558_v24  ;;  %v380_v29 = vld [vmem:[%s3877_s15 + $0xf8] sm:$0xff] }
 0x107   : > { %v396_v43 = vpack.c.bf16 %v380_v29, %v379_v42 }
 0x108   : > { %1798 = vmatmul.bf16.gmra.mxu2 %v4023_v45 }
 0x109   : > { %v489_v47 = vpop.f32.mrf.mxu0  ;;  %548 = vmatmul.bf16.gmra.mxu3 %v396_v43  ;;  %v536_v43 = vpop.f32.mrf.mxu3 }
 0x10a   : > { %v490_v32 = vadd.f32 %v3976_v55, %v489_v47 }
 0x10c   : > { %v560_v50 = vmax.f32 %v490_v32, 0.0  ;;  %528 = vmatmul.bf16.gmra.mxu0 %v392_v46 }
 0x10d   : > { %v680_v52 = vld [vmem:[#allocation2 + $0x50] sm:$0xff] }
 0x10e   : > { %647 = vst [vmem:[#allocation2 + $0x61] sm:$0xff] %v560_v50  ;;  %v989_v53 = vpack.c.bf16 %v680_v52, %v679_v51 }
 0x110   : > { %1709 = vmatmul.bf16.gmra.mxu1 %v989_v53 }
 0x111   : > { %v491_v38 = vpop.f32.mrf.mxu0 }
 0x112   : > { %v492_v54 = vadd.f32 %v3976_v55, %v491_v38 }
 0x114   : > { %v561_v56 = vmax.f32 %v492_v54, 0.0  ;;  %v3332_v54 = vld [vmem:[#allocation8 + $0x168] sm:$0xff] }
 0x115   : > { %v681_v60 = vld [vmem:[#allocation2 + $0x60] sm:$0xff]  ;;  %2133 = vmatpush.bf16.msrb.mxu2 %v3332_v54 }
 0x116   : > { %648 = vst [vmem:[#allocation2 + $0x69] sm:$0xff] %v561_v56  ;;  %v4032_v57 = vpack.c.bf16 %v561_v56, %v560_v50 }
 0x118   : > { %1803 = vmatmul.bf16.gmra.mxu2 %v4032_v57 }
 0x119   : > { %v494_v58 = vpop.f32.mrf.mxu0 }
 0x11a   : > { %v495_v40 = vadd.f32 %v3976_v55, %v494_v58  ;;  %v4076_v58 = vpop.f32.mrf.mxu2 }
 0x11c   : > { %v562_v59 = vmax.f32 %v495_v40, 0.0  ;;  %1961 = vmatmul.bf16.vlgmr.msrb.gmra.mxu0 %v4002_v16 }
 0x11d   : > { %v682_v61 = vld [vmem:[#allocation2 + $0x68] sm:$0xff] }
 0x11e   : > { %649 = vst [vmem:[#allocation2 + $0x79] sm:$0xff] %v562_v59  ;;  %v998_v62 = vpack.c.bf16 %v682_v61, %v681_v60  ;;  %v3325_v60 = vld [vmem:[#allocation8 + $0x130] sm:$0xff]  ;;  %v3331_v61 = vld [vmem:[#allocation8 + $0x160] sm:$0xff] }
 0x11f   : > { %2043 = vmatpush.bf16.msrb.mxu1 %v3325_v60  ;;  %2134 = vmatpush.bf16.msrb.mxu2 %v3331_v61 }
 0x120   : > { %1714 = vmatmul.bf16.gmra.mxu1 %v998_v62 }
 0x121   : > { %v496_v63 = vpop.f32.mrf.mxu0 }
 0x122   : > { %v497_v0 = vadd.f32 %v3976_v55, %v496_v63 }
 0x124   : > { %v563_v1 = vmax.f32 %v497_v0, 0.0  ;;  %v3324_v0 = vld [vmem:[#allocation8 + $0x128] sm:$0xff] }
 0x125   : > { %v683_v7 = vld [vmem:[#allocation2 + $0x78] sm:$0xff]  ;;  %2044 = vmatpush.bf16.msrb.mxu1 %v3324_v0 }
 0x126   : > { %650 = vst [vmem:[#allocation2 + $0x81] sm:$0xff] %v563_v1  ;;  %v4038_v2 = vpack.c.bf16 %v563_v1, %v562_v59  ;;  %v4079_v59 = vpop.f32.mrf.mxu1  ;;  %v3330_v1 = vld [vmem:[#allocation8 + $0x158] sm:$0xff] }
 0x127   : > { %2135 = vmatpush.bf16.msrb.mxu2 %v3330_v1 }
 0x128   : > { %1808 = vmatmul.bf16.gmra.mxu2 %v4038_v2 }
 0x129   : > { %v499_v3 = vpop.f32.mrf.mxu0 }
 0x12a   : > { %v500_v5 = vadd.f32 %v3976_v55, %v499_v3 }
 0x12c   : > { %v564_v6 = vmax.f32 %v500_v5, 0.0  ;;  %1966 = vmatmul.bf16.gmra.mxu0 %v980_v26 }
 0x12d   : > { %v684_v8 = vld [vmem:[#allocation2 + $0x80] sm:$0xff] }
 0x12e   : > { %651 = vst [vmem:[#allocation2 + $0x91] sm:$0xff] %v564_v6  ;;  %v1007_v9 = vpack.c.bf16 %v684_v8, %v683_v7  ;;  %v3323_v7 = vld [vmem:[#allocation8 + $0x120] sm:$0xff]  ;;  %v3329_v8 = vld [vmem:[#allocation8 + $0x150] sm:$0xff] }
 0x12f   : > { %2045 = vmatpush.bf16.msrb.mxu1 %v3323_v7  ;;  %2136 = vmatpush.bf16.msrb.mxu2 %v3329_v8 }
 0x130   : > { %1719 = vmatmul.bf16.gmra.mxu1 %v1007_v9 }
 0x131   : > { %v501_v10 = vpop.f32.mrf.mxu0 }
 0x132   : > { %v502_v11 = vadd.f32 %v3976_v55, %v501_v10  ;;  %v539_v61 = vpop.f32.mrf.mxu3 }
 0x134   : > { %v565_v12 = vmax.f32 %v502_v11, 0.0 }
 0x135   : > { %v685_v17 = vld [vmem:[#allocation2 + $0x90] sm:$0xff] }
 0x136   : > { %652 = vst [vmem:[#allocation2 + $0x99] sm:$0xff] %v565_v12  ;;  %v4043_v13 = vpack.c.bf16 %v565_v12, %v564_v6 }
 0x138   : > { %1813 = vmatmul.bf16.gmra.mxu2 %v4043_v13 }
 0x139   : > { %v504_v14 = vpop.f32.mrf.mxu0 }
 0x13a   : > { %v505_v15 = vadd.f32 %v3976_v55, %v504_v14 }
 0x13c   : > { %v566_v16 = vmax.f32 %v505_v15, 0.0  ;;  %1971 = vmatmul.bf16.gmra.mxu0 %v989_v53 }
 0x13d   : > { %v686_v18 = vld [vmem:[#allocation2 + $0x98] sm:$0xff] }
 0x13e   : > { %653 = vst [vmem:[#allocation2 + $0xa9] sm:$0xff] %v566_v16  ;;  %v4047_v19 = vpack.c.bf16 %v686_v18, %v685_v17  ;;  %v3328_v17 = vld [vmem:[#allocation8 + $0x148] sm:$0xff] }
 0x13f   : > { %2137 = vmatpush.bf16.msrb.mxu2 %v3328_v17 }
 0x140   : > { %1724 = vmatmul.bf16.gmra.mxu1 %v4047_v19 }
 0x141   : > { %v506_v21 = vpop.f32.mrf.mxu0 }
 0x142   : > { %v507_v25 = vadd.f32 %v3976_v55, %v506_v21 }
 0x144   : > { %v567_v22 = vmax.f32 %v507_v25, 0.0 }
 0x145   : > { %v687_v37 = vld [vmem:[#allocation2 + $0xa8] sm:$0xff] }
 0x146   : > { %654 = vst [vmem:[#allocation2 + $0xb1] sm:$0xff] %v567_v22  ;;  %v4057_v31 = vpack.c.bf16 %v567_v22, %v566_v16  ;;  %v3322_v16 = vld [vmem:[#allocation8 + $0x118] sm:$0xff]  ;;  %v3327_v22 = vld [vmem:[#allocation8 + $0x140] sm:$0xff] }
 0x147   : > { %2046 = vmatpush.bf16.msrb.mxu1 %v3322_v16  ;;  %2138 = vmatpush.bf16.msrb.mxu2 %v3327_v22 }
 0x148   : > { %1818 = vmatmul.bf16.gmra.mxu2 %v4057_v31 }
 0x149   : > { %v509_v34 = vpop.f32.mrf.mxu0 }
 0x14a   : > { %v510_v24 = vadd.f32 %v3976_v55, %v509_v34 }
 0x14b   : > { %2047 = vmatpush.bf16.msrb.mxu1 %v3321_v28 }
 0x14c   : > { %v568_v36 = vmax.f32 %v510_v24, 0.0  ;;  %1976 = vmatmul.bf16.gmra.mxu0 %v998_v62 }
 0x14d   : > { %v688_v39 = vld [vmem:[#allocation2 + $0xb0] sm:$0xff] }
 0x14e   : > { %655 = vst [vmem:[#allocation2 + $0xc1] sm:$0xff] %v568_v36  ;;  %v4063_v26 = vpack.c.bf16 %v688_v39, %v687_v37  ;;  %v535_v37 = vadd.f32 %v3976_v55, %v534_v23  ;;  %v3320_v39 = vld [vmem:[#allocation8 + $0x108] sm:$0xff] }
 0x14f   : > { %2048 = vmatpush.bf16.msrb.mxu1 %v3320_v39 }
 0x150   : > { %1729 = vmatmul.bf16.gmra.mxu1 %v4063_v26  ;;  %v578_v42 = vmax.f32 %v535_v37, 0.0 }
 0x151   : > { %v511_v44 = vpop.f32.mrf.mxu0 }
 0x152   : > { %v512_v46 = vadd.f32 %v3976_v55, %v511_v44  ;;  %665 = vst [vmem:[#allocation2 + $0x139] sm:$0xff] %v578_v42 }
 0x153   : > { %2049 = vmatpush.bf16.msrb.mxu1 %v3319_v48 }
 0x154   : > { %v569_v47 = vmax.f32 %v512_v46, 0.0  ;;  %v537_v46 = vadd.f32 %v3976_v55, %v536_v43 }
 0x155   : > { %v689_v52 = vld [vmem:[#allocation2 + $0xc0] sm:$0xff] }
 0x156   : > { %656 = vst [vmem:[#allocation2 + $0xc9] sm:$0xff] %v569_v47  ;;  %v4069_v32 = vpack.c.bf16 %v569_v47, %v568_v36 }
 0x158   : > { %1823 = vmatmul.bf16.gmra.mxu2 %v4069_v32 }
 0x159   : > { %v514_v49 = vpop.f32.mrf.mxu0 }
 0x15a   : > { %v515_v50 = vadd.f32 %v3976_v55, %v514_v49 }
 0x15c   : > { %v570_v51 = vmax.f32 %v515_v50, 0.0  ;;  %1981 = vmatmul.bf16.gmra.mxu0 %v1007_v9  ;;  %v579_v50 = vmax.f32 %v537_v46, 0.0 }
 0x15d   : > { %v690_v53 = vld [vmem:[#allocation2 + $0xc8] sm:$0xff] }
 0x15e   : > { %657 = vst [vmem:[#allocation2 + $0xd9] sm:$0xff] %v570_v51  ;;  %v4073_v38 = vpack.c.bf16 %v690_v53, %v689_v52 }
 0x15f   : > { %666 = vst [vmem:[#allocation2 + $0x141] sm:$0xff] %v579_v50 }
 0x160   : > { %1734 = vmatmul.bf16.gmra.mxu1 %v4073_v38 }
 0x161   : > { %v516_v56 = vpop.f32.mrf.mxu0 }
 0x162   : > { %v517_v40 = vadd.f32 %v3976_v55, %v516_v56  ;;  %v4107_v56 = vpack.c.bf16 %v579_v50, %v578_v42  ;;  %v833_v42 = vld [vmem:[#allocation2 + $0x1a] sm:$0xff] }
 0x164   : > { %v571_v62 = vmax.f32 %v517_v40, 0.0 }
 0x165   : > { %v691_v11 = vld [vmem:[#allocation2 + $0xd8] sm:$0xff] }
 0x166   : > { %658 = vst [vmem:[#allocation2 + $0xe1] sm:$0xff] %v571_v62  ;;  %v4081_v63 = vpack.c.bf16 %v571_v62, %v570_v51  ;;  %v540_v62 = vadd.f32 %v3976_v55, %v539_v61 }
 0x168   : > { %1828 = vmatmul.bf16.gmra.mxu2 %v4081_v63 }
 0x169   : > { %v519_v3 = vpop.f32.mrf.mxu0 }
 0x16a   : > { %v520_v5 = vadd.f32 %v3976_v55, %v519_v3  ;;  %v580_v3 = vmax.f32 %v540_v62, 0.0 }
 0x16b   : > { %v1789_v6 = vpop.f32.mrf.mxu2 }
 0x16c   : > { %v572_v9 = vmax.f32 %v520_v5, 0.0  ;;  %1986 = vmatmul.bf16.gmra.mxu0 %v4047_v19  ;;  %667 = vst [vmem:[#allocation2 + $0x151] sm:$0xff] %v580_v3 }
 0x16d   : > { %v1700_v10 = vpop.f32.mrf.mxu1  ;;  %v692_v12 = vld [vmem:[#allocation2 + $0xe0] sm:$0xff] }
 0x16e   : > { %659 = vst [vmem:[#allocation2 + $0xf1] sm:$0xff] %v572_v9  ;;  %v1701_v14 = vadd.f32 %v4053_v20, %v1700_v10  ;;  %v4087_v15 = vpack.c.bf16 %v692_v12, %v691_v11  ;;  %v541_v10 = vpop.f32.mrf.mxu3 }
 0x16f   : > { %v542_v12 = vadd.f32 %v3976_v55, %v541_v10  ;;  %v835_v10 = vld [vmem:[#allocation2 + $0x32] sm:$0xff] }
 0x170   : > { %1739 = vmatmul.bf16.gmra.mxu1 %v4087_v15  ;;  %v4090_v18 = vadd.f32 %v1789_v6, %v1701_v14 }
 0x171   : > { %v521_v21 = vpop.f32.mrf.mxu0  ;;  %v581_v17 = vmax.f32 %v542_v12, 0.0 }
 0x172   : > { %v522_v19 = vadd.f32 %v3976_v55, %v521_v21 }
 0x173   : > { %v1791_v25 = vpop.f32.mrf.mxu2  ;;  %v4126_v22 = vpack.c.bf16 %v581_v17, %v580_v3  ;;  %668 = vst [vmem:[#allocation2 + $0x159] sm:$0xff] %v581_v17 }
 0x174   : > { %v4093_v30 = vmax.f32 %v522_v19, 0.0 }
 0x175   : > { %v1702_v34 = vpop.f32.mrf.mxu1  ;;  %v693_v51 = vld [vmem:[#allocation2 + $0xf0] sm:$0xff] }
 0x176   : > { %660 = vst [vmem:[#allocation2 + $0xf9] sm:$0xff] %v4093_v30  ;;  %v1703_v24 = vadd.f32 %v4053_v20, %v1702_v34  ;;  %v1053_v36 = vpack.c.bf16 %v4093_v30, %v572_v9 }
 0x178   : > { %v4099_v41 = vadd.f32 %v1791_v25, %v1703_v24  ;;  %1833 = vmatmul.bf16.gmra.mxu2 %v1053_v36  ;;  %v544_v36 = vpop.f32.mrf.mxu3 }
 0x179   : > { %v524_v29 = vpop.f32.mrf.mxu0  ;;  %v545_v37 = vadd.f32 %v3976_v55, %v544_v36 }
 0x17a   : > { %v525_v44 = vadd.f32 %v3976_v55, %v524_v29  ;;  %v834_v29 = vld [vmem:[#allocation2 + $0x22] sm:$0xff] }
 0x17b   : > { %v1794_v47 = vpop.f32.mrf.mxu2  ;;  %v4134_v48 = vpack.c.bf16 %v834_v29, %v833_v42  ;;  %v838_v42 = vld [vmem:[#allocation2 + $0x52] sm:$0xff] }
 0x17c   : > { %v574_v49 = vmax.f32 %v525_v44, 0.0  ;;  %1991 = vmatmul.bf16.gmra.mxu0 %v4063_v26  ;;  %v582_v44 = vmax.f32 %v545_v37, 0.0 }
 0x17d   : > { %v1705_v35 = vpop.f32.mrf.mxu1  ;;  %v694_v52 = vld [vmem:[#allocation2 + $0xf8] sm:$0xff] }
 0x17e   : > { %661 = vst [vmem:[#allocation2 + $0x109] sm:$0xff] %v574_v49  ;;  %v1706_v53 = vadd.f32 %v4053_v20, %v1705_v35  ;;  %v4105_v54 = vpack.c.bf16 %v694_v52, %v693_v51 }
 0x17f   : > { %669 = vst [vmem:[#allocation2 + $0x169] sm:$0xff] %v582_v44 }
 0x180   : > { %1744 = vmatmul.bf16.gmra.mxu1 %v4105_v54  ;;  %v4110_v40 = vadd.f32 %v1794_v47, %v1706_v53  ;;  %v546_v51 = vpop.f32.mrf.mxu3 }
 0x181   : > { %v526_v60 = vpop.f32.mrf.mxu0  ;;  %v547_v52 = vadd.f32 %v3976_v55, %v546_v51 }
 0x182   : > { %v527_v26 = vadd.f32 %v3976_v55, %v526_v60 }
 0x183   : > { %v1796_v0 = vpop.f32.mrf.mxu2  ;;  %v583_v60 = vmax.f32 %v547_v52, 0.0 }
 0x184   : > { %v575_v1 = vmax.f32 %v527_v26, 0.0 }
 0x185   : > { %v1707_v5 = vpop.f32.mrf.mxu1  ;;  %v695_v23 = vld [vmem:[#allocation2 + $0x108] sm:$0xff]  ;;  %670 = vst [vmem:[#allocation2 + $0x171] sm:$0xff] %v583_v60  ;;  %v4146_v3 = vpack.c.bf16 %v583_v60, %v582_v44 }
 0x186   : > { %662 = vst [vmem:[#allocation2 + $0x111] sm:$0xff] %v575_v1  ;;  %v1708_v6 = vadd.f32 %v4053_v20, %v1707_v5  ;;  %v4115_v7 = vpack.c.bf16 %v575_v1, %v574_v49 }
 0x188   : > { %v4117_v8 = vadd.f32 %v1796_v0, %v1708_v6  ;;  %1838 = vmatmul.bf16.gmra.mxu2 %v4115_v7 }
 0x189   : > { %v529_v9 = vpop.f32.mrf.mxu0 }
 0x18a   : > { %v530_v11 = vadd.f32 %v3976_v55, %v529_v9 }
 0x18b   : > { %v1799_v14 = vpop.f32.mrf.mxu2 }
 0x18c   : > { %v576_v16 = vmax.f32 %v530_v11, 0.0  ;;  %1996 = vmatmul.bf16.gmra.mxu0 %v4073_v38 }
 0x18d   : > { %v1710_v21 = vpop.f32.mrf.mxu1  ;;  %v696_v19 = vld [vmem:[#allocation2 + $0x110] sm:$0xff] }
 0x18e   : > { %663 = vst [vmem:[#allocation2 + $0x121] sm:$0xff] %v576_v16  ;;  %v1711_v25 = vadd.f32 %v4053_v20, %v1710_v21  ;;  %v4124_v28 = vpack.c.bf16 %v696_v19, %v695_v23  ;;  %v699_v21 = vld [vmem:[#allocation2 + $0x138] sm:$0xff] }
 0x190   : > { %1749 = vmatmul.bf16.gmra.mxu1 %v4124_v28  ;;  %v4129_v34 = vadd.f32 %v1799_v14, %v1711_v25 }
 0x191   : > { %v531_v24 = vpop.f32.mrf.mxu0 }
 0x192   : > { %v532_v38 = vadd.f32 %v3976_v55, %v531_v24 }
 0x193   : > { %v1801_v39 = vpop.f32.mrf.mxu2 }
 0x194   : > { %v577_v43 = vmax.f32 %v532_v38, 0.0 }
 0x195   : > { %v1712_v46 = vpop.f32.mrf.mxu1  ;;  %v697_v26 = vld [vmem:[#allocation2 + $0x120] sm:$0xff] }
 0x196   : > { %664 = vst [vmem:[#allocation2 + $0x129] sm:$0xff] %v577_v43  ;;  %v1713_v47 = vadd.f32 %v4053_v20, %v1712_v46  ;;  %v4136_v49 = vpack.c.bf16 %v577_v43, %v576_v16 }
 0x198   : > { %v4138_v50 = vadd.f32 %v1801_v39, %v1713_v47  ;;  %2139 = vmatmul.bf16.vlgmr.msrb.gmra.mxu2 %v4134_v48  ;;  %v837_v39 = vld [vmem:[#allocation2 + $0x4a] sm:$0xff] }
 0x199   : > { %v4141_v35 = vpop.f32.mrf.mxu0  ;;  %v701_v47 = vld [vmem:[#allocation2 + $0x150] sm:$0xff] }
 0x19b   : > { %v1804_v53 = vpop.f32.mrf.mxu2 }
 0x19c   : > { %2001 = vmatmul.bf16.gmra.mxu0 %v4087_v15  ;;  %v836_v15 = vld [vmem:[#allocation2 + $0x3a] sm:$0xff] }
 0x19d   : > { %v1715_v61 = vpop.f32.mrf.mxu1  ;;  %v698_v62 = vld [vmem:[#allocation2 + $0x128] sm:$0xff]  ;;  %v4154_v14 = vpack.c.bf16 %v836_v15, %v835_v10 }
 0x19e   : > { %v1716_v0 = vadd.f32 %v4053_v20, %v1715_v61  ;;  %v1070_v1 = vpack.c.bf16 %v698_v62, %v697_v26  ;;  %v3310_v26 = vld [vmem:[#allocation8 + $0xb8] sm:$0xff] }
 0x19f   : > { %v840_v10 = vld [vmem:[#allocation2 + $0x6a] sm:$0xff] }
 0x1a0   : > { %1754 = vmatmul.bf16.vlgmr.msrb.gmra.mxu3 %v1070_v1  ;;  %2050 = vmatmul.bf16.vlgmr.msrb.gmra.mxu1 %v3996_v4  ;;  %v4149_v5 = vadd.f32 %v1804_v53, %v1716_v0  ;;  %v700_v4 = vld [vmem:[#allocation2 + $0x140] sm:$0xff] }
 0x1a1   : > { %v4151_v6 = vpop.f32.mrf.mxu0  ;;  %v4163_v24 = vpack.c.bf16 %v700_v4, %v699_v21  ;;  %1864 = vmatpush.bf16.msrb.mxu3 %v3310_v26  ;;  %v703_v4 = vld [vmem:[#allocation2 + $0x168] sm:$0xff] }
 0x1a2   : > { %5026 = vst [vmem:[#allocation16_spill] sm:$0xff] %v4151_v6 }
 0x1a3   : > { %v1806_v9 = vpop.f32.mrf.mxu2 }
 0x1a5   : > { %v1717_v11 = vpop.f32.mrf.mxu1 }
 0x1a6   : > { %v1718_v12 = vadd.f32 %v4053_v20, %v1717_v11 }
 0x1a8   : > { %v4156_v16 = vadd.f32 %v1806_v9, %v1718_v12  ;;  %2144 = vmatmul.bf16.gmra.mxu2 %v4154_v14  ;;  %v839_v9 = vld [vmem:[#allocation2 + $0x62] sm:$0xff] }
 0x1a9   : > { %v4159_v17 = vpop.f32.mrf.mxu0  ;;  %v4190_v11 = vpack.c.bf16 %v840_v10, %v839_v9  ;;  %v3309_v12 = vld [vmem:[#allocation8 + $0xb0] sm:$0xff]  ;;  %v3307_v9 = vld [vmem:[#allocation8 + $0xa0] sm:$0xff] }
 0x1aa   : > { %5027 = vst [vmem:[#allocation17_spill] sm:$0xff] %v4159_v17  ;;  %1865 = vmatpush.bf16.msrb.mxu3 %v3309_v12  ;;  %v3350_v12 = vld [vmem:[#allocation8 + $0x1f8] sm:$0xff] }
 0x1ab   : > { %v1809_v23 = vpop.f32.mrf.mxu2  ;;  %2309 = vmatpush.bf16.msra.mxu0 %v3350_v12 }
 0x1ac   : > { %2006 = vmatmul.bf16.gmra.mxu0 %v4105_v54  ;;  %v4172_v54 = vpack.c.bf16 %v838_v42, %v837_v39 }
 0x1ad   : > { %v1720_v19 = vpop.f32.mrf.mxu1 }
 0x1ae   : > { %v1721_v25 = vadd.f32 %v4053_v20, %v1720_v19 }
 0x1b0   : > { %1759 = vmatmul.bf16.gmra.mxu3 %v4163_v24  ;;  %2055 = vmatmul.bf16.gmra.mxu1 %v4010_v27  ;;  %v4167_v36 = vadd.f32 %v1809_v23, %v1721_v25  ;;  %v702_v27 = vld [vmem:[#allocation2 + $0x158] sm:$0xff]  ;;  %v704_v23 = vld [vmem:[#allocation2 + $0x170] sm:$0xff] }
 0x1b1   : > { %v4169_v38 = vpop.f32.mrf.mxu0  ;;  %v4181_v60 = vpack.c.bf16 %v702_v27, %v701_v47  ;;  %v4198_v39 = vpack.c.bf16 %v704_v23, %v703_v4  ;;  %v841_v27 = vld [vmem:[#allocation2 + $0x7a] sm:$0xff] }
 0x1b2   : > { %5028 = vst [vmem:[#allocation18_spill] sm:$0xff] %v4169_v38 }
 0x1b3   : > { %v1811_v37 = vpop.f32.mrf.mxu2 }
 0x1b5   : > { %v1722_v29 = vpop.f32.mrf.mxu1 }
 0x1b6   : > { %v1723_v43 = vadd.f32 %v4053_v20, %v1722_v29  ;;  %v3308_v29 = vld [vmem:[#allocation8 + $0xa8] sm:$0xff] }
 0x1b7   : > { %1866 = vmatpush.bf16.msrb.mxu3 %v3308_v29 }
 0x1b8   : > { %v4174_v44 = vadd.f32 %v1811_v37, %v1723_v43  ;;  %2149 = vmatmul.bf16.gmra.mxu2 %v4172_v54 }
 0x1b9   : > { %v4177_v46 = vpop.f32.mrf.mxu0 }
 0x1ba   : > { %5029 = vst [vmem:[#allocation19_spill] sm:$0xff] %v4177_v46 }
 0x1bb   : > { %v1814_v51 = vpop.f32.mrf.mxu2  ;;  %1867 = vmatpush.bf16.msrb.mxu3 %v3307_v9 }
 0x1bc   : > { %2011 = vmatmul.bf16.gmra.mxu0 %v4124_v28 }
 0x1bd   : > { %v1725_v52 = vpop.f32.mrf.mxu1 }
 0x1be   : > { %v1726_v53 = vadd.f32 %v4053_v20, %v1725_v52 }
 0x1c0   : > { %1764 = vmatmul.bf16.gmra.mxu3 %v4181_v60  ;;  %2060 = vmatmul.bf16.gmra.mxu1 %v4023_v45  ;;  %v4185_v61 = vadd.f32 %v1814_v51, %v1726_v53  ;;  %v842_v51 = vld [vmem:[#allocation2 + $0x82] sm:$0xff] }
 0x1c1   : > { %v4187_v62 = vpop.f32.mrf.mxu0  ;;  %v4207_v26 = vpack.c.bf16 %v842_v51, %v841_v27  ;;  %v3306_v27 = vld [vmem:[#allocation8 + $0x98] sm:$0xff]  ;;  %v843_v51 = vld [vmem:[#allocation2 + $0x92] sm:$0xff] }
 0x1c2   : > { %5030 = vst [vmem:[#allocation20_spill] sm:$0xff] %v4187_v62  ;;  %1868 = vmatpush.bf16.msrb.mxu3 %v3306_v27 }
 0x1c3   : > { %v1816_v0 = vpop.f32.mrf.mxu2 }
 0x1c5   : > { %v1727_v15 = vpop.f32.mrf.mxu1 }
 0x1c6   : > { %v1728_v28 = vadd.f32 %v4053_v20, %v1727_v15 }
 0x1c8   : > { %v4192_v21 = vadd.f32 %v1816_v0, %v1728_v28  ;;  %2154 = vmatmul.bf16.gmra.mxu2 %v4190_v11 }
 0x1c9   : > { %v4195_v45 = vpop.f32.mrf.mxu0 }
 0x1ca   : > { %5031 = vst [vmem:[#allocation21_spill] sm:$0xff] %v4195_v45  ;;  %v854_v45 = vld [vmem:[#allocation2 + $0x112] sm:$0xff] }
 0x1cb   : > { %v1819_v19 = vpop.f32.mrf.mxu2 }
 0x1cc   : > { %2016 = vmatmul.bf16.gmra.mxu0 %v1070_v1  ;;  %v549_v1 = vpop.f32.mrf.mxu3 }
 0x1cd   : > { %v1730_v25 = vpop.f32.mrf.mxu1  ;;  %v4210_v0 = vadd.f32 %v3976_v55, %v549_v1  ;;  %v3348_v1 = vld [vmem:[#allocation8 + $0x1e8] sm:$0xff] }
 0x1ce   : > { %v1731_v37 = vadd.f32 %v4053_v20, %v1730_v25 }
 0x1cf   : > { %v5017_v10 = vmax.f32 %v4210_v0, 0.0 }
 0x1d0   : > { %1769 = vmatmul.bf16.gmra.mxu3 %v4198_v39  ;;  %2065 = vmatmul.bf16.gmra.mxu1 %v4032_v57  ;;  %v4202_v42 = vadd.f32 %v1819_v19, %v1731_v37  ;;  %v3349_v37 = vld [vmem:[#allocation8 + $0x1f0] sm:$0xff] }
 0x1d1   : > { %v4204_v43 = vpop.f32.mrf.mxu0  ;;  %671 = vst [vmem:[#allocation2 + $0x181] sm:$0xff] %v5017_v10  ;;  %2310 = vmatpush.bf16.msra.mxu0 %v3349_v37  ;;  %v3343_v10 = vld [vmem:[#allocation8 + $0x1c0] sm:$0xff] }
 0x1d2   : > { %5032 = vst [vmem:[#allocation22_spill] sm:$0xff] %v4204_v43 }
 0x1d3   : > { %v1821_v47 = vpop.f32.mrf.mxu2 }
 0x1d4   : > { %v551_v23 = vpop.f32.mrf.mxu3 }
 0x1d5   : > { %v1732_v52 = vpop.f32.mrf.mxu1  ;;  %v552_v25 = vadd.f32 %v3976_v55, %v551_v23  ;;  %2311 = vmatpush.bf16.msra.mxu0 %v3348_v1 }
 0x1d6   : > { %v1733_v53 = vadd.f32 %v4053_v20, %v1732_v52  ;;  %v844_v52 = vld [vmem:[#allocation2 + $0x9a] sm:$0xff] }
 0x1d7   : > { %v4230_v12 = vpack.c.bf16 %v844_v52, %v843_v51  ;;  %v3345_v51 = vld [vmem:[#allocation8 + $0x1d0] sm:$0xff]  ;;  %v3304_v52 = vld [vmem:[#allocation8 + $0x88] sm:$0xff] }
 0x1d8   : > { %v4212_v57 = vadd.f32 %v1821_v47, %v1733_v53  ;;  %2159 = vmatmul.bf16.gmra.mxu2 %v4207_v26  ;;  %v585_v47 = vmax.f32 %v552_v25, 0.0 }
 0x1d9   : > { %v4216_v15 = vpop.f32.mrf.mxu0 }
 0x1da   : > { %5033 = vst [vmem:[#allocation23_spill] sm:$0xff] %v4216_v15 }
 0x1db   : > { %v1824_v28 = vpop.f32.mrf.mxu2  ;;  %672 = vst [vmem:[#allocation2 + $0x189] sm:$0xff] %v585_v47 }
 0x1dc   : > { %2021 = vmatmul.bf16.gmra.mxu0 %v4163_v24 }
 0x1dd   : > { %v1735_v4 = vpop.f32.mrf.mxu1 }
 0x1de   : > { %v1736_v19 = vadd.f32 %v4053_v20, %v1735_v4 }
 0x1e0   : > { %1843 = vmatmul.bf16.vlgmr.msra.gmra.mxu3 %v4136_v49  ;;  %2070 = vmatmul.bf16.gmra.mxu1 %v4038_v2  ;;  %v4225_v29 = vadd.f32 %v1824_v28, %v1736_v19  ;;  %v3305_v2 = vld [vmem:[#allocation8 + $0x90] sm:$0xff]  ;;  %v3347_v28 = vld [vmem:[#allocation8 + $0x1e0] sm:$0xff]  ;;  %v3346_v19 = vld [vmem:[#allocation8 + $0x1d8] sm:$0xff] }
 0x1e1   : > { %v4227_v53 = vpop.f32.mrf.mxu0  ;;  %1869 = vmatpush.bf16.msrb.mxu3 %v3305_v2  ;;  %2312 = vmatpush.bf16.msra.mxu0 %v3347_v28 }
 0x1e2   : > { %5034 = vst [vmem:[#allocation24_spill] sm:$0xff] %v4227_v53  ;;  %v737_v53 = vld [vmem:[#allocation2 + $0x2] sm:$0xff] }
 0x1e3   : > { %v1826_v24 = vpop.f32.mrf.mxu2 }
 0x1e5   : > { %v1737_v9 = vpop.f32.mrf.mxu1  ;;  %2313 = vmatpush.bf16.msra.mxu0 %v3346_v19  ;;  %1870 = vmatpush.bf16.msrb.mxu3 %v3304_v52 }
 0x1e6   : > { %v1738_v55 = vadd.f32 %v4053_v20, %v1737_v9  ;;  %v845_v9 = vld [vmem:[#allocation2 + $0xaa] sm:$0xff] }
 0x1e8   : > { %v4232_v4 = vadd.f32 %v1826_v24, %v1738_v55  ;;  %2164 = vmatmul.bf16.gmra.mxu2 %v4230_v12  ;;  %v846_v55 = vld [vmem:[#allocation2 + $0xb2] sm:$0xff] }
 0x1e9   : > { %v4236_v37 = vpop.f32.mrf.mxu0  ;;  %2314 = vmatpush.bf16.msra.mxu0 %v3345_v51  ;;  %v4244_v19 = vpack.c.bf16 %v846_v55, %v845_v9  ;;  %v3342_v55 = vld [vmem:[#allocation8 + $0x1b8] sm:$0xff] }
 0x1ea   : > { %5035 = vst [vmem:[#allocation25_spill] sm:$0xff] %v4236_v37 }
 0x1eb   : > { %v1829_v23 = vpop.f32.mrf.mxu2 }
 0x1ec   : > { %2026 = vmatmul.bf16.gmra.mxu0 %v4181_v60  ;;  %v3344_v60 = vld [vmem:[#allocation8 + $0x1c8] sm:$0xff] }
 0x1ed   : > { %v1740_v25 = vpop.f32.mrf.mxu1  ;;  %2315 = vmatpush.bf16.msra.mxu0 %v3344_v60 }
 0x1ee   : > { %v1741_v27 = vadd.f32 %v4053_v20, %v1740_v25  ;;  %v3303_v25 = vld [vmem:[#allocation8 + $0x80] sm:$0xff] }
 0x1ef   : > { %1871 = vmatpush.bf16.msrb.mxu3 %v3303_v25  ;;  %v800_v25 = vld [vmem:[#allocation2 + $0x188] sm:$0xff] }
 0x1f0   : > { %1848 = vmatmul.bf16.gmra.mxu3 %v4107_v56  ;;  %2075 = vmatmul.bf16.gmra.mxu1 %v4043_v13  ;;  %v4241_v24 = vadd.f32 %v1829_v23, %v1741_v27  ;;  %v5037_v23 = vmax.f32 %v4210_v0, 0.0  ;;  %v847_v0 = vld [vmem:[#allocation2 + $0xc2] sm:$0xff] }
 0x1f1   : > { %v4246_v37 = vpop.f32.mrf.mxu0  ;;  %2316 = vmatpush.bf16.msra.mxu0 %v3343_v10 }
 0x1f2   : > { %5036 = vst [vmem:[#allocation26_spill] sm:$0xff] %v4246_v37  ;;  %v4253_v27 = vpack.c.bf16 %v585_v47, %v5037_v23  ;;  %v848_v47 = vld [vmem:[#allocation2 + $0xca] sm:$0xff] }
 0x1f3   : > { %v1831_v1 = vpop.f32.mrf.mxu2  ;;  %2220 = vmatpush.bf16.msra.mxu3 %v3342_v55  ;;  %v4264_v23 = vpack.c.bf16 %v848_v47, %v847_v0  ;;  %v850_v47 = vld [vmem:[#allocation2 + $0xe2] sm:$0xff] }
 0x1f5   : > { %v1742_v2 = vpop.f32.mrf.mxu1 }
 0x1f6   : > { %v1743_v28 = vadd.f32 %v4053_v20, %v1742_v2 }
 0x1f8   : > { %v4248_v13 = vadd.f32 %v1831_v1, %v1743_v28  ;;  %2169 = vmatmul.bf16.gmra.mxu2 %v4244_v19  ;;  %v799_v28 = vld [vmem:[#allocation2 + $0x180] sm:$0xff] }
 0x1f9   : > { %v4261_v60 = vpop.f32.mrf.mxu0  ;;  %v1100_v37 = vpack.c.bf16 %v800_v25, %v799_v28 }
 0x1fa   : > { %5038 = vst [vmem:[#allocation27_spill] sm:$0xff] %v4261_v60 }
 0x1fb   : > { %v1834_v51 = vpop.f32.mrf.mxu2 }
 0x1fc   : > { %2031 = vmatmul.bf16.gmra.mxu0 %v4198_v39 }
 0x1fd   : > { %v1745_v52 = vpop.f32.mrf.mxu1 }
 0x1fe   : > { %v1746_v9 = vadd.f32 %v4053_v20, %v1745_v52 }
 0x200   : > { %1853 = vmatmul.bf16.gmra.mxu3 %v4126_v22  ;;  %2080 = vmatmul.bf16.gmra.mxu1 %v4057_v31  ;;  %v4259_v1 = vadd.f32 %v1834_v51, %v1746_v9  ;;  %v3358_v31 = vld [vmem:[#allocation8 + $0x238] sm:$0xff] }
 0x201   : > { %2398 = vmatpush.bf16.msra.mxu1 %v3358_v31  ;;  %v4269_v51 = vpop.f32.mrf.mxu0  ;;  %v899_v31 = vld [vmem:[#allocation2 + $0x39] sm:$0xff] }
 0x202   : > { %5039 = vst [vmem:[#allocation28_spill] sm:$0xff] %v4269_v51 }
 0x203   : > { %v1836_v10 = vpop.f32.mrf.mxu2 }
 0x205   : > { %v1747_v2 = vpop.f32.mrf.mxu1 }
 0x206   : > { %v1748_v39 = vadd.f32 %v4053_v20, %v1747_v2 }
 0x208   : > { %v4266_v52 = vadd.f32 %v1836_v10, %v1748_v39  ;;  %2174 = vmatmul.bf16.gmra.mxu2 %v4264_v23  ;;  %v849_v10 = vld [vmem:[#allocation2 + $0xda] sm:$0xff] }
 0x209   : > { %v4276_v28 = vpop.f32.mrf.mxu0  ;;  %v4279_v39 = vpack.c.bf16 %v850_v47, %v849_v10  ;;  %v3341_v10 = vld [vmem:[#allocation8 + $0x1b0] sm:$0xff] }
 0x20a   : > { %5040 = vst [vmem:[#allocation29_spill] sm:$0xff] %v4276_v28  ;;  %2221 = vmatpush.bf16.msra.mxu3 %v3341_v10 }
 0x20b   : > { %v1839_v55 = vpop.f32.mrf.mxu2 }
 0x20c   : > { %2036 = vmatmul.bf16.gmra.mxu0 %v1100_v37 }
 0x20d   : > { %v1750_v9 = vpop.f32.mrf.mxu1 }
 0x20e   : > { %v1751_v60 = vadd.f32 %v4053_v20, %v1750_v9  ;;  %v898_v9 = vld [vmem:[#allocation2 + $0x31] sm:$0xff] }
 0x210   : > { %1858 = vmatmul.bf16.gmra.mxu3 %v4146_v3  ;;  %2085 = vmatmul.bf16.gmra.mxu1 %v4069_v32  ;;  %v4274_v0 = vadd.f32 %v1839_v55, %v1751_v60  ;;  %v738_v32 = vld [vmem:[#allocation2 + $0xa] sm:$0xff]  ;;  %v969_v60 = vpack.c.bf16 %v899_v31, %v898_v9  ;;  %v3357_v9 = vld [vmem:[#allocation8 + $0x230] sm:$0xff] }
 0x211   : > { %v964_v55 = vpack.c.bf16 %v738_v32, %v737_v53  ;;  %v4286_v43 = vpop.f32.mrf.mxu0  ;;  %v901_v31 = vld [vmem:[#allocation2 + $0x51] sm:$0xff]  ;;  %v900_v53 = vld [vmem:[#allocation2 + $0x49] sm:$0xff]  ;;  %2399 = vmatpush.bf16.msra.mxu1 %v3357_v9 }
 0x212   : > { %5041 = vst [vmem:[#allocation30_spill] sm:$0xff] %v4286_v43  ;;  %v853_v43 = vld [vmem:[#allocation2 + $0x10a] sm:$0xff] }
 0x213   : > { %v1841_v37 = vpop.f32.mrf.mxu2  ;;  %v903_v9 = vld [vmem:[#allocation2 + $0x69] sm:$0xff] }
 0x215   : > { %v1752_v2 = vpop.f32.mrf.mxu1 }
 0x216   : > { %v1753_v25 = vadd.f32 %v4053_v20, %v1752_v2  ;;  %v851_v2 = vld [vmem:[#allocation2 + $0xf2] sm:$0xff] }
 0x218   : > { %v4281_v51 = vadd.f32 %v1841_v37, %v1753_v25  ;;  %2179 = vmatmul.bf16.gmra.mxu2 %v4279_v39  ;;  %v852_v25 = vld [vmem:[#allocation2 + $0xfa] sm:$0xff] }
 0x219   : > { %v4293_v28 = vpack.c.bf16 %v852_v25, %v851_v2  ;;  %v4296_v32 = vpop.f32.mrf.mxu0 }
 0x21a   : > { %5043 = vst [vmem:[#allocation32_spill] sm:$0xff] %v4296_v32 }
 0x21c   : > { %2317 = vmatmul.bf16.vlgmr.msra.gmra.mxu0 %v969_v60  ;;  %v978_v60 = vpack.c.bf16 %v901_v31, %v900_v53  ;;  %v4313_v53 = vpack.c.bf16 %v854_v45, %v853_v43  ;;  %v855_v43 = vld [vmem:[#allocation2 + $0x122] sm:$0xff] }
 0x21d   : > { %v4284_v15 = vpop.f32.mrf.mxu1 }
 0x220   : > { %1872 = vmatmul.bf16.vlgmr.msrb.gmra.mxu3 %v964_v55  ;;  %2090 = vmatmul.bf16.gmra.mxu1 %v4081_v63  ;;  %v4300_v63 = vld [vmem:[#allocation2 + $0xf1] sm:$0xff] }
 0x221   : > { %v1047_v2 = vpack.c.bf16 %v4093_v30, %v4300_v63  ;;  %v4309_v32 = vpop.f32.mrf.mxu0 }
 0x222   : > { %5045 = vst [vmem:[#allocation34_spill] sm:$0xff] %v4309_v32  ;;  %v4324_v32 = vpop.f32.mrf.mxu2 }
 0x223   : > { %v4289_v47 = vpop.f32.mrf.mxu3  ;;  %5049 = vst [vmem:[#allocation38_spill] sm:$0xff] %v4324_v32 }
 0x225   : > { %v4291_v37 = vpop.f32.mrf.mxu1 }
 0x226   : > { %5042 = vst [vmem:[#allocation31_spill] sm:$0xff] %v4291_v37 }
 0x228   : > { %2184 = vmatmul.bf16.gmra.mxu2 %v4293_v28 }
 0x22b   : > { %v4298_v55 = vpop.f32.mrf.mxu3 }
 0x22c   : > { %2322 = vmatmul.bf16.gmra.mxu0 %v978_v60  ;;  %v902_v60 = vld [vmem:[#allocation2 + $0x61] sm:$0xff] }
 0x22d   : > { %v4302_v10 = vpop.f32.mrf.mxu1  ;;  %v987_v62 = vpack.c.bf16 %v903_v9, %v902_v60 }
 0x22e   : > { %5044 = vst [vmem:[#allocation33_spill] sm:$0xff] %v4302_v10 }
 0x230   : > { %1877 = vmatmul.bf16.gmra.mxu3 %v4134_v48  ;;  %2095 = vmatmul.bf16.gmra.mxu1 %v1047_v2  ;;  %v4320_v48 = vpop.f32.mrf.mxu0  ;;  %v3340_v2 = vld [vmem:[#allocation8 + $0x1a8] sm:$0xff] }
 0x231   : > { %5048 = vst [vmem:[#allocation37_spill] sm:$0xff] %v4320_v48  ;;  %2222 = vmatpush.bf16.msra.mxu3 %v3340_v2  ;;  %v3356_v48 = vld [vmem:[#allocation8 + $0x228] sm:$0xff]  ;;  %v4337_v2 = vpop.f32.mrf.mxu2 }
 0x232   : > { %2400 = vmatpush.bf16.msra.mxu1 %v3356_v48  ;;  %5052 = vst [vmem:[#allocation41_spill] sm:$0xff] %v4337_v2 }
 0x233   : > { %v4307_v25 = vpop.f32.mrf.mxu3 }
 0x235   : > { %v4311_v31 = vpop.f32.mrf.mxu1 }
 0x236   : > { %5046 = vst [vmem:[#allocation35_spill] sm:$0xff] %v4311_v31  ;;  %v856_v31 = vld [vmem:[#allocation2 + $0x12a] sm:$0xff] }
 0x237   : > { %v4330_v60 = vpack.c.bf16 %v856_v31, %v855_v43 }
 0x238   : > { %2189 = vmatmul.bf16.gmra.mxu2 %v4313_v53 }
 0x23b   : > { %v4316_v46 = vpop.f32.mrf.mxu3 }
 0x23c   : > { %2327 = vmatmul.bf16.gmra.mxu0 %v987_v62  ;;  %v905_v62 = vld [vmem:[#allocation2 + $0x81] sm:$0xff] }
 0x23d   : > { %v4318_v30 = vpop.f32.mrf.mxu1 }
 0x23e   : > { %5047 = vst [vmem:[#allocation36_spill] sm:$0xff] %v4318_v30  ;;  %v4332_v30 = vpop.f32.mrf.mxu0 }
 0x23f   : > { %5051 = vst [vmem:[#allocation40_spill] sm:$0xff] %v4332_v30  ;;  %v857_v30 = vld [vmem:[#allocation2 + $0x13a] sm:$0xff] }
 0x240   : > { %1882 = vmatmul.bf16.gmra.mxu3 %v4154_v14  ;;  %2100 = vmatmul.bf16.gmra.mxu1 %v4115_v7  ;;  %v904_v14 = vld [vmem:[#allocation2 + $0x79] sm:$0xff] }
 0x241   : > { %v996_v7 = vpack.c.bf16 %v905_v62, %v904_v14  ;;  %v4349_v62 = vpop.f32.mrf.mxu2  ;;  %v907_v14 = vld [vmem:[#allocation2 + $0x99] sm:$0xff] }
 0x242   : > { %5056 = vst [vmem:[#allocation45_spill] sm:$0xff] %v4349_v62 }
 0x243   : > { %v4326_v45 = vpop.f32.mrf.mxu3 }
 0x245   : > { %v4328_v9 = vpop.f32.mrf.mxu1 }
 0x246   : > { %5050 = vst [vmem:[#allocation39_spill] sm:$0xff] %v4328_v9  ;;  %v4343_v31 = vpop.f32.mrf.mxu0  ;;  %v858_v9 = vld [vmem:[#allocation2 + $0x142] sm:$0xff] }
 0x247   : > { %5054 = vst [vmem:[#allocation43_spill] sm:$0xff] %v4343_v31  ;;  %v4351_v48 = vpack.c.bf16 %v858_v9, %v857_v30  ;;  %v3339_v30 = vld [vmem:[#allocation8 + $0x1a0] sm:$0xff]  ;;  %v1756_v9 = vadd.f32 %v4053_v20, %v4289_v47  ;;  %v1758_v47 = vadd.f32 %v4053_v20, %v4298_v55 }
 0x248   : > { %2194 = vmatmul.bf16.gmra.mxu2 %v4330_v60  ;;  %2223 = vmatpush.bf16.msra.mxu3 %v3339_v30 }
 0x249   : > { %v4360_v37 = vpop.f32.mrf.mxu2 }
 0x24a   : > { %5059 = vst [vmem:[#allocation48_spill] sm:$0xff] %v4360_v37 }
 0x24b   : > { %v4335_v38 = vpop.f32.mrf.mxu3 }
 0x24c   : > { %2332 = vmatmul.bf16.gmra.mxu0 %v996_v7  ;;  %v906_v7 = vld [vmem:[#allocation2 + $0x91] sm:$0xff] }
 0x24d   : > { %v4339_v10 = vpop.f32.mrf.mxu1 }
 0x24e   : > { %5053 = vst [vmem:[#allocation42_spill] sm:$0xff] %v4339_v10  ;;  %v1005_v10 = vpack.c.bf16 %v907_v14, %v906_v7  ;;  %v859_v14 = vld [vmem:[#allocation2 + $0x152] sm:$0xff]  ;;  %v860_v7 = vld [vmem:[#allocation2 + $0x15a] sm:$0xff] }
 0x250   : > { %1887 = vmatmul.bf16.gmra.mxu3 %v4172_v54  ;;  %2105 = vmatmul.bf16.gmra.mxu1 %v4136_v49  ;;  %v4356_v49 = vpop.f32.mrf.mxu0 }
 0x251   : > { %5057 = vst [vmem:[#allocation46_spill] sm:$0xff] %v4356_v49  ;;  %v4377_v30 = vpop.f32.mrf.mxu2 }
 0x252   : > { %5062 = vst [vmem:[#allocation51_spill] sm:$0xff] %v4377_v30 }
 0x253   : > { %v4345_v43 = vpop.f32.mrf.mxu3 }
 0x255   : > { %v4347_v17 = vpop.f32.mrf.mxu1 }
 0x256   : > { %5055 = vst [vmem:[#allocation44_spill] sm:$0xff] %v4347_v17 }
 0x258   : > { %2199 = vmatmul.bf16.gmra.mxu2 %v4351_v48  ;;  %v4368_v49 = vpop.f32.mrf.mxu0 }
 0x259   : > { %5060 = vst [vmem:[#allocation49_spill] sm:$0xff] %v4368_v49 }
 0x25b   : > { %v4354_v2 = vpop.f32.mrf.mxu3 }
 0x25c   : > { %2337 = vmatmul.bf16.gmra.mxu0 %v1005_v10  ;;  %v4370_v10 = vpack.c.bf16 %v860_v7, %v859_v14  ;;  %v3354_v14 = vld [vmem:[#allocation8 + $0x218] sm:$0xff]  ;;  %v1761_v7 = vadd.f32 %v4053_v20, %v4307_v25  ;;  %v1763_v25 = vadd.f32 %v4053_v20, %v4316_v46  ;;  %v4411_v20 = vld [vmem:[%s5013_s4] ss:$0 sm:$0xff] }
 0x25d   : > { %v4358_v31 = vpop.f32.mrf.mxu1  ;;  %v1766_v46 = vadd.f32 %v4411_v20, %v4326_v45  ;;  %v1768_v45 = vadd.f32 %v4411_v20, %v4335_v38  ;;  %v3366_v38 = vld [vmem:[#allocation9 + $0x38] sm:$0xff] }
 0x25e   : > { %5058 = vst [vmem:[#allocation47_spill] sm:$0xff] %v4358_v31  ;;  %v909_v31 = vld [vmem:[#allocation2 + $0xb1] sm:$0xff]  ;;  %2603 = vmatpush.bf16.msra.mxu2 %v3366_v38 }
 0x260   : > { %1892 = vmatmul.bf16.gmra.mxu3 %v4190_v11  ;;  %2110 = vmatmul.bf16.gmra.mxu1 %v4107_v56  ;;  %v908_v56 = vld [vmem:[#allocation2 + $0xa9] sm:$0xff] }
 0x261   : > { %v3355_v11 = vld [vmem:[#allocation8 + $0x220] sm:$0xff]  ;;  %v1014_v32 = vpack.c.bf16 %v909_v31, %v908_v56 }
 0x262   : > { %2401 = vmatpush.bf16.msra.mxu1 %v3355_v11  ;;  %v861_v31 = vld [vmem:[#allocation2 + $0x16a] sm:$0xff]  ;;  %v862_v56 = vld [vmem:[#allocation2 + $0x172] sm:$0xff]  ;;  %v4389_v11 = vpop.f32.mrf.mxu2 }
 0x263   : > { %v1844_v17 = vpop.f32.mrf.mxu3  ;;  %5065 = vst [vmem:[#allocation54_spill] sm:$0xff] %v4389_v11 }
 0x264   : > { %v4366_v62 = vadd.f32 %v1844_v17, %v1756_v9  ;;  %v4381_v9 = vpop.f32.mrf.mxu0 }
 0x265   : > { %v4372_v37 = vpop.f32.mrf.mxu1  ;;  %5063 = vst [vmem:[#allocation52_spill] sm:$0xff] %v4381_v9  ;;  %v911_v9 = vld [vmem:[#allocation2 + $0xc9] sm:$0xff] }
 0x266   : > { %5061 = vst [vmem:[#allocation50_spill] sm:$0xff] %v4372_v37  ;;  %2402 = vmatpush.bf16.msra.mxu1 %v3354_v14  ;;  %v910_v37 = vld [vmem:[#allocation2 + $0xc1] sm:$0xff] }
 0x268   : > { %2204 = vmatmul.bf16.gmra.mxu2 %v4370_v10 }
 0x26b   : > { %v1846_v6 = vpop.f32.mrf.mxu3 }
 0x26c   : > { %v4379_v17 = vadd.f32 %v1846_v6, %v1758_v47  ;;  %2342 = vmatmul.bf16.gmra.mxu0 %v1014_v32  ;;  %v3353_v32 = vld [vmem:[#allocation8 + $0x210] sm:$0xff]  ;;  %v4393_v47 = vpack.c.bf16 %v862_v56, %v861_v31  ;;  %v4398_v14 = vpop.f32.mrf.mxu0  ;;  %v4404_v31 = vpop.f32.mrf.mxu2  ;;  %v3338_v56 = vld [vmem:[#allocation8 + $0x198] sm:$0xff] }
 0x26d   : > { %v4387_v49 = vpop.f32.mrf.mxu1  ;;  %2403 = vmatpush.bf16.msra.mxu1 %v3353_v32  ;;  %5066 = vst [vmem:[#allocation55_spill] sm:$0xff] %v4398_v14  ;;  %2224 = vmatpush.bf16.msra.mxu3 %v3338_v56  ;;  %v912_v14 = vld [vmem:[#allocation2 + $0xd9] sm:$0xff] }
 0x26e   : > { %5064 = vst [vmem:[#allocation53_spill] sm:$0xff] %v4387_v49  ;;  %v1023_v49 = vpack.c.bf16 %v911_v9, %v910_v37 }
 0x26f   : > { %5068 = vst [vmem:[#allocation57_spill] sm:$0xff] %v4404_v31 }
 0x270   : > { %1897 = vmatmul.bf16.gmra.mxu3 %v4207_v26  ;;  %2115 = vmatmul.bf16.gmra.mxu1 %v4126_v22  ;;  %v3352_v22 = vld [vmem:[#allocation8 + $0x208] sm:$0xff] }
 0x271   : > { %2404 = vmatpush.bf16.msra.mxu1 %v3352_v22 }
 0x273   : > { %v1849_v55 = vpop.f32.mrf.mxu3 }
 0x274   : > { %v4391_v6 = vadd.f32 %v1849_v55, %v1761_v7  ;;  %v3351_v55 = vld [vmem:[#allocation8 + $0x200] sm:$0xff]  ;;  %v4415_v9 = vpop.f32.mrf.mxu0 }
 0x275   : > { %v4400_v11 = vpop.f32.mrf.mxu1  ;;  %2405 = vmatpush.bf16.msra.mxu1 %v3351_v55  ;;  %5069 = vst [vmem:[#allocation58_spill] sm:$0xff] %v4415_v9  ;;  %v4423_v55 = vpop.f32.mrf.mxu2 }
 0x276   : > { %5067 = vst [vmem:[#allocation56_spill] sm:$0xff] %v4400_v11 }
 0x278   : > { %2209 = vmatmul.bf16.gmra.mxu2 %v4393_v47 }
 0x27b   : > { %v1851_v30 = vpop.f32.mrf.mxu3 }
 0x27c   : > { %v4402_v7 = vadd.f32 %v1851_v30, %v1763_v25  ;;  %2347 = vmatmul.bf16.gmra.mxu0 %v1023_v49  ;;  %v863_v49 = vld [vmem:[#allocation2 + $0x182] sm:$0xff]  ;;  %v864_v30 = vld [vmem:[#allocation2 + $0x18a] sm:$0xff] }
 0x27d   : > { %v4419_v22 = vpop.f32.mrf.mxu1  ;;  %v913_v25 = vld [vmem:[#allocation2 + $0xe1] sm:$0xff] }
 0x27e   : > { %5070 = vst [vmem:[#allocation59_spill] sm:$0xff] %v4419_v22  ;;  %v1032_v56 = vpack.c.bf16 %v913_v25, %v912_v14  ;;  %v915_v14 = vld [vmem:[#allocation2 + $0xf9] sm:$0xff] }
 0x280   : > { %1902 = vmatmul.bf16.gmra.mxu3 %v4230_v12  ;;  %2120 = vmatmul.bf16.gmra.mxu1 %v4146_v3  ;;  %v4421_v3 = vpack.c.bf16 %v864_v30, %v863_v49  ;;  %v1771_v49 = vadd.f32 %v4411_v20, %v4345_v43 }
 0x283   : > { %v1854_v37 = vpop.f32.mrf.mxu3 }
 0x284   : > { %v4417_v32 = vadd.f32 %v1854_v37, %v1766_v46  ;;  %v4430_v46 = vpop.f32.mrf.mxu0 }
 0x285   : > { %5071 = vst [vmem:[#allocation60_spill] sm:$0xff] %v4430_v46  ;;  %v4432_v37 = vpop.f32.mrf.mxu1 }
 0x286   : > { %5072 = vst [vmem:[#allocation61_spill] sm:$0xff] %v4432_v37  ;;  %v931_v37 = vld [vmem:[#allocation2 + $0x3a] sm:$0xff] }
 0x288   : > { %2214 = vmatmul.bf16.gmra.mxu2 %v4421_v3 }
 0x28b   : > { %v1856_v11 = vpop.f32.mrf.mxu3 }
 0x28c   : > { %v4428_v31 = vadd.f32 %v1856_v11, %v1768_v45  ;;  %2352 = vmatmul.bf16.gmra.mxu0 %v1032_v56  ;;  %v4440_v25 = vpop.f32.mrf.mxu0  ;;  %v1773_v11 = vadd.f32 %v4411_v20, %v4354_v2  ;;  %v1041_v56 = vpack.c.bf16 %v915_v14, %v4300_v63  ;;  %v917_v63 = vld [vmem:[#allocation2 + $0x111] sm:$0xff]  ;;  %v916_v14 = vld [vmem:[#allocation2 + $0x109] sm:$0xff] }
 0x28d   : > { %5073 = vst [vmem:[#allocation62_spill] sm:$0xff] %v4440_v25  ;;  %v4444_v45 = vpop.f32.mrf.mxu1 }
 0x28e   : > { %5074 = vst [vmem:[#allocation63_spill] sm:$0xff] %v4444_v45  ;;  %v1050_v45 = vpack.c.bf16 %v917_v63, %v916_v14  ;;  %v918_v63 = vld [vmem:[#allocation2 + $0x121] sm:$0xff] }
 0x290   : > { %1907 = vmatmul.bf16.gmra.mxu3 %v4244_v19  ;;  %2125 = vmatmul.bf16.gmra.mxu1 %v4253_v27  ;;  %v930_v27 = vld [vmem:[#allocation2 + $0x32] sm:$0xff] }
 0x291   : > { %v970_v43 = vpack.c.bf16 %v931_v37, %v930_v27 }
 0x293   : > { %v1859_v30 = vpop.f32.mrf.mxu3 }
 0x294   : > { %v4438_v9 = vadd.f32 %v1859_v30, %v1771_v49  ;;  %v3337_v49 = vld [vmem:[#allocation8 + $0x190] sm:$0xff]  ;;  %v4450_v30 = vpop.f32.mrf.mxu0 }
 0x295   : > { %5075 = vst [vmem:[#allocation64_spill] sm:$0xff] %v4450_v30  ;;  %2225 = vmatpush.bf16.msra.mxu3 %v3337_v49  ;;  %v4452_v2 = vpop.f32.mrf.mxu1  ;;  %v919_v49 = vld [vmem:[#allocation2 + $0x129] sm:$0xff] }
 0x296   : > { %5076 = vst [vmem:[#allocation65_spill] sm:$0xff] %v4452_v2  ;;  %v1059_v14 = vpack.c.bf16 %v919_v49, %v918_v63  ;;  %v935_v30 = vld [vmem:[#allocation2 + $0x6a] sm:$0xff]  ;;  %v920_v63 = vld [vmem:[#allocation2 + $0x139] sm:$0xff] }
 0x29b   : > { %v1861_v46 = vpop.f32.mrf.mxu3 }
 0x29c   : > { %v4447_v22 = vadd.f32 %v1861_v46, %v1773_v11  ;;  %2357 = vmatmul.bf16.gmra.mxu0 %v1041_v56  ;;  %v4459_v11 = vpop.f32.mrf.mxu0 }
 0x29d   : > { %5077 = vst [vmem:[#allocation66_spill] sm:$0xff] %v4459_v11  ;;  %v4461_v37 = vpop.f32.mrf.mxu1  ;;  %v934_v11 = vld [vmem:[#allocation2 + $0x62] sm:$0xff] }
 0x29e   : > { %5078 = vst [vmem:[#allocation67_spill] sm:$0xff] %v4461_v37 }
 0x2a0   : > { %1912 = vmatmul.bf16.gmra.mxu3 %v4264_v23  ;;  %2406 = vmatmul.bf16.vlgmr.msra.gmra.mxu1 %v970_v43  ;;  %v3365_v43 = vld [vmem:[#allocation9 + $0x30] sm:$0xff] }
 0x2a1   : > { %2604 = vmatpush.bf16.msra.mxu2 %v3365_v43 }
 0x2a3   : > { %v1873_v38 = vpop.f32.mrf.mxu3 }
 0x2a4   : > { %v4455_v25 = vadd.f32 %v1873_v38, %v4059_v33  ;;  %v4468_v33 = vpop.f32.mrf.mxu0 }
 0x2a5   : > { %5079 = vst [vmem:[#allocation68_spill] sm:$0xff] %v4468_v33  ;;  %v4470_v38 = vpop.f32.mrf.mxu1  ;;  %v921_v33 = vld [vmem:[#allocation2 + $0x141] sm:$0xff] }
 0x2a6   : > { %5080 = vst [vmem:[#allocation69_spill] sm:$0xff] %v4470_v38 }
 0x2ab   : > { %v4457_v46 = vpop.f32.mrf.mxu3 }
 0x2ac   : > { %2362 = vmatmul.bf16.gmra.mxu0 %v1050_v45  ;;  %v4475_v2 = vpop.f32.mrf.mxu0 }
 0x2ad   : > { %5081 = vst [vmem:[#allocation70_spill] sm:$0xff] %v4475_v2 }
 0x2b0   : > { %1917 = vmatmul.bf16.gmra.mxu3 %v4279_v39  ;;  %2411 = vmatmul.bf16.gmra.mxu1 %v4172_v54  ;;  %v988_v54 = vpack.c.bf16 %v935_v30, %v934_v11 }
 0x2b3   : > { %v1878_v56 = vpop.f32.mrf.mxu3 }
 0x2b4   : > { %v4466_v27 = vadd.f32 %v1878_v56, %v4090_v18  ;;  %v3336_v18 = vld [vmem:[#allocation8 + $0x188] sm:$0xff]  ;;  %v4478_v56 = vpop.f32.mrf.mxu1  ;;  %v4483_v38 = vpop.f32.mrf.mxu0 }
 0x2b5   : > { %5082 = vst [vmem:[#allocation71_spill] sm:$0xff] %v4478_v56  ;;  %2226 = vmatpush.bf16.msra.mxu3 %v3336_v18 }
 0x2bb   : > { %v1880_v45 = vpop.f32.mrf.mxu3 }
 0x2bc   : > { %v4473_v37 = vadd.f32 %v1880_v45, %v4099_v41  ;;  %2367 = vmatmul.bf16.gmra.mxu0 %v1059_v14  ;;  %v1068_v41 = vpack.c.bf16 %v921_v33, %v920_v63  ;;  %v4485_v30 = vpop.f32.mrf.mxu1  ;;  %v3364_v33 = vld [vmem:[#allocation9 + $0x28] sm:$0xff] }
 0x2bd   : > { %5083 = vst [vmem:[#allocation72_spill] sm:$0xff] %v4485_v30  ;;  %v923_v63 = vld [vmem:[#allocation2 + $0x159] sm:$0xff]  ;;  %2605 = vmatpush.bf16.msra.mxu2 %v3364_v33  ;;  %v924_v33 = vld [vmem:[#allocation2 + $0x169] sm:$0xff] }
 0x2be   : > { %v3363_v30 = vld [vmem:[#allocation9 + $0x20] sm:$0xff] }
 0x2c0   : > { %1922 = vmatmul.bf16.gmra.mxu3 %v4293_v28  ;;  %2416 = vmatmul.bf16.gmra.mxu1 %v988_v54  ;;  %v4492_v54 = vpop.f32.mrf.mxu0 }
 0x2c1   : > { %2606 = vmatpush.bf16.msra.mxu2 %v3363_v30 }
 0x2c3   : > { %v1883_v43 = vpop.f32.mrf.mxu3 }
 0x2c4   : > { %v4481_v49 = vadd.f32 %v1883_v43, %v4110_v40  ;;  %v4497_v18 = vpop.f32.mrf.mxu1  ;;  %v922_v43 = vld [vmem:[#allocation2 + $0x151] sm:$0xff] }
 0x2c5   : > { %5084 = vst [vmem:[#allocation73_spill] sm:$0xff] %v4497_v18  ;;  %v1077_v2 = vpack.c.bf16 %v923_v63, %v922_v43  ;;  %v925_v43 = vld [vmem:[#allocation2 + $0x171] sm:$0xff] }
 0x2cb   : > { %v1885_v14 = vpop.f32.mrf.mxu3 }
 0x2cc   : > { %v4488_v11 = vadd.f32 %v1885_v14, %v4117_v8  ;;  %2372 = vmatmul.bf16.gmra.mxu0 %v1068_v41  ;;  %v4502_v14 = vpop.f32.mrf.mxu0 }
 0x2d0   : > { %1927 = vmatmul.bf16.gmra.mxu3 %v4313_v53  ;;  %2421 = vmatmul.bf16.gmra.mxu1 %v4207_v26  ;;  %v4504_v26 = vpop.f32.mrf.mxu1 }
 0x2d1   : > { %5085 = vst [vmem:[#allocation74_spill] sm:$0xff] %v4504_v26 }
 0x2d3   : > { %v1888_v45 = vpop.f32.mrf.mxu3 }
 0x2d4   : > { %v4495_v40 = vadd.f32 %v1888_v45, %v4129_v34  ;;  %v3335_v34 = vld [vmem:[#allocation8 + $0x180] sm:$0xff]  ;;  %v4511_v63 = vpop.f32.mrf.mxu0 }
 0x2d5   : > { %2227 = vmatpush.bf16.msra.mxu3 %v3335_v34 }
 0x2db   : > { %v1890_v8 = vpop.f32.mrf.mxu3 }
 0x2dc   : > { %v4500_v41 = vadd.f32 %v1890_v8, %v4138_v50  ;;  %2377 = vmatmul.bf16.gmra.mxu0 %v1077_v2  ;;  %v4513_v50 = vpop.f32.mrf.mxu1  ;;  %v1086_v2 = vpack.c.bf16 %v925_v43, %v924_v33  ;;  %v927_v33 = vld [vmem:[#allocation2 + $0x189] sm:$0xff] }
 0x2dd   : > { %5086 = vst [vmem:[#allocation75_spill] sm:$0xff] %v4513_v50  ;;  %v926_v50 = vld [vmem:[#allocation2 + $0x181] sm:$0xff] }
 0x2de   : > { %v1095_v43 = vpack.c.bf16 %v927_v33, %v926_v50 }
 0x2e0   : > { %1932 = vmatmul.bf16.gmra.mxu3 %v4330_v60  ;;  %2426 = vmatmul.bf16.gmra.mxu1 %v4230_v12  ;;  %v4520_v12 = vpop.f32.mrf.mxu0 }
 0x2e3   : > { %v1893_v45 = vpop.f32.mrf.mxu3 }
 0x2e4   : > { %v4509_v18 = vadd.f32 %v1893_v45, %v4149_v5  ;;  %v4522_v34 = vpop.f32.mrf.mxu1 }
 0x2e5   : > { %5087 = vst [vmem:[#allocation76_spill] sm:$0xff] %v4522_v34 }
 0x2eb   : > { %v1895_v8 = vpop.f32.mrf.mxu3 }
 0x2ec   : > { %v4516_v26 = vadd.f32 %v1895_v8, %v4156_v16  ;;  %2382 = vmatmul.bf16.gmra.mxu0 %v1086_v2  ;;  %v4527_v8 = vpop.f32.mrf.mxu0 }
 0x2f0   : > { %1937 = vmatmul.bf16.gmra.mxu3 %v4351_v48  ;;  %2431 = vmatmul.bf16.gmra.mxu1 %v4244_v19  ;;  %v4532_v19 = vpop.f32.mrf.mxu1 }
 0x2f1   : > { %5088 = vst [vmem:[#allocation77_spill] sm:$0xff] %v4532_v19 }
 0x2f3   : > { %v1898_v5 = vpop.f32.mrf.mxu3 }
 0x2f4   : > { %v4525_v45 = vadd.f32 %v1898_v5, %v4167_v36 }
 0x2f8   : > { %v4539_v34 = vpop.f32.mrf.mxu1 }
 0x2f9   : > { %5089 = vst [vmem:[#allocation78_spill] sm:$0xff] %v4539_v34 }
 0x2fb   : > { %v1900_v16 = vpop.f32.mrf.mxu3 }
 0x2fc   : > { %v4530_v2 = vadd.f32 %v1900_v16, %v4174_v44  ;;  %2387 = vmatmul.bf16.gmra.mxu0 %v1095_v43  ;;  %v867_v16 = vld [vmem:[#allocation2 + $0x38] sm:$0xff] }
 0x300   : > { %1942 = vmatmul.bf16.gmra.mxu3 %v4370_v10  ;;  %2436 = vmatmul.bf16.gmra.mxu1 %v4264_v23  ;;  %v4546_v44 = vpop.f32.mrf.mxu1  ;;  %v3362_v23 = vld [vmem:[#allocation9 + $0x18] sm:$0xff] }
 0x301   : > { %5090 = vst [vmem:[#allocation79_spill] sm:$0xff] %v4546_v44  ;;  %2607 = vmatpush.bf16.msra.mxu2 %v3362_v23  ;;  %v869_v23 = vld [vmem:[#allocation2 + $0x50] sm:$0xff] }
 0x303   : > { %v1903_v36 = vpop.f32.mrf.mxu3 }
 0x304   : > { %v4537_v5 = vadd.f32 %v1903_v36, %v4185_v61 }
 0x308   : > { %v4551_v36 = vpop.f32.mrf.mxu1 }
 0x309   : > { %5091 = vst [vmem:[#allocation80_spill] sm:$0xff] %v4551_v36  ;;  %v868_v36 = vld [vmem:[#allocation2 + $0x48] sm:$0xff] }
 0x30a   : > { %v977_v56 = vpack.c.bf16 %v869_v23, %v868_v36 }
 0x30b   : > { %v1905_v30 = vpop.f32.mrf.mxu3 }
 0x30c   : > { %v4542_v50 = vadd.f32 %v1905_v30, %v4192_v21  ;;  %v866_v21 = vld [vmem:[#allocation2 + $0x30] sm:$0xff] }
 0x30d   : > { %v968_v30 = vpack.c.bf16 %v867_v16, %v866_v21 }
 0x310   : > { %1947 = vmatmul.bf16.gmra.mxu3 %v4393_v47  ;;  %2441 = vmatmul.bf16.gmra.mxu1 %v4279_v39 }
 0x313   : > { %v1908_v33 = vpop.f32.mrf.mxu3 }
 0x314   : > { %v4549_v43 = vadd.f32 %v1908_v33, %v4202_v42  ;;  %v4560_v42 = vpop.f32.mrf.mxu1 }
 0x315   : > { %5092 = vst [vmem:[#allocation81_spill] sm:$0xff] %v4560_v42 }
 0x31b   : > { %v1910_v61 = vpop.f32.mrf.mxu3 }
 0x31c   : > { %v4554_v34 = vadd.f32 %v1910_v61, %v4212_v57  ;;  %v4565_v57 = vpop.f32.mrf.mxu1 }
 0x31d   : > { %5093 = vst [vmem:[#allocation82_spill] sm:$0xff] %v4565_v57  ;;  %v877_v57 = vld [vmem:[#allocation2 + $0xb0] sm:$0xff] }
 0x320   : > { %2228 = vmatmul.bf16.vlgmr.msra.gmra.mxu3 %v968_v30  ;;  %2446 = vmatmul.bf16.gmra.mxu1 %v4293_v28  ;;  %v871_v30 = vld [vmem:[#allocation2 + $0x68] sm:$0xff] }
 0x323   : > { %v1913_v39 = vpop.f32.mrf.mxu3 }
 0x324   : > { %v4558_v44 = vadd.f32 %v1913_v39, %v4225_v29  ;;  %v3361_v29 = vld [vmem:[#allocation9 + $0x10] sm:$0xff]  ;;  %v4571_v16 = vpop.f32.mrf.mxu1 }
 0x325   : > { %2608 = vmatpush.bf16.msra.mxu2 %v3361_v29  ;;  %5094 = vst [vmem:[#allocation83_spill] sm:$0xff] %v4571_v16  ;;  %v870_v39 = vld [vmem:[#allocation2 + $0x60] sm:$0xff]  ;;  %v874_v16 = vld [vmem:[#allocation2 + $0x90] sm:$0xff] }
 0x326   : > { %v986_v36 = vpack.c.bf16 %v871_v30, %v870_v39 }
 0x32b   : > { %v1915_v33 = vpop.f32.mrf.mxu3 }
 0x32c   : > { %v4563_v19 = vadd.f32 %v1915_v33, %v4232_v4  ;;  %v4582_v33 = vpop.f32.mrf.mxu2 }
 0x330   : > { %2233 = vmatmul.bf16.gmra.mxu3 %v977_v56  ;;  %2451 = vmatmul.bf16.gmra.mxu1 %v4313_v53  ;;  %v4577_v53 = vpop.f32.mrf.mxu1 }
 0x331   : > { %5095 = vst [vmem:[#allocation84_spill] sm:$0xff] %v4577_v53 }
 0x333   : > { %v1918_v61 = vpop.f32.mrf.mxu3 }
 0x334   : > { %v4569_v28 = vadd.f32 %v1918_v61, %v4241_v24  ;;  %v873_v61 = vld [vmem:[#allocation2 + $0x80] sm:$0xff]  ;;  %v4590_v39 = vpop.f32.mrf.mxu2 }
 0x33b   : > { %v1920_v21 = vpop.f32.mrf.mxu3 }
 0x33c   : > { %v4574_v4 = vadd.f32 %v1920_v21, %v4248_v13  ;;  %v872_v13 = vld [vmem:[#allocation2 + $0x78] sm:$0xff]  ;;  %v4587_v21 = vpop.f32.mrf.mxu1 }
 0x33d   : > { %v995_v30 = vpack.c.bf16 %v873_v61, %v872_v13  ;;  %v4600_v61 = vpop.f32.mrf.mxu2 }
 0x340   : > { %2238 = vmatmul.bf16.gmra.mxu3 %v986_v36  ;;  %2456 = vmatmul.bf16.gmra.mxu1 %v4330_v60  ;;  %v3360_v36 = vld [vmem:[#allocation9 + $0x8] sm:$0xff] }
 0x341   : > { %2609 = vmatpush.bf16.msra.mxu2 %v3360_v36 }
 0x343   : > { %v1923_v56 = vpop.f32.mrf.mxu3 }
 0x344   : > { %v4580_v24 = vadd.f32 %v1923_v56, %v4259_v1  ;;  %v4595_v56 = vpop.f32.mrf.mxu1 }
 0x34b   : > { %v1925_v23 = vpop.f32.mrf.mxu3 }
 0x34c   : > { %v4585_v29 = vadd.f32 %v1925_v23, %v4266_v52  ;;  %v875_v52 = vld [vmem:[#allocation2 + $0x98] sm:$0xff] }
 0x34d   : > { %v1004_v13 = vpack.c.bf16 %v875_v52, %v874_v16 }
 0x350   : > { %2243 = vmatmul.bf16.gmra.mxu3 %v995_v30  ;;  %2461 = vmatmul.bf16.gmra.mxu1 %v4351_v48  ;;  %v4603_v48 = vpop.f32.mrf.mxu1 }
 0x353   : > { %v1928_v60 = vpop.f32.mrf.mxu3 }
 0x354   : > { %v4593_v1 = vadd.f32 %v1928_v60, %v4274_v0  ;;  %v4608_v60 = vpop.f32.mrf.mxu2 }
 0x356   : > { %5096 = vst [vmem:[#allocation85_spill] sm:$0xff] %v4593_v1 }
 0x358   : > { %v4610_v42 = vpop.f32.mrf.mxu1 }
 0x35b   : > { %v1930_v53 = vpop.f32.mrf.mxu3 }
 0x35c   : > { %v4598_v23 = vadd.f32 %v1930_v53, %v4281_v51  ;;  %v876_v53 = vld [vmem:[#allocation2 + $0xa8] sm:$0xff] }
 0x35d   : > { %v1013_v16 = vpack.c.bf16 %v877_v57, %v876_v53  ;;  %v878_v57 = vld [vmem:[#allocation2 + $0xc0] sm:$0xff] }
 0x35e   : > { %5097 = vst [vmem:[#allocation86_spill] sm:$0xff] %v4598_v23  ;;  %v879_v23 = vld [vmem:[#allocation2 + $0xc8] sm:$0xff] }
 0x360   : > { %2248 = vmatmul.bf16.gmra.mxu3 %v1004_v13  ;;  %2466 = vmatmul.bf16.gmra.mxu1 %v4370_v10  ;;  %v4616_v10 = vpop.f32.mrf.mxu2  ;;  %v4621_v13 = vpop.f32.mrf.mxu1 }
 0x363   : > { %v1933_v0 = vpop.f32.mrf.mxu3 }
 0x364   : > { %v4606_v30 = vadd.f32 %v1933_v0, %v4366_v62  ;;  %v3359_v0 = vld [vmem:[#allocation9] sm:$0xff] }
 0x365   : > { %2610 = vmatpush.bf16.msra.mxu2 %v3359_v0  ;;  %v881_v0 = vld [vmem:[#allocation2 + $0xe0] sm:$0xff] }
 0x366   : > { %5098 = vst [vmem:[#allocation87_spill] sm:$0xff] %v4606_v30 }
 0x368   : > { %v4623_v1 = vpop.f32.mrf.mxu2 }
 0x36b   : > { %v1935_v36 = vpop.f32.mrf.mxu3 }
 0x36c   : > { %v4613_v51 = vadd.f32 %v1935_v36, %v4379_v17  ;;  %v1022_v36 = vpack.c.bf16 %v879_v23, %v878_v57 }
 0x370   : > { %2253 = vmatmul.bf16.gmra.mxu3 %v1013_v16  ;;  %2471 = vmatmul.bf16.gmra.mxu1 %v4393_v47  ;;  %v4628_v47 = vpop.f32.mrf.mxu1  ;;  %v4634_v16 = vpop.f32.mrf.mxu2 }
 0x373   : > { %v1938_v52 = vpop.f32.mrf.mxu3 }
 0x374   : > { %v4619_v62 = vadd.f32 %v1938_v52, %v4391_v6 }
 0x376   : > { %5099 = vst [vmem:[#allocation88_spill] sm:$0xff] %v4619_v62 }
 0x37b   : > { %v1940_v30 = vpop.f32.mrf.mxu3 }
 0x37c   : > { %v4626_v17 = vadd.f32 %v1940_v30, %v4402_v7  ;;  %v880_v7 = vld [vmem:[#allocation2 + $0xd8] sm:$0xff] }
 0x37d   : > { %v1031_v30 = vpack.c.bf16 %v881_v0, %v880_v7  ;;  %v882_v0 = vld [vmem:[#allocation2 + $0xf0] sm:$0xff] }
 0x37e   : > { %5100 = vst [vmem:[#allocation89_spill] sm:$0xff] %v4626_v17  ;;  %v4639_v17 = vpop.f32.mrf.mxu2 }
 0x380   : > { %2258 = vmatmul.bf16.gmra.mxu3 %v1022_v36  ;;  %2476 = vmatmul.bf16.gmra.mxu1 %v4421_v3 }
 0x383   : > { %v1943_v6 = vpop.f32.mrf.mxu3 }
 0x384   : > { %v4632_v53 = vadd.f32 %v1943_v6, %v4417_v32  ;;  %v1698_v32 = vadd.f32 %v4411_v20, %v4079_v59  ;;  %v883_v6 = vld [vmem:[#allocation2 + $0xf8] sm:$0xff]  ;;  %v5105_v59 = vld [vmem:[#allocation16_spill] sm:$0xff] }
 0x386   : > { %5101 = vst [vmem:[#allocation90_spill] sm:$0xff] %v4632_v53  ;;  %v4646_v3 = vpop.f32.mrf.mxu2  ;;  %v1787_v53 = vadd.f32 %v4076_v58, %v1698_v32  ;;  %v4660_v32 = vpop.f32.mrf.mxu0 }
 0x388   : > { %v1876_v7 = vadd.f32 %v4457_v46, %v1787_v53  ;;  %v5108_v53 = vld [vmem:[#allocation41_spill] sm:$0xff] }
 0x38a   : > { %v1965_v20 = vadd.f32 %v5105_v59, %v1876_v7  ;;  %v884_v59 = vld [vmem:[#allocation2 + $0x108] sm:$0xff] }
 0x38b   : > { %v1945_v52 = vpop.f32.mrf.mxu3 }
 0x38c   : > { %v4637_v62 = vadd.f32 %v1945_v52, %v4428_v31  ;;  %v1963_v31 = vadd.f32 %v4141_v35, %v4455_v25  ;;  %v5107_v25 = vld [vmem:[#allocation31_spill] sm:$0xff] }
 0x38e   : > { %5102 = vst [vmem:[#allocation91_spill] sm:$0xff] %v4637_v62  ;;  %v5106_v62 = vld [vmem:[#allocation38_spill] sm:$0xff] }
 0x390   : > { %2263 = vmatmul.bf16.gmra.mxu3 %v1031_v30  ;;  %v2052_v30 = vadd.f32 %v4284_v15, %v1963_v31  ;;  %v885_v15 = vld [vmem:[#allocation2 + $0x110] sm:$0xff]  ;;  %v5109_v31 = vld [vmem:[#allocation17_spill] sm:$0xff] }
 0x391   : > { %v1968_v7 = vadd.f32 %v5109_v31, %v4466_v27  ;;  %v5111_v27 = vld [vmem:[#allocation18_spill] sm:$0xff] }
 0x392   : > { %v2141_v58 = vadd.f32 %v5106_v62, %v2052_v30 }
 0x393   : > { %v1948_v23 = vpop.f32.mrf.mxu3 }
 0x394   : > { %v4642_v57 = vadd.f32 %v1948_v23, %v4438_v9  ;;  %v1040_v9 = vpack.c.bf16 %v883_v6, %v882_v0 }
 0x396   : > { %5103 = vst [vmem:[#allocation92_spill] sm:$0xff] %v4642_v57  ;;  %v4657_v57 = vpop.f32.mrf.mxu2 }
 0x39b   : > { %v1950_v36 = vpop.f32.mrf.mxu3 }
 0x39c   : > { %v4652_v52 = vadd.f32 %v1950_v36, %v4447_v22  ;;  %v2054_v22 = vadd.f32 %v5107_v25, %v1965_v20  ;;  %v4663_v36 = vpop.f32.mrf.mxu1  ;;  %v1049_v20 = vpack.c.bf16 %v885_v15, %v884_v59  ;;  %v5113_v15 = vld [vmem:[#allocation35_spill] sm:$0xff] }
 0x39e   : > { %5104 = vst [vmem:[#allocation93_spill] sm:$0xff] %v4652_v52  ;;  %v2143_v6 = vadd.f32 %v5108_v53, %v2054_v22  ;;  %v4669_v52 = vpop.f32.mrf.mxu2  ;;  %v1970_v22 = vadd.f32 %v5111_v27, %v4473_v37 }
 0x3a0   : > { %2268 = vmatmul.bf16.gmra.mxu3 %v1040_v9 }
 0x3a3   : > { %v2229_v23 = vpop.f32.mrf.mxu3 }
 0x3a4   : > { %v2230_v35 = vadd.f32 %v2229_v23, %v2141_v58  ;;  %v4673_v23 = vpop.f32.mrf.mxu0  ;;  %v5110_v58 = vld [vmem:[#allocation33_spill] sm:$0xff]  ;;  %v4677_v25 = vpop.f32.mrf.mxu1 }
 0x3a6   : > { %v2319_v46 = vadd.f32 %v4483_v38, %v2230_v35  ;;  %v2057_v35 = vadd.f32 %v5110_v58, %v1968_v7  ;;  %v4683_v59 = vpop.f32.mrf.mxu2 }
 0x3a8   : > { %v2408_v62 = vadd.f32 %v4587_v21, %v2319_v46  ;;  %v5112_v21 = vld [vmem:[#allocation45_spill] sm:$0xff] }
 0x3a9   : > { %v2146_v46 = vadd.f32 %v5112_v21, %v2057_v35 }
 0x3aa   : > { %v2487_v53 = vmax.f32 %v2408_v62, 0.0  ;;  %v887_v62 = vld [vmem:[#allocation2 + $0x128] sm:$0xff] }
 0x3ab   : > { %v2231_v0 = vpop.f32.mrf.mxu3 }
 0x3ac   : > { %v2232_v9 = vadd.f32 %v2231_v0, %v2143_v6  ;;  %v4689_v58 = vpop.f32.mrf.mxu1 }
 0x3ae   : > { %v2321_v30 = vadd.f32 %v4492_v54, %v2232_v9  ;;  %v2059_v9 = vadd.f32 %v5113_v15, %v1970_v22 }
 0x3b0   : > { %v2410_v38 = vadd.f32 %v4595_v56, %v2321_v30  ;;  %2273 = vmatmul.bf16.gmra.mxu3 %v1049_v20  ;;  %v4685_v56 = vpop.f32.mrf.mxu0  ;;  %v5114_v30 = vld [vmem:[#allocation48_spill] sm:$0xff] }
 0x3b1   : > { %v2148_v20 = vadd.f32 %v5114_v30, %v2059_v9 }
 0x3b2   : > { %v2488_v6 = vmax.f32 %v2410_v38, 0.0  ;;  %v5115_v38 = vld [vmem:[#allocation19_spill] sm:$0xff] }
 0x3b3   : > { %v2234_v0 = vpop.f32.mrf.mxu3  ;;  %v1973_v27 = vadd.f32 %v5115_v38, %v4481_v49 }
 0x3b4   : > { %v2519_v31 = vpack.c.bf16 %v2488_v6, %v2487_v53  ;;  %v2235_v54 = vadd.f32 %v2234_v0, %v2146_v46  ;;  %v886_v53 = vld [vmem:[#allocation2 + $0x120] sm:$0xff]  ;;  %v4697_v46 = vpop.f32.mrf.mxu2 }
 0x3b5   : > { %v1058_v0 = vpack.c.bf16 %v887_v62, %v886_v53 }
 0x3b6   : > { %2611 = vmatmul.bf16.vlgmr.msra.gmra.mxu2 %v2519_v31  ;;  %v2324_v7 = vadd.f32 %v4502_v14, %v2235_v54  ;;  %v5116_v14 = vld [vmem:[#allocation36_spill] sm:$0xff] }
 0x3b7   : > { %v2062_v21 = vadd.f32 %v5116_v14, %v1973_v27  ;;  %v5117_v54 = vld [vmem:[#allocation20_spill] sm:$0xff] }
 0x3b8   : > { %v2413_v6 = vadd.f32 %v4603_v48, %v2324_v7  ;;  %v1975_v15 = vadd.f32 %v5117_v54, %v4488_v11  ;;  %v4701_v49 = vpop.f32.mrf.mxu0  ;;  %v888_v11 = vld [vmem:[#allocation2 + $0x138] sm:$0xff] }
 0x3ba   : > { %v2489_v9 = vmax.f32 %v2413_v6, 0.0  ;;  %v889_v6 = vld [vmem:[#allocation2 + $0x140] sm:$0xff] }
 0x3bb   : > { %v2236_v37 = vpop.f32.mrf.mxu3 }
 0x3bc   : > { %v2237_v35 = vadd.f32 %v2236_v37, %v2148_v20  ;;  %v5118_v37 = vld [vmem:[#allocation51_spill] sm:$0xff] }
 0x3bd   : > { %v2151_v48 = vadd.f32 %v5118_v37, %v2062_v21  ;;  %v5122_v37 = vld [vmem:[#allocation42_spill] sm:$0xff] }
 0x3be   : > { %v2326_v22 = vadd.f32 %v4511_v63, %v2237_v35  ;;  %v4704_v63 = vpop.f32.mrf.mxu1  ;;  %v5120_v35 = vld [vmem:[#allocation54_spill] sm:$0xff] }
 0x3c0   : > { %v2415_v31 = vadd.f32 %v4610_v42, %v2326_v22  ;;  %2278 = vmatmul.bf16.gmra.mxu3 %v1058_v0  ;;  %v5119_v42 = vld [vmem:[#allocation39_spill] sm:$0xff]  ;;  %v4709_v0 = vpop.f32.mrf.mxu2  ;;  %v4713_v54 = vpop.f32.mrf.mxu0 }
 0x3c1   : > { %v2064_v38 = vadd.f32 %v5119_v42, %v1975_v15  ;;  %v1067_v15 = vpack.c.bf16 %v889_v6, %v888_v11 }
 0x3c2   : > { %v2490_v30 = vmax.f32 %v2415_v31, 0.0  ;;  %v5121_v31 = vld [vmem:[#allocation21_spill] sm:$0xff] }
 0x3c3   : > { %v2239_v20 = vpop.f32.mrf.mxu3  ;;  %v2153_v53 = vadd.f32 %v5120_v35, %v2064_v38  ;;  %v1978_v14 = vadd.f32 %v5121_v31, %v4495_v40  ;;  %v5124_v35 = vld [vmem:[#allocation57_spill] sm:$0xff] }
 0x3c4   : > { %v2520_v7 = vpack.c.bf16 %v2490_v30, %v2489_v9  ;;  %v2240_v62 = vadd.f32 %v2239_v20, %v2151_v48 }
 0x3c5   : > { %v2067_v48 = vadd.f32 %v5122_v37, %v1978_v14 }
 0x3c6   : > { %2616 = vmatmul.bf16.gmra.mxu2 %v2520_v7  ;;  %v2329_v27 = vadd.f32 %v4520_v12, %v2240_v62  ;;  %v4717_v20 = vpop.f32.mrf.mxu1  ;;  %v5123_v7 = vld [vmem:[#allocation22_spill] sm:$0xff] }
 0x3c7   : > { %v1980_v62 = vadd.f32 %v5123_v7, %v4500_v41 }
 0x3c8   : > { %v2418_v9 = vadd.f32 %v4621_v13, %v2329_v27  ;;  %v4724_v13 = vpop.f32.mrf.mxu2  ;;  %v5125_v27 = vld [vmem:[#allocation44_spill] sm:$0xff]  ;;  %v4727_v6 = vpop.f32.mrf.mxu0 }
 0x3c9   : > { %v2069_v11 = vadd.f32 %v5125_v27, %v1980_v62 }
 0x3ca   : > { %v2491_v42 = vmax.f32 %v2418_v9, 0.0  ;;  %v891_v9 = vld [vmem:[#allocation2 + $0x158] sm:$0xff] }
 0x3cb   : > { %v2241_v22 = vpop.f32.mrf.mxu3  ;;  %v2158_v41 = vadd.f32 %v4423_v55, %v2069_v11  ;;  %v5129_v11 = vld [vmem:[#allocation50_spill] sm:$0xff] }
 0x3cc   : > { %v2242_v21 = vadd.f32 %v2241_v22, %v2153_v53  ;;  %v2156_v53 = vadd.f32 %v5124_v35, %v2067_v48 }
 0x3ce   : > { %v2331_v30 = vadd.f32 %v4527_v8, %v2242_v21  ;;  %v890_v21 = vld [vmem:[#allocation2 + $0x150] sm:$0xff] }
 0x3cf   : > { %v1076_v7 = vpack.c.bf16 %v891_v9, %v890_v21  ;;  %v892_v9 = vld [vmem:[#allocation2 + $0x168] sm:$0xff] }
 0x3d0   : > { %v2420_v12 = vadd.f32 %v4628_v47, %v2331_v30  ;;  %2283 = vmatmul.bf16.gmra.mxu3 %v1067_v15  ;;  %v4729_v47 = vpop.f32.mrf.mxu1  ;;  %v5126_v30 = vld [vmem:[#allocation23_spill] sm:$0xff]  ;;  %v4737_v62 = vpop.f32.mrf.mxu2 }
 0x3d1   : > { %v1983_v15 = vadd.f32 %v5126_v30, %v4509_v18  ;;  %v4741_v55 = vpop.f32.mrf.mxu0  ;;  %v893_v30 = vld [vmem:[#allocation2 + $0x170] sm:$0xff] }
 0x3d2   : > { %v2492_v40 = vmax.f32 %v2420_v12, 0.0 }
 0x3d3   : > { %v2244_v38 = vpop.f32.mrf.mxu3 }
 0x3d4   : > { %v2521_v22 = vpack.c.bf16 %v2492_v40, %v2491_v42  ;;  %v2245_v8 = vadd.f32 %v2244_v38, %v2156_v53  ;;  %v5128_v38 = vld [vmem:[#allocation24_spill] sm:$0xff] }
 0x3d5   : > { %v1985_v35 = vadd.f32 %v5128_v38, %v4516_v26 }
 0x3d6   : > { %2621 = vmatmul.bf16.gmra.mxu2 %v2521_v22  ;;  %v2334_v31 = vadd.f32 %v4660_v32, %v2245_v8  ;;  %v5127_v32 = vld [vmem:[#allocation47_spill] sm:$0xff] }
 0x3d7   : > { %v2072_v40 = vadd.f32 %v5127_v32, %v1983_v15  ;;  %v5130_v15 = vld [vmem:[#allocation25_spill] sm:$0xff] }
 0x3d8   : > { %v2423_v37 = vadd.f32 %v4663_v36, %v2334_v31  ;;  %v4745_v22 = vpop.f32.mrf.mxu1  ;;  %v4749_v31 = vpop.f32.mrf.mxu2  ;;  %v928_v32 = vld [vmem:[#allocation2 + $0x199] sm:$0xff] }
 0x3d9   : > { %v4753_v21 = vpop.f32.mrf.mxu0 }
 0x3da   : > { %v2493_v53 = vmax.f32 %v2423_v37, 0.0 }
 0x3db   : > { %v2246_v14 = vpop.f32.mrf.mxu3 }
 0x3dc   : > { %v2247_v12 = vadd.f32 %v2246_v14, %v2158_v41 }
 0x3de   : > { %v2336_v48 = vadd.f32 %v4673_v23, %v2247_v12  ;;  %v2161_v23 = vadd.f32 %v4582_v33, %v2072_v40  ;;  %v1988_v12 = vadd.f32 %v5130_v15, %v4525_v45  ;;  %v5131_v40 = vld [vmem:[#allocation53_spill] sm:$0xff]  ;;  %v5132_v45 = vld [vmem:[#allocation26_spill] sm:$0xff] }
 0x3e0   : > { %v2425_v42 = vadd.f32 %v4677_v25, %v2336_v48  ;;  %2288 = vmatmul.bf16.gmra.mxu3 %v1076_v7  ;;  %v2074_v25 = vadd.f32 %v5129_v11, %v1985_v35  ;;  %v4757_v37 = vpop.f32.mrf.mxu1  ;;  %v2077_v38 = vadd.f32 %v5131_v40, %v1988_v12  ;;  %v894_v12 = vld [vmem:[#allocation2 + $0x180] sm:$0xff] }
 0x3e2   : > { %v2494_v18 = vmax.f32 %v2425_v42, 0.0  ;;  %v2163_v14 = vadd.f32 %v4590_v39, %v2074_v25  ;;  %v1085_v42 = vpack.c.bf16 %v893_v30, %v892_v9  ;;  %v2166_v11 = vadd.f32 %v4600_v61, %v2077_v38 }
 0x3e3   : > { %v2249_v36 = vpop.f32.mrf.mxu3 }
 0x3e4   : > { %v2522_v8 = vpack.c.bf16 %v2494_v18, %v2493_v53  ;;  %v2250_v27 = vadd.f32 %v2249_v36, %v2161_v23  ;;  %v960_v53 = vld [vmem:[#allocation2 + $0x19a] sm:$0xff]  ;;  %v961_v18 = vld [vmem:[#allocation2 + $0x1a2] sm:$0xff]  ;;  %v1990_v36 = vadd.f32 %v5132_v45, %v4530_v2 }
 0x3e6   : > { %2626 = vmatmul.bf16.gmra.mxu2 %v2522_v8  ;;  %v2339_v41 = vadd.f32 %v4685_v56, %v2250_v27  ;;  %v929_v56 = vld [vmem:[#allocation2 + $0x1a1] sm:$0xff] }
 0x3e7   : > { %v1104_v35 = vpack.c.bf16 %v929_v56, %v928_v32 }
 0x3e8   : > { %v2428_v48 = vadd.f32 %v4689_v58, %v2339_v41  ;;  %v1105_v58 = vpack.c.bf16 %v961_v18, %v960_v53  ;;  %v2442_v9 = vpop.f32.mrf.mxu1  ;;  %v5136_v53 = vld [vmem:[#allocation28_spill] sm:$0xff] }
 0x3e9   : > { %2392 = vmatmul.bf16.gmra.mxu0 %v1104_v35  ;;  %v1995_v18 = vadd.f32 %v5136_v53, %v4542_v50  ;;  %v5138_v50 = vld [vmem:[#allocation29_spill] sm:$0xff] }
 0x3ea   : > { %v2495_v23 = vmax.f32 %v2428_v48, 0.0  ;;  %2481 = vmatmul.bf16.gmra.mxu1 %v1105_v58  ;;  %v5134_v48 = vld [vmem:[#allocation27_spill] sm:$0xff] }
 0x3eb   : > { %v2251_v26 = vpop.f32.mrf.mxu3 }
 0x3ec   : > { %v2252_v33 = vadd.f32 %v2251_v26, %v2163_v14  ;;  %v5133_v14 = vld [vmem:[#allocation56_spill] sm:$0xff] }
 0x3ed   : > { %v2079_v26 = vadd.f32 %v5133_v14, %v1990_v36 }
 0x3ee   : > { %v2341_v7 = vadd.f32 %v4701_v49, %v2252_v33  ;;  %v4765_v49 = vpop.f32.mrf.mxu2  ;;  %v895_v33 = vld [vmem:[#allocation2 + $0x188] sm:$0xff] }
 0x3ef   : > { %v2168_v2 = vadd.f32 %v4608_v60, %v2079_v26  ;;  %v1998_v26 = vadd.f32 %v5138_v50, %v4549_v43 }
 0x3f0   : > { %v2430_v39 = vadd.f32 %v4704_v63, %v2341_v7  ;;  %2293 = vmatmul.bf16.gmra.mxu3 %v1085_v42  ;;  %v2353_v63 = vpop.f32.mrf.mxu0  ;;  %v1993_v7 = vadd.f32 %v5134_v48, %v4537_v5  ;;  %v2444_v35 = vpop.f32.mrf.mxu1  ;;  %v5139_v48 = vld [vmem:[#allocation63_spill] sm:$0xff] }
 0x3f2   : > { %v2496_v8 = vmax.f32 %v2430_v39, 0.0  ;;  %v1094_v39 = vpack.c.bf16 %v895_v33, %v894_v12 }
 0x3f3   : > { %v2254_v27 = vpop.f32.mrf.mxu3 }
 0x3f4   : > { %v2523_v25 = vpack.c.bf16 %v2496_v8, %v2495_v23  ;;  %v2255_v41 = vadd.f32 %v2254_v27, %v2166_v11 }
 0x3f6   : > { %2631 = vmatmul.bf16.gmra.mxu2 %v2523_v25  ;;  %v2344_v30 = vadd.f32 %v4713_v54, %v2255_v41  ;;  %v4773_v61 = vpop.f32.mrf.mxu2  ;;  %v5135_v54 = vld [vmem:[#allocation59_spill] sm:$0xff] }
 0x3f7   : > { %v2082_v60 = vadd.f32 %v5135_v54, %v1993_v7  ;;  %v2087_v7 = vadd.f32 %v5139_v48, %v1998_v26 }
 0x3f8   : > { %v2433_v32 = vadd.f32 %v4717_v20, %v2344_v30  ;;  %v2355_v40 = vpop.f32.mrf.mxu0  ;;  %v2447_v41 = vpop.f32.mrf.mxu1 }
 0x3f9   : > { %v2171_v23 = vadd.f32 %v4616_v10, %v2082_v60 }
 0x3fa   : > { %v2497_v45 = vmax.f32 %v2433_v32, 0.0 }
 0x3fb   : > { %v2256_v15 = vpop.f32.mrf.mxu3 }
 0x3fc   : > { %v2257_v42 = vadd.f32 %v2256_v15, %v2168_v2  ;;  %v3480_v2 = vld [vmem:[#allocation2] sm:$0xff] }
 0x3fd   : > { %v1103_v10 = vpack.c.bf16 %v3480_v2, %v3480_v2 }
 0x3fe   : > { %v2346_v56 = vadd.f32 %v4727_v6, %v2257_v42  ;;  %v5137_v6 = vld [vmem:[#allocation61_spill] sm:$0xff]  ;;  %v4783_v27 = vpop.f32.mrf.mxu2 }
 0x3ff   : > { %v2084_v58 = vadd.f32 %v5137_v6, %v1995_v18 }
 0x400   : > { %v2435_v38 = vadd.f32 %v4729_v47, %v2346_v56  ;;  %2298 = vmatmul.bf16.gmra.mxu3 %v1094_v39  ;;  %v2358_v47 = vpop.f32.mrf.mxu0 }
 0x401   : > { %v2173_v25 = vadd.f32 %v4623_v1, %v2084_v58  ;;  %v5140_v1 = vld [vmem:[#allocation30_spill] sm:$0xff] }
 0x402   : > { %v2498_v5 = vmax.f32 %v2435_v38, 0.0  ;;  %v2000_v42 = vadd.f32 %v5140_v1, %v4554_v34  ;;  %v2176_v38 = vadd.f32 %v4634_v16, %v2087_v7 }
 0x403   : > { %v2259_v36 = vpop.f32.mrf.mxu3 }
 0x404   : > { %v2524_v8 = vpack.c.bf16 %v2498_v5, %v2497_v45  ;;  %v2260_v20 = vadd.f32 %v2259_v36, %v2171_v23  ;;  %v5142_v5 = vld [vmem:[#allocation32_spill] sm:$0xff] }
 0x405   : > { %v2003_v36 = vadd.f32 %v5142_v5, %v4558_v44 }
 0x406   : > { %2636 = vmatmul.bf16.gmra.mxu2 %v2524_v8  ;;  %v2349_v11 = vadd.f32 %v4741_v55, %v2260_v20  ;;  %v4793_v55 = vpop.f32.mrf.mxu2 }
 0x408   : > { %v2438_v15 = vadd.f32 %v4745_v22, %v2349_v11  ;;  %v2360_v43 = vpop.f32.mrf.mxu0  ;;  %v2449_v22 = vpop.f32.mrf.mxu1  ;;  %v5143_v11 = vld [vmem:[#allocation67_spill] sm:$0xff] }
 0x40a   : > { %v2499_v32 = vmax.f32 %v2438_v15, 0.0 }
 0x40b   : > { %v2261_v14 = vpop.f32.mrf.mxu3 }
 0x40c   : > { %v2262_v30 = vadd.f32 %v2261_v14, %v2173_v25  ;;  %v2092_v25 = vadd.f32 %v5143_v11, %v2003_v36  ;;  %v5144_v14 = vld [vmem:[#allocation34_spill] sm:$0xff]  ;;  %v3481_v11 = vld [vmem:[%s3877_s15] sm:$0xff] }
 0x40d   : > { %v2005_v50 = vadd.f32 %v5144_v14, %v4563_v19  ;;  %v5146_v19 = vld [vmem:[#allocation37_spill] sm:$0xff] }
 0x40e   : > { %v2351_v12 = vadd.f32 %v4753_v21, %v2262_v30  ;;  %v5141_v21 = vld [vmem:[#allocation65_spill] sm:$0xff]  ;;  %v4802_v23 = vpop.f32.mrf.mxu2  ;;  %v2181_v30 = vadd.f32 %v4646_v3, %v2092_v25  ;;  %v2008_v7 = vadd.f32 %v5146_v19, %v4569_v28 }
 0x410   : > { %v2440_v33 = vadd.f32 %v4757_v37, %v2351_v12  ;;  %2303 = vmatmul.bf16.gmra.mxu3 %v1103_v10  ;;  %v2089_v37 = vadd.f32 %v5141_v21, %v2000_v42  ;;  %v2363_v8 = vpop.f32.mrf.mxu0  ;;  %v2452_v16 = vpop.f32.mrf.mxu1  ;;  %v5145_v10 = vld [vmem:[#allocation69_spill] sm:$0xff] }
 0x411   : > { %v2094_v15 = vadd.f32 %v5145_v10, %v2005_v50 }
 0x412   : > { %v2500_v56 = vmax.f32 %v2440_v33, 0.0  ;;  %v2178_v18 = vadd.f32 %v4639_v17, %v2089_v37 }
 0x413   : > { %v2264_v39 = vpop.f32.mrf.mxu3  ;;  %v2183_v33 = vadd.f32 %v4657_v57, %v2094_v15 }
 0x414   : > { %v2525_v54 = vpack.c.bf16 %v2500_v56, %v2499_v32  ;;  %v2265_v60 = vadd.f32 %v2264_v39, %v2176_v38  ;;  %v5147_v56 = vld [vmem:[#allocation71_spill] sm:$0xff] }
 0x415   : > { %v2097_v39 = vadd.f32 %v5147_v56, %v2008_v7 }
 0x416   : > { %2641 = vmatmul.bf16.gmra.mxu2 %v2525_v54  ;;  %v2354_v53 = vadd.f32 %v2353_v63, %v2265_v60  ;;  %v4809_v12 = vpop.f32.mrf.mxu2  ;;  %v5148_v60 = vld [vmem:[#allocation40_spill] sm:$0xff] }
 0x417   : > { %v2010_v21 = vadd.f32 %v5148_v60, %v4574_v4 }
 0x418   : > { %v2443_v20 = vadd.f32 %v2442_v9, %v2354_v53  ;;  %v2365_v9 = vpop.f32.mrf.mxu0 }
 0x41a   : > { %v2501_v63 = vmax.f32 %v2443_v20, 0.0 }
 0x41b   : > { %v2266_v45 = vpop.f32.mrf.mxu3 }
 0x41c   : > { %v2267_v34 = vadd.f32 %v2266_v45, %v2178_v18  ;;  %v2186_v18 = vadd.f32 %v4669_v52, %v2097_v39  ;;  %v5150_v52 = vld [vmem:[#allocation43_spill] sm:$0xff] }
 0x41e   : > { %v2356_v6 = vadd.f32 %v2355_v40, %v2267_v34  ;;  %v2454_v40 = vpop.f32.mrf.mxu1  ;;  %v4815_v38 = vpop.f32.mrf.mxu2 }
 0x420   : > { %v2445_v58 = vadd.f32 %v2444_v35, %v2356_v6  ;;  %v2368_v54 = vpop.f32.mrf.mxu0 }
 0x422   : > { %v2502_v26 = vmax.f32 %v2445_v58, 0.0  ;;  %v2013_v58 = vadd.f32 %v5150_v52, %v4580_v24  ;;  %v5158_v52 = vld [vmem:[#allocation52_spill] sm:$0xff] }
 0x423   : > { %v2269_v17 = vpop.f32.mrf.mxu3 }
 0x424   : > { %v2526_v2 = vpack.c.bf16 %v2502_v26, %v2501_v63  ;;  %v2270_v44 = vadd.f32 %v2269_v17, %v2181_v30 }
 0x426   : > { %2646 = vmatmul.bf16.gmra.mxu2 %v2526_v2  ;;  %v2359_v35 = vadd.f32 %v2358_v47, %v2270_v44  ;;  %v2457_v57 = vpop.f32.mrf.mxu1  ;;  %v5152_v44 = vld [vmem:[#allocation46_spill] sm:$0xff] }
 0x427   : > { %v2015_v24 = vadd.f32 %v5152_v44, %v4585_v29 }
 0x428   : > { %v2448_v42 = vadd.f32 %v2447_v41, %v2359_v35  ;;  %v4823_v41 = vld [vmem:[%s5015_s6] ss:$0 sm:$0xff]  ;;  %v2370_v20 = vpop.f32.mrf.mxu0 }
 0x42a   : > { %v2503_v37 = vmax.f32 %v2448_v42, 0.0  ;;  %v5153_v42 = vld [vmem:[#allocation74_spill] sm:$0xff] }
 0x42b   : > { %v2271_v48 = vpop.f32.mrf.mxu3 }
 0x42c   : > { %v2272_v1 = vadd.f32 %v2271_v48, %v2183_v33  ;;  %v3482_v33 = vld [vmem:[%s3877_s15 + $0x8] sm:$0xff] }
 0x42e   : > { %v2361_v32 = vadd.f32 %v2360_v43, %v2272_v1  ;;  %v5149_v43 = vld [vmem:[#allocation72_spill] sm:$0xff]  ;;  %v2459_v50 = vpop.f32.mrf.mxu1 }
 0x430   : > { %v2450_v3 = vadd.f32 %v2449_v22, %v2361_v32  ;;  %v2099_v22 = vadd.f32 %v5149_v43, %v2010_v21  ;;  %v2373_v7 = vpop.f32.mrf.mxu0  ;;  %v2104_v32 = vadd.f32 %v5153_v42, %v2015_v24 }
 0x432   : > { %v2504_v47 = vmax.f32 %v2450_v3, 0.0  ;;  %v2188_v34 = vadd.f32 %v4683_v59, %v2099_v22  ;;  %v5151_v59 = vld [vmem:[#allocation73_spill] sm:$0xff]  ;;  %v2193_v60 = vadd.f32 %v4709_v0, %v2104_v32  ;;  %v5157_v0 = vld [vmem:[#allocation86_spill] sm:$0xff] }
 0x433   : > { %v2274_v53 = vpop.f32.mrf.mxu3  ;;  %v2102_v30 = vadd.f32 %v5151_v59, %v2013_v58  ;;  %v2020_v58 = vadd.f32 %v5158_v52, %v5157_v0  ;;  %v5159_v59 = vld [vmem:[#allocation76_spill] sm:$0xff] }
 0x434   : > { %v2527_v28 = vpack.c.bf16 %v2504_v47, %v2503_v37  ;;  %v2275_v45 = vadd.f32 %v2274_v53, %v2186_v18  ;;  %v5154_v37 = vld [vmem:[#allocation85_spill] sm:$0xff]  ;;  %v3483_v53 = vld [vmem:[%s3877_s15 + $0x10] sm:$0xff]  ;;  %v5165_v52 = vld [vmem:[#allocation88_spill] sm:$0xff] }
 0x435   : > { %v2191_v48 = vadd.f32 %v4697_v46, %v2102_v30  ;;  %v5155_v47 = vld [vmem:[#allocation49_spill] sm:$0xff]  ;;  %v2109_v30 = vadd.f32 %v5159_v59, %v2020_v58  ;;  %v5166_v58 = vld [vmem:[#allocation60_spill] sm:$0xff] }
 0x436   : > { %2651 = vmatmul.bf16.gmra.mxu2 %v2527_v28  ;;  %v2364_v4 = vadd.f32 %v2363_v8, %v2275_v45  ;;  %v2462_v3 = vpop.f32.mrf.mxu1  ;;  %v2018_v46 = vadd.f32 %v5155_v47, %v5154_v37 }
 0x438   : > { %v2453_v63 = vadd.f32 %v2452_v16, %v2364_v4 }
 0x439   : > { %v2612_v5 = vpop.f32.mrf.mxu2 }
 0x43a   : > { %v2613_v36 = vadd.f32 %v4823_v41, %v2612_v5  ;;  %v2505_v10 = vmax.f32 %v2453_v63, 0.0  ;;  %v2375_v5 = vpop.f32.mrf.mxu0 }
 0x43b   : > { %v2276_v6 = vpop.f32.mrf.mxu3 }
 0x43c   : > { %v2692_v25 = vadd.f32 %v3481_v11, %v2613_v36  ;;  %v2277_v14 = vadd.f32 %v2276_v6, %v2188_v34  ;;  %v5156_v36 = vld [vmem:[#allocation75_spill] sm:$0xff] }
 0x43e   : > { %v2724_v26 = vmax.f32 %v2692_v25, 0.0  ;;  %v2366_v17 = vadd.f32 %v2365_v9, %v2277_v14  ;;  %v2464_v34 = vpop.f32.mrf.mxu1 }
 0x440   : > { %2756 = vst [vmem:[%s4833_s20] sm:$0xff] %v2724_v26  ;;  %v2455_v8 = vadd.f32 %v2454_v40, %v2366_v17  ;;  %v3484_v26 = vld [vmem:[%s3877_s15 + $0x18] sm:$0xff] }
 0x441   : > { %v2614_v2 = vpop.f32.mrf.mxu2 }
 0x442   : > { %v2506_v15 = vmax.f32 %v2455_v8, 0.0  ;;  %v2615_v35 = vadd.f32 %v4823_v41, %v2614_v2  ;;  %v2378_v2 = vpop.f32.mrf.mxu0 }
 0x443   : > { %v2279_v16 = vpop.f32.mrf.mxu3 }
 0x444   : > { %v2693_v9 = vadd.f32 %v3482_v33, %v2615_v35  ;;  %v2528_v19 = vpack.c.bf16 %v2506_v15, %v2505_v10  ;;  %v2280_v1 = vadd.f32 %v2279_v16, %v2191_v48  ;;  %v2198_v15 = vadd.f32 %v4737_v62, %v2109_v30  ;;  %v5160_v33 = vld [vmem:[#allocation87_spill] sm:$0xff]  ;;  %v3485_v48 = vld [vmem:[%s3877_s15 + $0x20] sm:$0xff] }
 0x446   : > { %v2725_v40 = vmax.f32 %v2693_v9, 0.0  ;;  %2656 = vmatmul.bf16.gmra.mxu2 %v2528_v19  ;;  %v2369_v56 = vadd.f32 %v2368_v54, %v2280_v1  ;;  %v2107_v54 = vadd.f32 %v5156_v36, %v2018_v46  ;;  %v2467_v35 = vpop.f32.mrf.mxu1  ;;  %v5161_v9 = vld [vmem:[#allocation55_spill] sm:$0xff] }
 0x448   : > { %2757 = vst [vmem:[%s4833_s20 + $0x8] sm:$0xff] %v2725_v40  ;;  %v2458_v45 = vadd.f32 %v2457_v57, %v2369_v56  ;;  %v5162_v56 = vld [vmem:[#allocation77_spill] sm:$0xff] }
 0x449   : > { %v2617_v29 = vpop.f32.mrf.mxu2 }
 0x44a   : > { %v2618_v39 = vadd.f32 %v4823_v41, %v2617_v29  ;;  %v2507_v11 = vmax.f32 %v2458_v45, 0.0  ;;  %v2380_v46 = vpop.f32.mrf.mxu0 }
 0x44b   : > { %v2281_v21 = vpop.f32.mrf.mxu3 }
 0x44c   : > { %v2694_v18 = vadd.f32 %v3483_v53, %v2618_v39  ;;  %v2282_v28 = vadd.f32 %v2281_v21, %v2193_v60  ;;  %v5163_v60 = vld [vmem:[#allocation58_spill] sm:$0xff] }
 0x44d   : > { %v2025_v62 = vadd.f32 %v5163_v60, %v4613_v51 }
 0x44e   : > { %v2726_v43 = vmax.f32 %v2694_v18, 0.0  ;;  %v2371_v22 = vadd.f32 %v2370_v20, %v2282_v28  ;;  %v2196_v20 = vadd.f32 %v4724_v13, %v2107_v54  ;;  %v2023_v13 = vadd.f32 %v5161_v9, %v5160_v33  ;;  %v3486_v18 = vld [vmem:[%s3877_s15 + $0x28] sm:$0xff]  ;;  %v3488_v33 = vld [vmem:[%s3877_s15 + $0x38] sm:$0xff] }
 0x450   : > { %2758 = vst [vmem:[%s4833_s20 + $0x10] sm:$0xff] %v2726_v43  ;;  %v2460_v4 = vadd.f32 %v2459_v50, %v2371_v22  ;;  %v2469_v43 = vpop.f32.mrf.mxu1 }
 0x451   : > { %v2619_v6 = vpop.f32.mrf.mxu2 }
 0x452   : > { %v2508_v25 = vmax.f32 %v2460_v4, 0.0  ;;  %v2620_v14 = vadd.f32 %v4823_v41, %v2619_v6  ;;  %v5164_v4 = vld [vmem:[#allocation78_spill] sm:$0xff] }
 0x453   : > { %v2284_v63 = vpop.f32.mrf.mxu3  ;;  %v2114_v36 = vadd.f32 %v5164_v4, %v2025_v62  ;;  %v5171_v62 = vld [vmem:[#allocation90_spill] sm:$0xff]  ;;  %v5174_v4 = vld [vmem:[#allocation91_spill] sm:$0xff] }
 0x454   : > { %v2695_v57 = vadd.f32 %v3484_v26, %v2620_v14  ;;  %v2529_v17 = vpack.c.bf16 %v2508_v25, %v2507_v11  ;;  %v2285_v8 = vadd.f32 %v2284_v63, %v2196_v20  ;;  %v2028_v11 = vadd.f32 %v5166_v58, %v5165_v52  ;;  %v2383_v63 = vpop.f32.mrf.mxu0  ;;  %v3490_v52 = vld [vmem:[%s3877_s15 + $0x48] sm:$0xff] }
 0x455   : > { %v2203_v6 = vadd.f32 %v4765_v49, %v2114_v36  ;;  %v5168_v49 = vld [vmem:[#allocation89_spill] sm:$0xff] }
 0x456   : > { %v2727_v50 = vmax.f32 %v2695_v57, 0.0  ;;  %2661 = vmatmul.bf16.gmra.mxu2 %v2529_v17  ;;  %v2374_v24 = vadd.f32 %v2373_v7, %v2285_v8  ;;  %v2112_v7 = vadd.f32 %v5162_v56, %v2023_v13  ;;  %v5167_v8 = vld [vmem:[#allocation79_spill] sm:$0xff] }
 0x457   : > { %v2117_v59 = vadd.f32 %v5167_v8, %v2028_v11 }
 0x458   : > { %2759 = vst [vmem:[%s4833_s20 + $0x18] sm:$0xff] %v2727_v50  ;;  %v2463_v1 = vadd.f32 %v2462_v3, %v2374_v24  ;;  %v2201_v28 = vadd.f32 %v4749_v31, %v2112_v7  ;;  %v3487_v31 = vld [vmem:[%s3877_s15 + $0x30] sm:$0xff]  ;;  %v2472_v17 = vpop.f32.mrf.mxu1 }
 0x459   : > { %v2622_v44 = vpop.f32.mrf.mxu2 }
 0x45a   : > { %v2623_v10 = vadd.f32 %v4823_v41, %v2622_v44  ;;  %v2509_v21 = vmax.f32 %v2463_v1, 0.0 }
 0x45b   : > { %v2286_v16 = vpop.f32.mrf.mxu3 }
 0x45c   : > { %v2696_v19 = vadd.f32 %v3485_v48, %v2623_v10  ;;  %v2287_v40 = vadd.f32 %v2286_v16, %v2198_v15 }
 0x45e   : > { %v2728_v42 = vmax.f32 %v2696_v19, 0.0  ;;  %v2376_v32 = vadd.f32 %v2375_v5, %v2287_v40  ;;  %v5170_v40 = vld [vmem:[#allocation80_spill] sm:$0xff] }
 0x460   : > { %2760 = vst [vmem:[%s4833_s20 + $0x20] sm:$0xff] %v2728_v42  ;;  %v2465_v29 = vadd.f32 %v2464_v34, %v2376_v32  ;;  %v2385_v42 = vpop.f32.mrf.mxu0  ;;  %v2474_v32 = vpop.f32.mrf.mxu1 }
 0x461   : > { %v2624_v39 = vpop.f32.mrf.mxu2 }
 0x462   : > { %v2510_v37 = vmax.f32 %v2465_v29, 0.0  ;;  %v2625_v47 = vadd.f32 %v4823_v41, %v2624_v39 }
 0x463   : > { %v2289_v53 = vpop.f32.mrf.mxu3 }
 0x464   : > { %v2697_v3 = vadd.f32 %v3486_v18, %v2625_v47  ;;  %v2530_v45 = vpack.c.bf16 %v2510_v37, %v2509_v21  ;;  %v2290_v5 = vadd.f32 %v2289_v53, %v2201_v28  ;;  %v5172_v21 = vld [vmem:[#allocation64_spill] sm:$0xff] }
 0x465   : > { %v3489_v37 = vld [vmem:[%s3877_s15 + $0x40] sm:$0xff] }
 0x466   : > { %v2729_v22 = vmax.f32 %v2697_v3, 0.0  ;;  %2666 = vmatmul.bf16.gmra.mxu2 %v2530_v45  ;;  %v2379_v54 = vadd.f32 %v2378_v2, %v2290_v5  ;;  %v5169_v2 = vld [vmem:[#allocation62_spill] sm:$0xff]  ;;  %v5173_v45 = vld [vmem:[#allocation81_spill] sm:$0xff] }
 0x467   : > { %v2030_v44 = vadd.f32 %v5169_v2, %v5168_v49  ;;  %v5178_v49 = vld [vmem:[#allocation68_spill] sm:$0xff] }
 0x468   : > { %2761 = vst [vmem:[%s4833_s20 + $0x28] sm:$0xff] %v2729_v22  ;;  %v2468_v26 = vadd.f32 %v2467_v35, %v2379_v54  ;;  %v2206_v35 = vadd.f32 %v4773_v61, %v2117_v59  ;;  %v2033_v61 = vadd.f32 %v5172_v21, %v5171_v62  ;;  %v2388_v22 = vpop.f32.mrf.mxu0 }
 0x469   : > { %v2627_v51 = vpop.f32.mrf.mxu2  ;;  %v2119_v1 = vadd.f32 %v5170_v40, %v2030_v44 }
 0x46a   : > { %v2628_v34 = vadd.f32 %v4823_v41, %v2627_v51  ;;  %v2511_v24 = vmax.f32 %v2468_v26, 0.0 }
 0x46b   : > { %v2291_v0 = vpop.f32.mrf.mxu3  ;;  %v2208_v39 = vadd.f32 %v4783_v27, %v2119_v1  ;;  %v5175_v27 = vld [vmem:[#allocation66_spill] sm:$0xff] }
 0x46c   : > { %v2698_v25 = vadd.f32 %v3487_v31, %v2628_v34  ;;  %v2292_v14 = vadd.f32 %v2291_v0, %v2203_v6  ;;  %v2035_v36 = vadd.f32 %v5175_v27, %v5174_v4  ;;  %v2477_v6 = vpop.f32.mrf.mxu1 }
 0x46e   : > { %v2730_v57 = vmax.f32 %v2698_v25, 0.0  ;;  %v2381_v20 = vadd.f32 %v2380_v46, %v2292_v14 }
 0x470   : > { %2762 = vst [vmem:[%s4833_s20 + $0x30] sm:$0xff] %v2730_v57  ;;  %v2470_v50 = vadd.f32 %v2469_v43, %v2381_v20  ;;  %v2122_v43 = vadd.f32 %v5173_v45, %v2033_v61  ;;  %v2390_v8 = vpop.f32.mrf.mxu0 }
 0x471   : > { %v2629_v30 = vpop.f32.mrf.mxu2 }
 0x472   : > { %v2512_v10 = vmax.f32 %v2470_v50, 0.0  ;;  %v2630_v15 = vadd.f32 %v4823_v41, %v2629_v30  ;;  %v2211_v11 = vadd.f32 %v4793_v55, %v2122_v43  ;;  %v5177_v30 = vld [vmem:[#allocation92_spill] sm:$0xff]  ;;  %v3491_v55 = vld [vmem:[%s3877_s15 + $0x50] sm:$0xff] }
 0x473   : > { %v2294_v16 = vpop.f32.mrf.mxu3  ;;  %v2038_v2 = vadd.f32 %v5178_v49, %v5177_v30  ;;  %v3493_v43 = vld [vmem:[%s3877_s15 + $0x60] sm:$0xff] }
 0x474   : > { %v2699_v9 = vadd.f32 %v3488_v33, %v2630_v15  ;;  %v2531_v13 = vpack.c.bf16 %v2512_v10, %v2511_v24  ;;  %v2295_v19 = vadd.f32 %v2294_v16, %v2206_v35  ;;  %v2479_v10 = vpop.f32.mrf.mxu1  ;;  %v5179_v35 = vld [vmem:[#allocation83_spill] sm:$0xff] }
 0x476   : > { %v2731_v48 = vmax.f32 %v2699_v9, 0.0  ;;  %2671 = vmatmul.bf16.gmra.mxu2 %v2531_v13  ;;  %v2384_v56 = vadd.f32 %v2383_v63, %v2295_v19  ;;  %v5176_v63 = vld [vmem:[#allocation82_spill] sm:$0xff]  ;;  %v2127_v13 = vadd.f32 %v5179_v35, %v2038_v2  ;;  %v5180_v19 = vld [vmem:[#allocation93_spill] sm:$0xff]  ;;  %v3497_v2 = vld [vmem:[%s3877_s15 + $0x80] sm:$0xff] }
 0x477   : > { %v2124_v26 = vadd.f32 %v5176_v63, %v2035_v36  ;;  %v3495_v63 = vld [vmem:[%s3877_s15 + $0x70] sm:$0xff] }
 0x478   : > { %2763 = vst [vmem:[%s4833_s20 + $0x38] sm:$0xff] %v2731_v48  ;;  %v2473_v53 = vadd.f32 %v2472_v17, %v2384_v56 }
 0x479   : > { %v2632_v29 = vpop.f32.mrf.mxu2  ;;  %v2213_v50 = vadd.f32 %v4802_v23, %v2124_v26  ;;  %v5181_v23 = vld [vmem:[#allocation70_spill] sm:$0xff] }
 0x47a   : > { %v2633_v7 = vadd.f32 %v4823_v41, %v2632_v29  ;;  %v2513_v51 = vmax.f32 %v2473_v53, 0.0  ;;  %v2040_v40 = vadd.f32 %v5181_v23, %v5180_v19  ;;  %v2393_v29 = vpop.f32.mrf.mxu0 }
 0x47b   : > { %v2296_v60 = vpop.f32.mrf.mxu3 }
 0x47c   : > { %v2700_v47 = vadd.f32 %v3489_v37, %v2633_v7  ;;  %v2297_v46 = vadd.f32 %v2296_v60, %v2208_v39  ;;  %v3492_v7 = vld [vmem:[%s3877_s15 + $0x58] sm:$0xff]  ;;  %v2216_v60 = vadd.f32 %v4809_v12, %v2127_v13  ;;  %v2482_v21 = vpop.f32.mrf.mxu1  ;;  %v3499_v13 = vld [vmem:[%s3877_s15 + $0x90] sm:$0xff] }
 0x47e   : > { %v2732_v18 = vmax.f32 %v2700_v47, 0.0  ;;  %v2386_v3 = vadd.f32 %v2385_v42, %v2297_v46  ;;  %v5182_v47 = vld [vmem:[#allocation84_spill] sm:$0xff] }
 0x47f   : > { %v2129_v46 = vadd.f32 %v5182_v47, %v2040_v40 }
 0x480   : > { %2764 = vst [vmem:[%s4833_s20 + $0x40] sm:$0xff] %v2732_v18  ;;  %v2475_v28 = vadd.f32 %v2474_v32, %v2386_v3 }
 0x481   : > { %v2634_v5 = vpop.f32.mrf.mxu2 }
 0x482   : > { %v2514_v54 = vmax.f32 %v2475_v28, 0.0  ;;  %v2635_v34 = vadd.f32 %v4823_v41, %v2634_v5  ;;  %v2218_v28 = vadd.f32 %v4815_v38, %v2129_v46  ;;  %v2395_v5 = vpop.f32.mrf.mxu0 }
 0x483   : > { %v2299_v0 = vpop.f32.mrf.mxu3 }
 0x484   : > { %v2701_v58 = vadd.f32 %v3490_v52, %v2635_v34  ;;  %v2532_v31 = vpack.c.bf16 %v2514_v54, %v2513_v51  ;;  %v2300_v14 = vadd.f32 %v2299_v0, %v2211_v11  ;;  %v2484_v51 = vpop.f32.mrf.mxu1  ;;  %v3494_v52 = vld [vmem:[%s3877_s15 + $0x68] sm:$0xff] }
 0x486   : > { %v2733_v25 = vmax.f32 %v2701_v58, 0.0  ;;  %2676 = vmatmul.bf16.gmra.mxu2 %v2532_v31  ;;  %v2389_v20 = vadd.f32 %v2388_v22, %v2300_v14 }
 0x488   : > { %2765 = vst [vmem:[%s4833_s20 + $0x48] sm:$0xff] %v2733_v25  ;;  %v2478_v15 = vadd.f32 %v2477_v6, %v2389_v20 }
 0x489   : > { %v2637_v57 = vpop.f32.mrf.mxu2 }
 0x48a   : > { %v2638_v17 = vadd.f32 %v4823_v41, %v2637_v57  ;;  %v2515_v1 = vmax.f32 %v2478_v15, 0.0  ;;  %v3498_v15 = vld [vmem:[%s3877_s15 + $0x88] sm:$0xff] }
 0x48b   : > { %v2301_v59 = vpop.f32.mrf.mxu3 }
 0x48c   : > { %v2702_v44 = vadd.f32 %v3491_v55, %v2638_v17  ;;  %v2302_v24 = vadd.f32 %v2301_v59, %v2213_v50  ;;  %v3496_v50 = vld [vmem:[%s3877_s15 + $0x78] sm:$0xff] }
 0x48e   : > { %v2734_v16 = vmax.f32 %v2702_v44, 0.0  ;;  %v2391_v33 = vadd.f32 %v2390_v8, %v2302_v24 }
 0x490   : > { %2766 = vst [vmem:[%s4833_s20 + $0x50] sm:$0xff] %v2734_v16  ;;  %v2480_v9 = vadd.f32 %v2479_v10, %v2391_v33 }
 0x491   : > { %v2639_v48 = vpop.f32.mrf.mxu2 }
 0x492   : > { %v2516_v42 = vmax.f32 %v2480_v9, 0.0  ;;  %v2640_v32 = vadd.f32 %v4823_v41, %v2639_v48 }
 0x493   : > { %v2304_v56 = vpop.f32.mrf.mxu3 }
 0x494   : > { %v2703_v39 = vadd.f32 %v3492_v7, %v2640_v32  ;;  %v2533_v62 = vpack.c.bf16 %v2516_v42, %v2515_v1  ;;  %v2305_v37 = vadd.f32 %v2304_v56, %v2216_v60  ;;  %v3500_v1 = vld [vmem:[%s3877_s15 + $0x98] sm:$0xff]  ;;  %v3501_v7 = vld [vmem:[%s3877_s15 + $0xa0] sm:$0xff] }
 0x496   : > { %v2735_v61 = vmax.f32 %v2703_v39, 0.0  ;;  %2681 = vmatmul.bf16.gmra.mxu2 %v2533_v62  ;;  %v2394_v18 = vadd.f32 %v2393_v29, %v2305_v37 }
 0x498   : > { %2767 = vst [vmem:[%s4833_s20 + $0x58] sm:$0xff] %v2735_v61  ;;  %v2483_v4 = vadd.f32 %v2482_v21, %v2394_v18  ;;  %v3502_v61 = vld [vmem:[%s3877_s15 + $0xa8] sm:$0xff]  ;;  %v3503_v18 = vld [vmem:[%s3877_s15 + $0xb0] sm:$0xff] }
 0x499   : > { %v2642_v53 = vpop.f32.mrf.mxu2 }
 0x49a   : > { %v2643_v3 = vadd.f32 %v4823_v41, %v2642_v53  ;;  %v2517_v6 = vmax.f32 %v2483_v4, 0.0 }
 0x49b   : > { %v2306_v45 = vpop.f32.mrf.mxu3 }
 0x49c   : > { %v2704_v22 = vadd.f32 %v3493_v43, %v2643_v3  ;;  %v2307_v12 = vadd.f32 %v2306_v45, %v2218_v28 }
 0x49e   : > { %v2736_v27 = vmax.f32 %v2704_v22, 0.0  ;;  %v2396_v36 = vadd.f32 %v2395_v5, %v2307_v12  ;;  %v3504_v22 = vld [vmem:[%s3877_s15 + $0xb8] sm:$0xff] }
 0x4a0   : > { %2768 = vst [vmem:[%s4833_s20 + $0x60] sm:$0xff] %v2736_v27  ;;  %v2485_v54 = vadd.f32 %v2484_v51, %v2396_v36  ;;  %v3505_v36 = vld [vmem:[%s3877_s15 + $0xc0] sm:$0xff] }
 0x4a1   : > { %v2644_v34 = vpop.f32.mrf.mxu2 }
 0x4a2   : > { %v2518_v0 = vmax.f32 %v2485_v54, 0.0  ;;  %v2645_v38 = vadd.f32 %v4823_v41, %v2644_v34 }
 0x4a4   : > { %v2705_v58 = vadd.f32 %v3494_v52, %v2645_v38  ;;  %v2534_v11 = vpack.c.bf16 %v2518_v0, %v2517_v6  ;;  %v3506_v0 = vld [vmem:[%s3877_s15 + $0xc8] sm:$0xff] }
 0x4a6   : > { %v2737_v31 = vmax.f32 %v2705_v58, 0.0  ;;  %2686 = vmatmul.bf16.gmra.mxu2 %v2534_v11 }
 0x4a8   : > { %2769 = vst [vmem:[%s4833_s20 + $0x68] sm:$0xff] %v2737_v31  ;;  %v3507_v31 = vld [vmem:[%s3877_s15 + $0xd0] sm:$0xff] }
 0x4a9   : > { %v2647_v25 = vpop.f32.mrf.mxu2 }
 0x4aa   : > { %v2648_v14 = vadd.f32 %v4823_v41, %v2647_v25 }
 0x4ac   : > { %v2706_v26 = vadd.f32 %v3495_v63, %v2648_v14 }
 0x4ae   : > { %v2738_v57 = vmax.f32 %v2706_v26, 0.0 }
 0x4b0   : > { %2770 = vst [vmem:[%s4833_s20 + $0x70] sm:$0xff] %v2738_v57  ;;  %v3508_v57 = vld [vmem:[%s3877_s15 + $0xd8] sm:$0xff] }
 0x4b1   : > { %v2649_v20 = vpop.f32.mrf.mxu2 }
 0x4b2   : > { %v2650_v17 = vadd.f32 %v4823_v41, %v2649_v20 }
 0x4b4   : > { %v2707_v8 = vadd.f32 %v3496_v50, %v2650_v17 }
 0x4b6   : > { %v2739_v59 = vmax.f32 %v2707_v8, 0.0 }
 0x4b8   : > { %2771 = vst [vmem:[%s4833_s20 + $0x78] sm:$0xff] %v2739_v59  ;;  %v3509_v59 = vld [vmem:[%s3877_s15 + $0xe0] sm:$0xff] }
 0x4b9   : > { %v2652_v30 = vpop.f32.mrf.mxu2 }
 0x4ba   : > { %v2653_v49 = vadd.f32 %v4823_v41, %v2652_v30 }
 0x4bc   : > { %v2708_v55 = vadd.f32 %v3497_v2, %v2653_v49 }
 0x4be   : > { %v2740_v44 = vmax.f32 %v2708_v55, 0.0 }
 0x4c0   : > { %2772 = vst [vmem:[%s4833_s20 + $0x80] sm:$0xff] %v2740_v44  ;;  %v3510_v44 = vld [vmem:[%s3877_s15 + $0xe8] sm:$0xff] }
 0x4c1   : > { %v2654_v24 = vpop.f32.mrf.mxu2 }
 0x4c2   : > { %v2655_v10 = vadd.f32 %v4823_v41, %v2654_v24 }
 0x4c4   : > { %v2709_v16 = vadd.f32 %v3498_v15, %v2655_v10 }
 0x4c6   : > { %v2741_v33 = vmax.f32 %v2709_v16, 0.0 }
 0x4c8   : > { %2773 = vst [vmem:[%s4833_s20 + $0x88] sm:$0xff] %v2741_v33  ;;  %v3511_v33 = vld [vmem:[%s3877_s15 + $0xf0] sm:$0xff] }
 0x4c9   : > { %v2657_v9 = vpop.f32.mrf.mxu2 }
 0x4ca   : > { %v2658_v35 = vadd.f32 %v4823_v41, %v2657_v9 }
 0x4cc   : > { %v2710_v48 = vadd.f32 %v3499_v13, %v2658_v35 }
 0x4ce   : > { %v2742_v19 = vmax.f32 %v2710_v48, 0.0 }
 0x4d0   : > { %2774 = vst [vmem:[%s4833_s20 + $0x90] sm:$0xff] %v2742_v19  ;;  %v3512_v19 = vld [vmem:[%s3877_s15 + $0xf8] sm:$0xff] }
 0x4d1   : > { %v2659_v23 = vpop.f32.mrf.mxu2 }
 0x4d2   : > { %v2660_v40 = vadd.f32 %v4823_v41, %v2659_v23 }
 0x4d4   : > { %v2711_v42 = vadd.f32 %v3500_v1, %v2660_v40 }
 0x4d6   : > { %v2743_v32 = vmax.f32 %v2711_v42, 0.0 }
 0x4d8   : > { %2775 = vst [vmem:[%s4833_s20 + $0x98] sm:$0xff] %v2743_v32 }
 0x4d9   : > { %v2662_v29 = vpop.f32.mrf.mxu2 }
 0x4da   : > { %v2663_v56 = vadd.f32 %v4823_v41, %v2662_v29 }
 0x4dc   : > { %v2712_v39 = vadd.f32 %v3501_v7, %v2663_v56 }
 0x4de   : > { %v2744_v60 = vmax.f32 %v2712_v39, 0.0 }
 0x4e0   : > { %2776 = vst [vmem:[%s4833_s20 + $0xa0] sm:$0xff] %v2744_v60 }
 0x4e1   : > { %v2664_v62 = vpop.f32.mrf.mxu2 }
 0x4e2   : > { %v2665_v21 = vadd.f32 %v4823_v41, %v2664_v62 }
 0x4e4   : > { %v2713_v37 = vadd.f32 %v3502_v61, %v2665_v21 }
 0x4e6   : > { %v2745_v47 = vmax.f32 %v2713_v37, 0.0 }
 0x4e8   : > { %2777 = vst [vmem:[%s4833_s20 + $0xa8] sm:$0xff] %v2745_v47 }
 0x4e9   : > { %v2667_v46 = vpop.f32.mrf.mxu2 }
 0x4ea   : > { %v2668_v53 = vadd.f32 %v4823_v41, %v2667_v46 }
 0x4ec   : > { %v2714_v3 = vadd.f32 %v3503_v18, %v2668_v53 }
 0x4ee   : > { %v2746_v28 = vmax.f32 %v2714_v3, 0.0 }
 0x4f0   : > { %2778 = vst [vmem:[%s4833_s20 + $0xb0] sm:$0xff] %v2746_v28 }
 0x4f1   : > { %v2669_v45 = vpop.f32.mrf.mxu2 }
 0x4f2   : > { %v2670_v43 = vadd.f32 %v4823_v41, %v2669_v45 }
 0x4f4   : > { %v2715_v12 = vadd.f32 %v3504_v22, %v2670_v43 }
 0x4f6   : > { %v2747_v5 = vmax.f32 %v2715_v12, 0.0 }
 0x4f8   : > { %2779 = vst [vmem:[%s4833_s20 + $0xb8] sm:$0xff] %v2747_v5 }
 0x4f9   : > { %v2672_v4 = vpop.f32.mrf.mxu2 }
 0x4fa   : > { %v2673_v27 = vadd.f32 %v4823_v41, %v2672_v4 }
 0x4fc   : > { %v2716_v51 = vadd.f32 %v3505_v36, %v2673_v27 }
 0x4fe   : > { %v2748_v54 = vmax.f32 %v2716_v51, 0.0 }
 0x500   : > { %2780 = vst [vmem:[%s4833_s20 + $0xc0] sm:$0xff] %v2748_v54 }
 0x501   : > { %v2674_v34 = vpop.f32.mrf.mxu2 }
 0x502   : > { %v2675_v6 = vadd.f32 %v4823_v41, %v2674_v34 }
 0x504   : > { %v2717_v38 = vadd.f32 %v3506_v0, %v2675_v6 }
 0x506   : > { %v2749_v52 = vmax.f32 %v2717_v38, 0.0 }
 0x508   : > { %2781 = vst [vmem:[%s4833_s20 + $0xc8] sm:$0xff] %v2749_v52 }
 0x509   : > { %v2677_v58 = vpop.f32.mrf.mxu2 }
 0x50a   : > { %v2678_v11 = vadd.f32 %v4823_v41, %v2677_v58 }
 0x50c   : > { %v2718_v25 = vadd.f32 %v3507_v31, %v2678_v11 }
 0x50e   : > { %v2750_v14 = vmax.f32 %v2718_v25, 0.0 }
 0x510   : > { %2782 = vst [vmem:[%s4833_s20 + $0xd0] sm:$0xff] %v2750_v14 }
 0x511   : > { %v2679_v63 = vpop.f32.mrf.mxu2 }
 0x512   : > { %v2680_v26 = vadd.f32 %v4823_v41, %v2679_v63 }
 0x514   : > { %v2719_v20 = vadd.f32 %v3508_v57, %v2680_v26 }
 0x516   : > { %v2751_v17 = vmax.f32 %v2719_v20, 0.0 }
 0x518   : > { %2783 = vst [vmem:[%s4833_s20 + $0xd8] sm:$0xff] %v2751_v17 }
 0x519   : > { %v2682_v50 = vpop.f32.mrf.mxu2 }
 0x51a   : > { %v2683_v8 = vadd.f32 %v4823_v41, %v2682_v50 }
 0x51c   : > { %v2720_v30 = vadd.f32 %v3509_v59, %v2683_v8 }
 0x51e   : > { %v2752_v49 = vmax.f32 %v2720_v30, 0.0 }
 0x520   : > { %2784 = vst [vmem:[%s4833_s20 + $0xe0] sm:$0xff] %v2752_v49 }
 0x521   : > { %v2684_v2 = vpop.f32.mrf.mxu2 }
 0x522   : > { %v2685_v55 = vadd.f32 %v4823_v41, %v2684_v2 }
 0x524   : > { %v2721_v24 = vadd.f32 %v3510_v44, %v2685_v55 }
 0x526   : > { %v2753_v10 = vmax.f32 %v2721_v24, 0.0 }
 0x528   : > { %2785 = vst [vmem:[%s4833_s20 + $0xe8] sm:$0xff] %v2753_v10 }
 0x529   : > { %v2687_v15 = vpop.f32.mrf.mxu2 }
 0x52a   : > { %v2688_v16 = vadd.f32 %v4823_v41, %v2687_v15 }
 0x52c   : > { %v2722_v9 = vadd.f32 %v3511_v33, %v2688_v16 }
 0x52e   : > { %v2754_v35 = vmax.f32 %v2722_v9, 0.0 }
 0x530   : > { %2786 = vst [vmem:[%s4833_s20 + $0xf0] sm:$0xff] %v2754_v35 }
 0x531   : > { %v2689_v13 = vpop.f32.mrf.mxu2 }
 0x532   : > { %v2690_v48 = vadd.f32 %v4823_v41, %v2689_v13 }
 0x534   : > { %v2723_v23 = vadd.f32 %v3512_v19, %v2690_v48 }
 0x536   : > { %v2755_v40 = vmax.f32 %v2723_v23, 0.0 }
 0x538   : > { %2787 = vst [vmem:[%s4833_s20 + $0xf8] sm:$0xff] %v2755_v40 }
 0x539   : > { %3660 = shalt.err (!%p3657_p10)
}
 0x53a   : > { %s3718_s22 = smov 128   ;;  %s3719_s15 = smov 8  }
 0x53b   : > { %3406 = dma.vmem_to_hbm [thread:$0]  (%p3843_p7), %s2802_s30, 4096, %s2804_s12, %s2789_s29, %s3718_s22, %s3718_s22, %s3719_s15  }
 0x53c PF: > { %s2818_s20 = sand.u32 1, %s3695_s24   ;;  %p5183_p12 = scmp.ge.s32.totalorder %s3707_s27, 2 }
 0x53d   : > { %s2819_s9 = scalar_lea.sflag [#allocation5], %s2818_s20 }
 0x53e   : > { %p3423_p13 = pnand %p5183_p12, %p3795_p6 }
 0x540   : > { %p3424_p0 = pneg %p3423_p13 }
 0x542   : > { %3690 = dma.done.wait (%p3424_p0), %s2819_s9, 4096  }
 0x543   : > { %3692 = vsyncadd (%p3424_p0), %s2819_s9, 4294963200  ;;  %p22_p3 = scmp.ge.s32.totalorder %s3827_s11, 4   ;;  %s5184_s24 = smov %s3699_s25 }
 0x544   : > { %s5185_s25 = smov %s3703_s26  ;;  %s5186_s26 = smov %s3839_s17 }
 0x545   : > { %s5187_s27 = smov %s3827_s11  ;;  %24 = sbr.rel (!%p22_p3) target bundleno = 9 (0x9), region = 107 }
 0x54a   :  { %2825 = vsyncpa [#allocation4], 1 }
 0x54b   :  { %2827 = vsyncpa [#allocation4 + $0x1], 1 }
 0x54c   :  { %2828 = vsyncpa [#allocation7], 1 }
 0x54d   :  { %2829 = vsyncpa [#allocation10], 1 }
 0x54e   :  { %2830 = vsyncpa [#allocation5], 1 }
 0x54f   :  { %2832 = vsyncpa [#allocation5 + $0x1], 1 }

</bundles_post_ra>
